<compile_context>
chip_gen: v7x
topology: tpu7x:2x2x1
jax: 0.10.0
libtpu: 0.0.40
codegen_flags: <defaults>
</compile_context>

<pallas_src>
import numpy as np
import jax
import jax.numpy as jnp
from jax.experimental import pallas as pl
from jax.experimental.pallas import tpu as pltpu


def _vmem_limit_bytes():
    """Scoped-VMEM limit derived per generation (v7x: 64 MiB/TC, v5e/v6e: 128)."""
    try:
        cap = getattr(pltpu.get_tpu_info(), "vmem_capacity_bytes", None)
    except Exception:
        cap = None
    if not cap:
        cap = 64 * 1024 * 1024  # conservative (v7x-sized) fallback
    # Leave headroom for double-buffering / compiler scratch.
    return min(int(cap * 0.75), 96 * 1024 * 1024)


def _bilinear_matrix(n_in, n_out):
    """(n_out, n_in) interpolation matrix: bilinear, align_corners=True."""
    if n_in == 1:
        return np.ones((n_out, 1), np.float32)
    src = np.arange(n_out, dtype=np.float64) * (n_in - 1) / (n_out - 1)
    lo = np.floor(src).astype(np.int64)
    hi = np.minimum(lo + 1, n_in - 1)
    frac = (src - lo).astype(np.float32)
    M = np.zeros((n_out, n_in), np.float32)
    M[np.arange(n_out), lo] += 1.0 - frac
    M[np.arange(n_out), hi] += frac
    return M


# ---------------------------------------------------------------------------
# Pallas kernel: fused bilinear 2x upsample (align_corners=True) + 1x1 conv.
# ---------------------------------------------------------------------------
def _up2x_conv1x1_kernel(x_ref, g_ref, mh_ref, b_ref, o_ref):
    """x_ref: (1, H, W*Cin) lane-dense input tile (one batch element)
    g_ref: (W*Cin, 2W*Cout) fused W-upsample + 1x1-conv operator
    mh_ref: (2H, H)         H-upsample interpolation matrix
    b_ref: (1, 2W*Cout)     conv bias tiled across output columns
    o_ref: (1, 2H, 2W*Cout) lane-dense output tile
    """
    t = jnp.dot(x_ref[0], g_ref[...], preferred_element_type=jnp.float32)
    y = jnp.dot(mh_ref[...], t, preferred_element_type=jnp.float32)
    o_ref[0] = (y + b_ref[...]).astype(o_ref.dtype)


# ---------------------------------------------------------------------------
# Wrapper (accepts NCHW like PyTorch, returns NCHW)
# ---------------------------------------------------------------------------
def output_block_forward(x_nchw, conv_w, conv_b):
    """x_nchw: (N, Cin, H, W); conv_w: (Cout, Cin) (1x1 kernel); conv_b: (Cout,)."""
    N, Cin, H, W = x_nchw.shape
    Cout = conv_w.shape[0]
    Ho, Wo = 2 * H, 2 * W

    # Lane-dense input: NCHW -> NHWC -> (N, H, W*Cin) (bit-identical to NHWC).
    x2d = jnp.transpose(x_nchw, (0, 2, 3, 1)).astype(jnp.float32)
    x2d = x2d.reshape(N, H, W * Cin)

    mh = jnp.asarray(_bilinear_matrix(H, Ho))          # (Ho, H)
    mw_t = jnp.asarray(_bilinear_matrix(W, Wo).T)      # (W, Wo)
    wc = conv_w.T.astype(jnp.float32)                  # (Cin, Cout)

    # Fused W-upsample + 1x1 conv:
    #   G[w*Cin + ci, ow*Cout + co] = Mw[ow, w] * Wc[ci, co]
    g = (mw_t[:, None, :, None] * wc[None, :, None, :]).reshape(W * Cin, Wo * Cout)
    b_flat = jnp.tile(conv_b.astype(jnp.float32), Wo)[None, :]   # (1, Wo*Cout)

    out = pl.pallas_call(
        _up2x_conv1x1_kernel,
        out_shape=jax.ShapeDtypeStruct((N, Ho, Wo * Cout), jnp.float32),
        grid=(N,),
        in_specs=[
            pl.BlockSpec((1, H, W * Cin), lambda n: (n, 0, 0)),
            pl.BlockSpec((W * Cin, Wo * Cout), lambda n: (0, 0)),
            pl.BlockSpec((Ho, H), lambda n: (0, 0)),
            pl.BlockSpec((1, Wo * Cout), lambda n: (0, 0)),
        ],
        out_specs=pl.BlockSpec((1, Ho, Wo * Cout), lambda n: (n, 0, 0)),
        compiler_params=pltpu.CompilerParams(
            dimension_semantics=("parallel",),
            vmem_limit_bytes=_vmem_limit_bytes()),
    )(x2d, g, mh, b_flat)

    # (N, Ho, Wo*Cout) is bit-identical to NHWC (N, Ho, Wo, Cout); back to NCHW.
    return jnp.transpose(out.reshape(N, Ho, Wo, Cout), (0, 3, 1, 2))


# ---------------------------------------------------------------------------
# Plain-JAX reference (PyTorch op order: upsample, then conv) for validation.
# ---------------------------------------------------------------------------
def output_block_reference(x_nchw, conv_w, conv_b):
    N, Cin, H, W = x_nchw.shape
    mh = jnp.asarray(_bilinear_matrix(H, 2 * H))
    mw = jnp.asarray(_bilinear_matrix(W, 2 * W))
    x = jnp.transpose(x_nchw, (0, 2, 3, 1)).astype(jnp.float32)
    up = jnp.einsum('oh,nhwc->nowc', mh, x)
    up = jnp.einsum('pw,nowc->nopc', mw, up)
    y = jnp.einsum('nhwc,co->nhwo', up, conv_w.T.astype(jnp.float32)) + conv_b
    return jnp.transpose(y, (0, 3, 1, 2))


# ---------------------------------------------------------------------------
if __name__ == "__main__":
    in_c, out_c = 64, 32
    N, H, W = 2, 16, 16

    key = jax.random.PRNGKey(0)
    kx, kw, kb = jax.random.split(key, 3)
    x = jax.random.normal(kx, (N, in_c, H, W), jnp.float32)
    conv_w = jax.random.normal(kw, (out_c, in_c), jnp.float32) / np.sqrt(in_c)
    conv_b = 0.01 * jax.random.normal(kb, (out_c,), jnp.float32)

    fwd = jax.jit(output_block_forward)
    out = jax.block_until_ready(fwd(x, conv_w, conv_b))

    assert out.shape == (N, out_c, 2 * H, 2 * W), out.shape
    assert bool(jnp.all(jnp.isfinite(out)))
    ref = output_block_reference(x, conv_w, conv_b)
    max_err = float(jnp.max(jnp.abs(out - ref)))
    assert max_err < 2e-4, f"mismatch vs reference: {max_err}"
    print("KERNEL_OK")
</pallas_src>

<mosaic_0001>
module attributes {stable_mosaic.version = 11 : i64} {
  func.func @_up2x_conv1x1_kernel(%arg0: i32, %arg1: memref<1x16x1024xf32, #tpu.memory_space<vmem>>, %arg2: memref<1024x1024xf32, #tpu.memory_space<vmem>>, %arg3: memref<32x16xf32, #tpu.memory_space<vmem>>, %arg4: memref<1x1024xf32, #tpu.memory_space<vmem>>, %arg5: memref<1x32x1024xf32, #tpu.memory_space<vmem>>) attributes {dimension_semantics = [#tpu.dimension_semantics<parallel>], iteration_bounds = array<i64: 2>, scalar_prefetch = 0 : i64, scratch_operands = 0 : i64, tpu.core_type = #tpu.core_type<tc>, window_params = [{transform_indices = @transform_0, window_bounds = array<i64: 1, 16, 1024>}, {pipeline_mode = #tpu.pipeline_mode<synchronous>, transform_indices = @transform_1, window_bounds = array<i64: 1024, 1024>}, {pipeline_mode = #tpu.pipeline_mode<synchronous>, transform_indices = @transform_2, window_bounds = array<i64: 32, 16>}, {pipeline_mode = #tpu.pipeline_mode<synchronous>, transform_indices = @transform_3, window_bounds = array<i64: 1, 1024>}, {transform_indices = @transform_4, window_bounds = array<i64: 1, 32, 1024>}]} {
    %c0 = arith.constant 0 : index
    %c0_0 = arith.constant 0 : index
    %c0_1 = arith.constant 0 : index
    %0 = vector.load %arg1[%c0, %c0_0, %c0_1] : memref<1x16x1024xf32, #tpu.memory_space<vmem>>, vector<1x16x1024xf32>
    %1 = vector.shape_cast %0 : vector<1x16x1024xf32> to vector<16x1024xf32>
    %c0_2 = arith.constant 0 : index
    %c0_3 = arith.constant 0 : index
    %2 = vector.load %arg2[%c0_2, %c0_3] : memref<1024x1024xf32, #tpu.memory_space<vmem>>, vector<1024x1024xf32>
    %cst = arith.constant dense<0.000000e+00> : vector<16x1024xf32>
    %3 = tpu.matmul %1, %2, %cst {dimension_numbers = #tpu.dot_dimension_numbers<[1], [0], [0], [1], [0, 0, 1, 1], [], []>} : vector<16x1024xf32>, vector<1024x1024xf32>, vector<16x1024xf32> -> vector<16x1024xf32>
    %c0_4 = arith.constant 0 : index
    %c0_5 = arith.constant 0 : index
    %4 = vector.load %arg3[%c0_4, %c0_5] : memref<32x16xf32, #tpu.memory_space<vmem>>, vector<32x16xf32>
    %cst_6 = arith.constant dense<0.000000e+00> : vector<32x1024xf32>
    %5 = tpu.matmul %4, %3, %cst_6 {dimension_numbers = #tpu.dot_dimension_numbers<[1], [0], [0], [1], [0, 0, 1, 1], [], []>} : vector<32x16xf32>, vector<16x1024xf32>, vector<32x1024xf32> -> vector<32x1024xf32>
    %c0_7 = arith.constant 0 : index
    %c0_8 = arith.constant 0 : index
    %6 = vector.load %arg4[%c0_7, %c0_8] : memref<1x1024xf32, #tpu.memory_space<vmem>>, vector<1x1024xf32>
    %7 = vector.broadcast %6 : vector<1x1024xf32> to vector<32x1024xf32>
    %8 = arith.addf %5, %7 : vector<32x1024xf32>
    %c0_9 = arith.constant 0 : index
    %c0_10 = arith.constant 0 : index
    %c0_11 = arith.constant 0 : index
    %9 = vector.load %arg5[%c0_9, %c0_10, %c0_11] : memref<1x32x1024xf32, #tpu.memory_space<vmem>>, vector<1x32x1024xf32>
    %10 = vector.shape_cast %9 : vector<1x32x1024xf32> to vector<32x1024xf32>
    %11 = vector.shape_cast %8 : vector<32x1024xf32> to vector<1x32x1024xf32>
    tpu.vector_store %arg5[%c0_9, %c0_10, %c0_11], %11 {strides = array<i32>} : memref<1x32x1024xf32, #tpu.memory_space<vmem>>, vector<1x32x1024xf32>,
    return
  }
  func.func @transform_0(%arg0: i32) -> (i32, i32, i32) {
    %c0_i32 = arith.constant 0 : i32
    %c0_i32_0 = arith.constant 0 : i32
    %c0_i32_1 = arith.constant 0 : i32
    return %arg0, %c0_i32, %c0_i32_0 : i32, i32, i32
  }
  func.func @transform_1(%arg0: i32) -> (i32, i32) {
    %c0_i32 = arith.constant 0 : i32
    %c0_i32_0 = arith.constant 0 : i32
    %c0_i32_1 = arith.constant 0 : i32
    return %c0_i32, %c0_i32_0 : i32, i32
  }
  func.func @transform_2(%arg0: i32) -> (i32, i32) {
    %c0_i32 = arith.constant 0 : i32
    %c0_i32_0 = arith.constant 0 : i32
    %c0_i32_1 = arith.constant 0 : i32
    return %c0_i32, %c0_i32_0 : i32, i32
  }
  func.func @transform_3(%arg0: i32) -> (i32, i32) {
    %c0_i32 = arith.constant 0 : i32
    %c0_i32_0 = arith.constant 0 : i32
    %c0_i32_1 = arith.constant 0 : i32
    return %c0_i32, %c0_i32_0 : i32, i32
  }
  func.func @transform_4(%arg0: i32) -> (i32, i32, i32) {
    %c0_i32 = arith.constant 0 : i32
    %c0_i32_0 = arith.constant 0 : i32
    %c0_i32_1 = arith.constant 0 : i32
    return %arg0, %c0_i32, %c0_i32_0 : i32, i32, i32
  }
}

</mosaic_0001>

<bundles_post_ra>
// kernel: tile.8
= control target key start
LH: loop header
LB: loop body
LE: loop exit
PB: predicated region body
PF: predicated region fallthrough
CT: control target
= control target key end

     0   :  { %s40_s0 = inlined_call_operand.vmem [shape: f32[32], index: 0, kind: input, shape index: {}]   ;;  %s41_s1 = inlined_call_operand.vmem [shape: f32[32,32], index: 1, kind: output, shape index: {}]  }
   0x1   :  { %v4_v0 = vld [vmem:[%s40_s0] ss:$0 sm:$0xff] }
   0x2   :  { %5 = vst [vmem:[%s41_s1] sm:$0xff] %v4_v0  ;;  %12 = vst [vmem:[%s41_s1 + $0x8] sm:$0xff] %v4_v0 }
   0x3   :  { %13 = vst [vmem:[%s41_s1 + $0x10] sm:$0xff] %v4_v0  ;;  %14 = vst [vmem:[%s41_s1 + $0x18] sm:$0xff] %v4_v0 }

// kernel: tile.9
= control target key start
LH: loop header
LB: loop body
LE: loop exit
PB: predicated region body
PF: predicated region fallthrough
CT: control target
= control target key end

     0   :  { %s93_s8 = smov 96   ;;  %vm3_vm0 = vcmask 261120   ;;  %s95_s15 = smov 64   ;;  %vm10_vm1 = vcmask 1048320   ;;  %vm17_vm2 = vcmask 785920   ;;  %vm24_vm3 = vcmask 523520   ;;  %s142_s0 = inlined_call_operand.vmem [shape: f32[32,32], index: 0, kind: input, shape index: {}]   ;;  %s143_s1 = inlined_call_operand.vmem [shape: f32[1,1024], index: 1, kind: output, shape index: {}]  }
   0x1   :  { %v80_v0 = vld [vmem:[%s142_s0 + $0x3] ss:$4 sm:$0xff]   ;;  %v82_v1 = vld [vmem:[%s142_s0 + $0x1] ss:$4 sm:$0xff]   ;;  %v2_v2 = vld [vmem:[%s142_s0] ss:$4 sm:$0xff]  }
   0x2   :  { %8 = vrot.lane.b32.xlu0 %v80_v0, %s93_s8  ;;  %v81_v3 = vld [vmem:[%s142_s0 + $0x2] ss:$4 sm:$0xff]   ;;  %s94_s0 = smov 32   ;;  %4 = vst.msk [vmem:[#allocation0] ss:$8 sm:$0xf] %vm3_vm0, %v2_v2  }
   0x3   :  { %22 = vrot.lane.b32.xlu1 %v82_v1, %s94_s0  ;;  %5 = vst.msk [vmem:[#allocation0] ss:$8 sm:$0xf0] %vm3_vm0, %v2_v2  }
   0x6   :  { %15 = vrot.lane.b32.xlu0 %v81_v3, %s95_s15 }
  0x74   :  { %v9_v4 = vpop.permute.xlu0 %8  }
  0x75   :  { %11 = vst.msk [vmem:[#allocation0] ss:$8 sm:$0xf] %vm10_vm1, %v9_v4   ;;  %12 = vst.msk [vmem:[#allocation0] ss:$8 sm:$0xf0] %vm10_vm1, %v9_v4   ;;  %v23_v5 = vpop.permute.xlu1 %22  }
  0x78   :  { %v16_v6 = vpop.permute.xlu0 %15  }
  0x79   :  { %18 = vst.msk [vmem:[#allocation0] ss:$8 sm:$0xf] %vm17_vm2, %v16_v6   ;;  %19 = vst.msk [vmem:[#allocation0] ss:$8 sm:$0xf0] %vm17_vm2, %v16_v6  }
  0x7a   :  { %25 = vst.msk [vmem:[#allocation0] ss:$8 sm:$0xf] %vm24_vm3, %v23_v5   ;;  %26 = vst.msk [vmem:[#allocation0] ss:$8 sm:$0xf0] %vm24_vm3, %v23_v5  }
  0x81   :  { %v30_v7 = vld [vmem:[#allocation0] sm:$0x1]  ;;  %v34_v8 = vld [vmem:[#allocation0 + $0x8] sm:$0x1]  ;;  %v39_v9 = vld [vmem:[#allocation0 + $0x10] sm:$0x1] }
  0x82   :  { %32 = vst [vmem:[%s143_s1] sm:$0x1] %v30_v7  ;;  %83 = vst [vmem:[%s143_s1 + $0x1] sm:$0x1] %v34_v8  ;;  %v45_v10 = vld [vmem:[#allocation0 + $0x18] sm:$0x1] }
  0x83   :  { %84 = vst [vmem:[%s143_s1 + $0x2] sm:$0x1] %v39_v9  ;;  %v51_v11 = vld [vmem:[#allocation0 + $0x20] sm:$0x1]  ;;  %v57_v12 = vld [vmem:[#allocation0 + $0x28] sm:$0x1] }
  0x84   :  { %85 = vst [vmem:[%s143_s1 + $0x3] sm:$0x1] %v45_v10  ;;  %86 = vst [vmem:[%s143_s1 + $0x4] sm:$0x1] %v51_v11  ;;  %v63_v13 = vld [vmem:[#allocation0 + $0x30] sm:$0x1] }
  0x85   :  { %87 = vst [vmem:[%s143_s1 + $0x5] sm:$0x1] %v57_v12  ;;  %v69_v14 = vld [vmem:[#allocation0 + $0x38] sm:$0x1]  ;;  %88 = vst [vmem:[%s143_s1 + $0x6] sm:$0x1] %v63_v13 }
  0x86   :  { %89 = vst [vmem:[%s143_s1 + $0x7] sm:$0x1] %v69_v14 }

// kernel: output_block_forward.1
= control target key start
LH: loop header
LB: loop body
LE: loop exit
PB: predicated region body
PF: predicated region fallthrough
CT: control target
= control target key end

     0   :  { %s4148_s15 = smov 0   ;;  %s7406_s0 = inlined_call_operand.vmem [shape: f32[2,16,1024], index: 0, kind: input, shape index: {}]   ;;  %s7407_s1 = inlined_call_operand.vmem [shape: f32[1024,1024], index: 1, kind: input, shape index: {}]   ;;  %s7408_s2 = inlined_call_operand.vmem [shape: f32[32,16], index: 2, kind: input, shape index: {}]   ;;  %s7409_s3 = inlined_call_operand.vmem [shape: f32[1,1024], index: 3, kind: input, shape index: {}]   ;;  %s7410_s4 = inlined_call_operand.vmem [shape: f32[2,32,1024], index: 4, kind: output, shape index: {}]  }
   0x1 LB: > { %s2972_s16 = sadd.s32 4294967295, %s4120_s15   ;;  %p2976_p0 = scmp.ge.s32.totalorder %s4120_s15, 1  ;;  %s4120_s15 = sphi %s4148_s15, %s14_s15  }
   0x2   : > { %p162_p1 = scmp.lt.s32.totalorder %s4120_s15, 3 }
   0x4   : > { %p163_p2 = pnand %p2976_p0, %p162_p1 }
   0x5   : > { %v215_v0 = vld [vmem:[%s7407_s1 + $0x8] sm:$0xff] (!%p163_p2)  ;;  %v217_v2 = vld [vmem:[%s7407_s1 + $0x18] sm:$0xff] (!%p163_p2)  ;;  %v214_v5 = vld [vmem:[%s7407_s1] sm:$0xff] (!%p163_p2)  ;;  %p4362_p3 = scmp.lt.s32.totalorder (!%p163_p2), %s2972_s16, 1  ;;  %vm2516_vm0 = vcmask (!%p163_p2), 130048  }
   0x6   : > { %166 = sbr.rel (%p163_p2) target bundleno = 973 (0x3cd), region = 36  ;;  %v223_v1 = vld [vmem:[%s7407_s1 + $0x48] sm:$0xff] (!%p163_p2)  ;;  %v225_v4 = vld [vmem:[%s7407_s1 + $0x58] sm:$0xff] (!%p163_p2)  ;;  %v222_v6 = vld [vmem:[%s7407_s1 + $0x40] sm:$0xff] (!%p163_p2) }
   0x7   : > { %v3001_v3 = vpack.c.bf16 (!%p163_p2), %v223_v1, %v215_v0  ;;  %v3257_v7 = vpack.c.bf16 (!%p163_p2), %v225_v4, %v217_v2  ;;  %v3003_v8 = vpack.c.bf16 (!%p163_p2), %v222_v6, %v214_v5  ;;  %v216_v9 = vld [vmem:[%s7407_s1 + $0x10] sm:$0xff] (!%p163_p2)  ;;  %v231_v11 = vld [vmem:[%s7407_s1 + $0x88] sm:$0xff] (!%p163_p2)  ;;  %v233_v14 = vld [vmem:[%s7407_s1 + $0x98] sm:$0xff] (!%p163_p2) }
   0x8   : > { %v224_v10 = vld [vmem:[%s7407_s1 + $0x50] sm:$0xff] (!%p163_p2)  ;;  %v239_v13 = vld [vmem:[%s7407_s1 + $0xc8] sm:$0xff] (!%p163_p2)  ;;  %v241_v15 = vld [vmem:[%s7407_s1 + $0xd8] sm:$0xff] (!%p163_p2) }
   0x9   : > { %3002 = vmatprep.subr.bf16.mxu0 (!%p163_p2), %v3001_v3  ;;  %v3259_v12 = vpack.c.bf16 (!%p163_p2), %v224_v10, %v216_v9  ;;  %3258 = vmatprep.subr.bf16.mxu1 (!%p163_p2), %v3257_v7  ;;  %v3005_v16 = vpack.c.bf16 (!%p163_p2), %v239_v13, %v231_v11  ;;  %v3261_v17 = vpack.c.bf16 (!%p163_p2), %v241_v15, %v233_v14  ;;  %v230_v18 = vld [vmem:[%s7407_s1 + $0x80] sm:$0xff] (!%p163_p2)  ;;  %v232_v20 = vld [vmem:[%s7407_s1 + $0x90] sm:$0xff] (!%p163_p2)  ;;  %v247_v23 = vld [vmem:[%s7407_s1 + $0x108] sm:$0xff] (!%p163_p2) }
   0xa   : > { %3004 = vmatpush1.bf16.msra.mxu0 (!%p163_p2), %v3003_v8  ;;  %v238_v19 = vld [vmem:[%s7407_s1 + $0xc0] sm:$0xff] (!%p163_p2)  ;;  %v240_v22 = vld [vmem:[%s7407_s1 + $0xd0] sm:$0xff] (!%p163_p2)  ;;  %v255_v24 = vld [vmem:[%s7407_s1 + $0x148] sm:$0xff] (!%p163_p2) }
   0xb   : > { %3260 = vmatpush1.bf16.msra.mxu1 (!%p163_p2), %v3259_v12  ;;  %v3007_v21 = vpack.c.bf16 (!%p163_p2), %v238_v19, %v230_v18  ;;  %3006 = vmatprep.subr.bf16.mxu0 (!%p163_p2), %v3005_v16  ;;  %v3263_v25 = vpack.c.bf16 (!%p163_p2), %v240_v22, %v232_v20  ;;  %v3009_v26 = vpack.c.bf16 (!%p163_p2), %v255_v24, %v247_v23  ;;  %v249_v27 = vld [vmem:[%s7407_s1 + $0x118] sm:$0xff] (!%p163_p2)  ;;  %v246_v29 = vld [vmem:[%s7407_s1 + $0x100] sm:$0xff] (!%p163_p2)  ;;  %v248_v32 = vld [vmem:[%s7407_s1 + $0x110] sm:$0xff] (!%p163_p2) }
   0xc   : > { %3262 = vmatprep.subr.bf16.mxu1 (!%p163_p2), %v3261_v17  ;;  %v257_v28 = vld [vmem:[%s7407_s1 + $0x158] sm:$0xff] (!%p163_p2)  ;;  %v254_v31 = vld [vmem:[%s7407_s1 + $0x140] sm:$0xff] (!%p163_p2)  ;;  %v256_v33 = vld [vmem:[%s7407_s1 + $0x150] sm:$0xff] (!%p163_p2) }
   0xd   : > { %v3265_v30 = vpack.c.bf16 %v257_v28, %v249_v27  ;;  %v3011_v34 = vpack.c.bf16 %v254_v31, %v246_v29  ;;  %v263_v35 = vld [vmem:[%s7407_s1 + $0x188] sm:$0xff]  ;;  %v265_v37 = vld [vmem:[%s7407_s1 + $0x198] sm:$0xff]  ;;  %v3267_v38 = vpack.c.bf16 %v256_v33, %v248_v32  ;;  %v262_v41 = vld [vmem:[%s7407_s1 + $0x180] sm:$0xff]  ;;  %s7413_s16 = smov (!%p4362_p3, %s2972_s16), 1 }
   0xe   : > { %3008 = vmatpush1.bf16.msra.mxu0 %v3007_v21  ;;  %v271_v36 = vld [vmem:[%s7407_s1 + $0x1c8] sm:$0xff]  ;;  %v273_v40 = vld [vmem:[%s7407_s1 + $0x1d8] sm:$0xff]  ;;  %v270_v42 = vld [vmem:[%s7407_s1 + $0x1c0] sm:$0xff]  ;;  %s2999_s18 = sshll.u32 %s7413_s16, 7  ;;  %s3000_s24 = sshll.u32 %s7413_s16, 8 }
   0xf   : > { %3264 = vmatpush1.bf16.msra.mxu1 %v3263_v25  ;;  %3010 = vmatprep.subr.bf16.mxu0 %v3009_v26  ;;  %v3013_v39 = vpack.c.bf16 %v271_v36, %v263_v35  ;;  %v3269_v43 = vpack.c.bf16 %v273_v40, %v265_v37  ;;  %v264_v44 = vld [vmem:[%s7407_s1 + $0x190] sm:$0xff]  ;;  %v279_v46 = vld [vmem:[%s7407_s1 + $0x208] sm:$0xff]  ;;  %v281_v48 = vld [vmem:[%s7407_s1 + $0x218] sm:$0xff]  ;;  %v3015_v50 = vpack.c.bf16 %v270_v42, %v262_v41  ;;  %s4448_s11 = scalar_lea.vmem %s7406_s0, %s2999_s18  ;;  %s7361_s27 = scalar_lea.vmem %s7410_s4, %s3000_s24 }
  0x10   : > { %3266 = vmatprep.subr.bf16.mxu1 %v3265_v30  ;;  %v272_v45 = vld [vmem:[%s7407_s1 + $0x1d0] sm:$0xff]  ;;  %v287_v47 = vld [vmem:[%s7407_s1 + $0x248] sm:$0xff]  ;;  %v289_v49 = vld [vmem:[%s7407_s1 + $0x258] sm:$0xff] }
  0x11   : > { %v3271_v51 = vpack.c.bf16 %v272_v45, %v264_v44  ;;  %v3017_v52 = vpack.c.bf16 %v287_v47, %v279_v46  ;;  %v278_v53 = vld [vmem:[%s7407_s1 + $0x200] sm:$0xff]  ;;  %v280_v55 = vld [vmem:[%s7407_s1 + $0x210] sm:$0xff]  ;;  %v3273_v56 = vpack.c.bf16 %v289_v49, %v281_v48  ;;  %v295_v58 = vld [vmem:[%s7407_s1 + $0x288] sm:$0xff] }
  0x12   : > { %3012 = vmatpush1.bf16.msra.mxu0 %v3011_v34  ;;  %v286_v54 = vld [vmem:[%s7407_s1 + $0x240] sm:$0xff]  ;;  %v288_v57 = vld [vmem:[%s7407_s1 + $0x250] sm:$0xff]  ;;  %v303_v59 = vld [vmem:[%s7407_s1 + $0x2c8] sm:$0xff] }
  0x13   : > { %3268 = vmatpush1.bf16.msra.mxu1 %v3267_v38  ;;  %3014 = vmatprep.subr.bf16.mxu0 %v3013_v39  ;;  %v297_v60 = vld [vmem:[%s7407_s1 + $0x298] sm:$0xff]  ;;  %v3019_v62 = vpack.c.bf16 %v286_v54, %v278_v53  ;;  %v3275_v63 = vpack.c.bf16 %v288_v57, %v280_v55  ;;  %v3021_v0 = vpack.c.bf16 %v303_v59, %v295_v58  ;;  %v294_v1 = vld [vmem:[%s7407_s1 + $0x280] sm:$0xff]  ;;  %v296_v3 = vld [vmem:[%s7407_s1 + $0x290] sm:$0xff] }
  0x14   : > { %3270 = vmatprep.subr.bf16.mxu1 %v3269_v43  ;;  %v305_v61 = vld [vmem:[%s7407_s1 + $0x2d8] sm:$0xff]  ;;  %v302_v2 = vld [vmem:[%s7407_s1 + $0x2c0] sm:$0xff]  ;;  %v304_v5 = vld [vmem:[%s7407_s1 + $0x2d0] sm:$0xff] }
  0x15   : > { %v3277_v4 = vpack.c.bf16 %v305_v61, %v297_v60  ;;  %v311_v6 = vld [vmem:[%s7407_s1 + $0x308] sm:$0xff]  ;;  %v313_v8 = vld [vmem:[%s7407_s1 + $0x318] sm:$0xff]  ;;  %v3023_v10 = vpack.c.bf16 %v302_v2, %v294_v1  ;;  %v3279_v11 = vpack.c.bf16 %v304_v5, %v296_v3  ;;  %v310_v13 = vld [vmem:[%s7407_s1 + $0x300] sm:$0xff] }
  0x16   : > { %3016 = vmatpush1.bf16.msra.mxu0 %v3015_v50  ;;  %v319_v7 = vld [vmem:[%s7407_s1 + $0x348] sm:$0xff]  ;;  %v321_v9 = vld [vmem:[%s7407_s1 + $0x358] sm:$0xff]  ;;  %v318_v14 = vld [vmem:[%s7407_s1 + $0x340] sm:$0xff] }
  0x17   : > { %3272 = vmatpush1.bf16.msra.mxu1 %v3271_v51  ;;  %3018 = vmatprep.subr.bf16.mxu0 %v3017_v52  ;;  %v3025_v12 = vpack.c.bf16 %v319_v7, %v311_v6  ;;  %v312_v15 = vld [vmem:[%s7407_s1 + $0x310] sm:$0xff]  ;;  %v3281_v16 = vpack.c.bf16 %v321_v9, %v313_v8  ;;  %v327_v18 = vld [vmem:[%s7407_s1 + $0x388] sm:$0xff]  ;;  %v329_v20 = vld [vmem:[%s7407_s1 + $0x398] sm:$0xff]  ;;  %v3027_v22 = vpack.c.bf16 %v318_v14, %v310_v13 }
  0x18   : > { %3274 = vmatprep.subr.bf16.mxu1 %v3273_v56  ;;  %v320_v17 = vld [vmem:[%s7407_s1 + $0x350] sm:$0xff]  ;;  %v335_v19 = vld [vmem:[%s7407_s1 + $0x3c8] sm:$0xff]  ;;  %v337_v21 = vld [vmem:[%s7407_s1 + $0x3d8] sm:$0xff] }
  0x19   : > { %v3283_v23 = vpack.c.bf16 %v320_v17, %v312_v15  ;;  %v3029_v24 = vpack.c.bf16 %v335_v19, %v327_v18  ;;  %v326_v25 = vld [vmem:[%s7407_s1 + $0x380] sm:$0xff]  ;;  %v328_v27 = vld [vmem:[%s7407_s1 + $0x390] sm:$0xff]  ;;  %v3285_v28 = vpack.c.bf16 %v337_v21, %v329_v20  ;;  %v343_v30 = vld [vmem:[%s7407_s1 + $0x408] sm:$0xff] }
  0x1a   : > { %3020 = vmatpush1.bf16.msra.mxu0 %v3019_v62  ;;  %v334_v26 = vld [vmem:[%s7407_s1 + $0x3c0] sm:$0xff]  ;;  %v336_v29 = vld [vmem:[%s7407_s1 + $0x3d0] sm:$0xff]  ;;  %v351_v31 = vld [vmem:[%s7407_s1 + $0x448] sm:$0xff] }
  0x1b   : > { %3276 = vmatpush1.bf16.msra.mxu1 %v3275_v63  ;;  %3022 = vmatprep.subr.bf16.mxu0 %v3021_v0  ;;  %v345_v32 = vld [vmem:[%s7407_s1 + $0x418] sm:$0xff]  ;;  %v3031_v34 = vpack.c.bf16 %v334_v26, %v326_v25  ;;  %v3287_v35 = vpack.c.bf16 %v336_v29, %v328_v27  ;;  %v3033_v36 = vpack.c.bf16 %v351_v31, %v343_v30  ;;  %v342_v37 = vld [vmem:[%s7407_s1 + $0x400] sm:$0xff]  ;;  %v344_v39 = vld [vmem:[%s7407_s1 + $0x410] sm:$0xff] }
  0x1c   : > { %3278 = vmatprep.subr.bf16.mxu1 %v3277_v4  ;;  %v353_v33 = vld [vmem:[%s7407_s1 + $0x458] sm:$0xff]  ;;  %v350_v38 = vld [vmem:[%s7407_s1 + $0x440] sm:$0xff]  ;;  %v352_v41 = vld [vmem:[%s7407_s1 + $0x450] sm:$0xff] }
  0x1d   : > { %v3289_v40 = vpack.c.bf16 %v353_v33, %v345_v32  ;;  %v359_v42 = vld [vmem:[%s7407_s1 + $0x488] sm:$0xff]  ;;  %v361_v44 = vld [vmem:[%s7407_s1 + $0x498] sm:$0xff]  ;;  %v3035_v46 = vpack.c.bf16 %v350_v38, %v342_v37  ;;  %v3291_v47 = vpack.c.bf16 %v352_v41, %v344_v39  ;;  %v358_v49 = vld [vmem:[%s7407_s1 + $0x480] sm:$0xff] }
  0x1e   : > { %3024 = vmatpush1.bf16.msra.mxu0 %v3023_v10  ;;  %v367_v43 = vld [vmem:[%s7407_s1 + $0x4c8] sm:$0xff]  ;;  %v369_v45 = vld [vmem:[%s7407_s1 + $0x4d8] sm:$0xff]  ;;  %v366_v50 = vld [vmem:[%s7407_s1 + $0x4c0] sm:$0xff] }
  0x1f   : > { %3280 = vmatpush1.bf16.msra.mxu1 %v3279_v11  ;;  %3026 = vmatprep.subr.bf16.mxu0 %v3025_v12  ;;  %v3037_v48 = vpack.c.bf16 %v367_v43, %v359_v42  ;;  %v360_v51 = vld [vmem:[%s7407_s1 + $0x490] sm:$0xff]  ;;  %v3293_v52 = vpack.c.bf16 %v369_v45, %v361_v44  ;;  %v375_v54 = vld [vmem:[%s7407_s1 + $0x508] sm:$0xff]  ;;  %v377_v56 = vld [vmem:[%s7407_s1 + $0x518] sm:$0xff]  ;;  %v3039_v58 = vpack.c.bf16 %v366_v50, %v358_v49 }
  0x20   : > { %3282 = vmatprep.subr.bf16.mxu1 %v3281_v16  ;;  %v368_v53 = vld [vmem:[%s7407_s1 + $0x4d0] sm:$0xff]  ;;  %v383_v55 = vld [vmem:[%s7407_s1 + $0x548] sm:$0xff]  ;;  %v385_v57 = vld [vmem:[%s7407_s1 + $0x558] sm:$0xff] }
  0x21   : > { %v3295_v59 = vpack.c.bf16 %v368_v53, %v360_v51  ;;  %v3041_v60 = vpack.c.bf16 %v383_v55, %v375_v54  ;;  %v374_v61 = vld [vmem:[%s7407_s1 + $0x500] sm:$0xff]  ;;  %v376_v63 = vld [vmem:[%s7407_s1 + $0x510] sm:$0xff]  ;;  %v3297_v0 = vpack.c.bf16 %v385_v57, %v377_v56  ;;  %v391_v2 = vld [vmem:[%s7407_s1 + $0x588] sm:$0xff] }
  0x22   : > { %3028 = vmatpush1.bf16.msra.mxu0 %v3027_v22  ;;  %v382_v62 = vld [vmem:[%s7407_s1 + $0x540] sm:$0xff]  ;;  %v384_v1 = vld [vmem:[%s7407_s1 + $0x550] sm:$0xff]  ;;  %v399_v3 = vld [vmem:[%s7407_s1 + $0x5c8] sm:$0xff] }
  0x23   : > { %3284 = vmatpush1.bf16.msra.mxu1 %v3283_v23  ;;  %3030 = vmatprep.subr.bf16.mxu0 %v3029_v24  ;;  %v393_v4 = vld [vmem:[%s7407_s1 + $0x598] sm:$0xff]  ;;  %v3043_v6 = vpack.c.bf16 %v382_v62, %v374_v61  ;;  %v390_v7 = vld [vmem:[%s7407_s1 + $0x580] sm:$0xff]  ;;  %v3299_v8 = vpack.c.bf16 %v384_v1, %v376_v63  ;;  %v3045_v9 = vpack.c.bf16 %v399_v3, %v391_v2  ;;  %v392_v11 = vld [vmem:[%s7407_s1 + $0x590] sm:$0xff] }
  0x24   : > { %3286 = vmatprep.subr.bf16.mxu1 %v3285_v28  ;;  %v401_v5 = vld [vmem:[%s7407_s1 + $0x5d8] sm:$0xff]  ;;  %v398_v10 = vld [vmem:[%s7407_s1 + $0x5c0] sm:$0xff]  ;;  %v400_v12 = vld [vmem:[%s7407_s1 + $0x5d0] sm:$0xff] }
  0x25   : > { %v3301_v13 = vpack.c.bf16 %v401_v5, %v393_v4  ;;  %v407_v14 = vld [vmem:[%s7407_s1 + $0x608] sm:$0xff]  ;;  %v409_v17 = vld [vmem:[%s7407_s1 + $0x618] sm:$0xff]  ;;  %v3047_v19 = vpack.c.bf16 %v398_v10, %v390_v7  ;;  %v3303_v20 = vpack.c.bf16 %v400_v12, %v392_v11  ;;  %v406_v22 = vld [vmem:[%s7407_s1 + $0x600] sm:$0xff] }
  0x26   : > { %3032 = vmatpush1.bf16.msra.mxu0 %v3031_v34  ;;  %v415_v15 = vld [vmem:[%s7407_s1 + $0x648] sm:$0xff]  ;;  %v417_v18 = vld [vmem:[%s7407_s1 + $0x658] sm:$0xff]  ;;  %v414_v23 = vld [vmem:[%s7407_s1 + $0x640] sm:$0xff] }
  0x27   : > { %3288 = vmatpush1.bf16.msra.mxu1 %v3287_v35  ;;  %3034 = vmatprep.subr.bf16.mxu0 %v3033_v36  ;;  %v199_v16 = vld [vmem:[%s4448_s11 + $0x8] sm:$0xff]  ;;  %v3049_v21 = vpack.c.bf16 %v415_v15, %v407_v14  ;;  %v408_v24 = vld [vmem:[%s7407_s1 + $0x610] sm:$0xff]  ;;  %v3305_v25 = vpack.c.bf16 %v417_v18, %v409_v17  ;;  %v425_v29 = vld [vmem:[%s7407_s1 + $0x698] sm:$0xff]  ;;  %v3051_v31 = vpack.c.bf16 %v414_v23, %v406_v22 }
  0x28   : > { %3290 = vmatprep.subr.bf16.mxu1 %v3289_v40  ;;  %1302 = vmatprep.mubr.f32.mxu0 %v199_v16  ;;  %v416_v26 = vld [vmem:[%s7407_s1 + $0x650] sm:$0xff]  ;;  %v423_v27 = vld [vmem:[%s7407_s1 + $0x688] sm:$0xff]  ;;  %v433_v30 = vld [vmem:[%s7407_s1 + $0x6d8] sm:$0xff] }
  0x29   : > { %1610 = vmatprep.mubr.f32.mxu1 %v199_v16  ;;  %v431_v28 = vld [vmem:[%s7407_s1 + $0x6c8] sm:$0xff]  ;;  %v3307_v32 = vpack.c.bf16 %v416_v26, %v408_v24  ;;  %v422_v34 = vld [vmem:[%s7407_s1 + $0x680] sm:$0xff]  ;;  %v424_v36 = vld [vmem:[%s7407_s1 + $0x690] sm:$0xff]  ;;  %v3309_v37 = vpack.c.bf16 %v433_v30, %v425_v29 }
  0x2a   : > { %3036 = vmatpush1.bf16.msra.mxu0 %v3035_v46  ;;  %v3053_v33 = vpack.c.bf16 %v431_v28, %v423_v27  ;;  %v430_v35 = vld [vmem:[%s7407_s1 + $0x6c0] sm:$0xff]  ;;  %v432_v38 = vld [vmem:[%s7407_s1 + $0x6d0] sm:$0xff]  ;;  %v439_v39 = vld [vmem:[%s7407_s1 + $0x708] sm:$0xff] }
  0x2b   : > { %3292 = vmatpush1.bf16.msra.mxu1 %v3291_v47  ;;  %3038 = vmatprep.subr.bf16.mxu0 %v3037_v48  ;;  %v447_v40 = vld [vmem:[%s7407_s1 + $0x748] sm:$0xff]  ;;  %v441_v41 = vld [vmem:[%s7407_s1 + $0x718] sm:$0xff]  ;;  %v3055_v43 = vpack.c.bf16 %v430_v35, %v422_v34  ;;  %v3311_v44 = vpack.c.bf16 %v432_v38, %v424_v36  ;;  %v438_v46 = vld [vmem:[%s7407_s1 + $0x700] sm:$0xff] }
  0x2c   : > { %3294 = vmatprep.subr.bf16.mxu1 %v3293_v52  ;;  %v449_v42 = vld [vmem:[%s7407_s1 + $0x758] sm:$0xff]  ;;  %v3057_v45 = vpack.c.bf16 %v447_v40, %v439_v39  ;;  %v446_v47 = vld [vmem:[%s7407_s1 + $0x740] sm:$0xff]  ;;  %v440_v48 = vld [vmem:[%s7407_s1 + $0x710] sm:$0xff] }
  0x2d   : > { %v3313_v49 = vpack.c.bf16 %v449_v42, %v441_v41  ;;  %v448_v50 = vld [vmem:[%s7407_s1 + $0x750] sm:$0xff]  ;;  %v455_v51 = vld [vmem:[%s7407_s1 + $0x788] sm:$0xff]  ;;  %v457_v53 = vld [vmem:[%s7407_s1 + $0x798] sm:$0xff]  ;;  %v3059_v55 = vpack.c.bf16 %v446_v47, %v438_v46 }
  0x2e   : > { %3040 = vmatpush1.bf16.msra.mxu0 %v3039_v58  ;;  %v463_v52 = vld [vmem:[%s7407_s1 + $0x7c8] sm:$0xff]  ;;  %v465_v54 = vld [vmem:[%s7407_s1 + $0x7d8] sm:$0xff]  ;;  %v3315_v56 = vpack.c.bf16 %v448_v50, %v440_v48  ;;  %v454_v58 = vld [vmem:[%s7407_s1 + $0x780] sm:$0xff] }
  0x2f   : > { %3296 = vmatpush1.bf16.msra.mxu1 %v3295_v59  ;;  %3042 = vmatprep.subr.bf16.mxu0 %v3041_v60  ;;  %v3061_v57 = vpack.c.bf16 %v463_v52, %v455_v51  ;;  %v462_v59 = vld [vmem:[%s7407_s1 + $0x7c0] sm:$0xff]  ;;  %v456_v60 = vld [vmem:[%s7407_s1 + $0x790] sm:$0xff]  ;;  %v3317_v61 = vpack.c.bf16 %v465_v54, %v457_v53  ;;  %v471_v63 = vld [vmem:[%s7407_s1 + $0x808] sm:$0xff] }
  0x30   : > { %3298 = vmatprep.subr.bf16.mxu1 %v3297_v0  ;;  %v464_v62 = vld [vmem:[%s7407_s1 + $0x7d0] sm:$0xff]  ;;  %v479_v0 = vld [vmem:[%s7407_s1 + $0x848] sm:$0xff]  ;;  %v473_v1 = vld [vmem:[%s7407_s1 + $0x818] sm:$0xff]  ;;  %v3063_v3 = vpack.c.bf16 %v462_v59, %v454_v58 }
  0x31   : > { %v481_v2 = vld [vmem:[%s7407_s1 + $0x858] sm:$0xff]  ;;  %v3319_v4 = vpack.c.bf16 %v464_v62, %v456_v60  ;;  %v3065_v5 = vpack.c.bf16 %v479_v0, %v471_v63  ;;  %v478_v7 = vld [vmem:[%s7407_s1 + $0x840] sm:$0xff]  ;;  %v480_v10 = vld [vmem:[%s7407_s1 + $0x850] sm:$0xff] }
  0x32   : > { %3044 = vmatpush1.bf16.msra.mxu0 %v3043_v6  ;;  %v470_v6 = vld [vmem:[%s7407_s1 + $0x800] sm:$0xff]  ;;  %v487_v11 = vld [vmem:[%s7407_s1 + $0x888] sm:$0xff]  ;;  %v497_v14 = vld [vmem:[%s7407_s1 + $0x8d8] sm:$0xff] }
  0x33   : > { %3300 = vmatpush1.bf16.msra.mxu1 %v3299_v8  ;;  %3046 = vmatprep.subr.bf16.mxu0 %v3045_v9  ;;  %v472_v8 = vld [vmem:[%s7407_s1 + $0x810] sm:$0xff]  ;;  %v3321_v9 = vpack.c.bf16 %v481_v2, %v473_v1  ;;  %v495_v12 = vld [vmem:[%s7407_s1 + $0x8c8] sm:$0xff]  ;;  %v198_v15 = vld [vmem:[%s4448_s11] sm:$0xff]  ;;  %v3067_v16 = vpack.c.bf16 %v478_v7, %v470_v6 }
  0x34   : > { %3302 = vmatprep.subr.bf16.mxu1 %v3301_v13  ;;  %v489_v13 = vld [vmem:[%s7407_s1 + $0x898] sm:$0xff]  ;;  %v3323_v17 = vpack.c.bf16 %v480_v10, %v472_v8  ;;  %v3069_v18 = vpack.c.bf16 %v495_v12, %v487_v11  ;;  %v496_v23 = vld [vmem:[%s7407_s1 + $0x8d0] sm:$0xff]  ;;  %v503_v24 = vld [vmem:[%s7407_s1 + $0x908] sm:$0xff] }
  0x35   : > { %v3325_v22 = vpack.c.bf16 %v497_v14, %v489_v13  ;;  %v505_v26 = vld [vmem:[%s7407_s1 + $0x918] sm:$0xff]  ;;  %v512_v35 = vld [vmem:[%s7407_s1 + $0x950] sm:$0xff]  ;;  %v519_v36 = vld [vmem:[%s7407_s1 + $0x988] sm:$0xff] }
  0x36   : > { %3048 = vmatpush1.bf16.msra.mxu0 %v3047_v19  ;;  %v486_v19 = vld [vmem:[%s7407_s1 + $0x880] sm:$0xff]  ;;  %v513_v27 = vld [vmem:[%s7407_s1 + $0x958] sm:$0xff]  ;;  %v528_v47 = vld [vmem:[%s7407_s1 + $0x9d0] sm:$0xff] }
  0x37   : > { %3304 = vmatpush1.bf16.msra.mxu1 %v3303_v20  ;;  %3050 = vmatprep.subr.bf16.mxu0 %v3049_v21  ;;  %v494_v20 = vld [vmem:[%s7407_s1 + $0x8c0] sm:$0xff]  ;;  %v488_v21 = vld [vmem:[%s7407_s1 + $0x890] sm:$0xff]  ;;  %v3329_v34 = vpack.c.bf16 %v513_v27, %v505_v26  ;;  %v521_v38 = vld [vmem:[%s7407_s1 + $0x998] sm:$0xff] }
  0x38   : > { %3306 = vmatprep.subr.bf16.mxu1 %v3305_v25  ;;  %v511_v25 = vld [vmem:[%s7407_s1 + $0x948] sm:$0xff]  ;;  %v3071_v28 = vpack.c.bf16 %v494_v20, %v486_v19  ;;  %v3327_v29 = vpack.c.bf16 %v496_v23, %v488_v21  ;;  %v529_v39 = vld [vmem:[%s7407_s1 + $0x9d8] sm:$0xff]  ;;  %v544_v59 = vld [vmem:[%s7407_s1 + $0xa50] sm:$0xff] }
  0x39   : > { %v3073_v30 = vpack.c.bf16 %v511_v25, %v503_v24  ;;  %v3333_v46 = vpack.c.bf16 %v529_v39, %v521_v38  ;;  %v535_v48 = vld [vmem:[%s7407_s1 + $0xa08] sm:$0xff]  ;;  %v537_v50 = vld [vmem:[%s7407_s1 + $0xa18] sm:$0xff]  ;;  %v560_v7 = vld [vmem:[%s7407_s1 + $0xad0] sm:$0xff] }
  0x3a   : > { %3052 = vmatpush1.bf16.msra.mxu0 %v3051_v31  ;;  %v502_v31 = vld [vmem:[%s7407_s1 + $0x900] sm:$0xff]  ;;  %v545_v51 = vld [vmem:[%s7407_s1 + $0xa58] sm:$0xff]  ;;  %v551_v60 = vld [vmem:[%s7407_s1 + $0xa88] sm:$0xff] }
  0x3b   : > { %3308 = vmatpush1.bf16.msra.mxu1 %v3307_v32  ;;  %3054 = vmatprep.subr.bf16.mxu0 %v3053_v33  ;;  %v510_v32 = vld [vmem:[%s7407_s1 + $0x940] sm:$0xff]  ;;  %v504_v33 = vld [vmem:[%s7407_s1 + $0x910] sm:$0xff]  ;;  %v3337_v58 = vpack.c.bf16 %v545_v51, %v537_v50  ;;  %v553_v62 = vld [vmem:[%s7407_s1 + $0xa98] sm:$0xff] }
  0x3c   : > { %3310 = vmatprep.subr.bf16.mxu1 %v3309_v37  ;;  %v527_v37 = vld [vmem:[%s7407_s1 + $0x9c8] sm:$0xff]  ;;  %v3075_v40 = vpack.c.bf16 %v510_v32, %v502_v31  ;;  %v3331_v41 = vpack.c.bf16 %v512_v35, %v504_v33  ;;  %v561_v63 = vld [vmem:[%s7407_s1 + $0xad8] sm:$0xff]  ;;  %v566_v14 = vld [vmem:[%s7407_s1 + $0xb00] sm:$0xff] }
  0x3d   : > { %v3077_v42 = vpack.c.bf16 %v527_v37, %v519_v36  ;;  %v3341_v6 = vpack.c.bf16 %v561_v63, %v553_v62  ;;  %v567_v8 = vld [vmem:[%s7407_s1 + $0xb08] sm:$0xff]  ;;  %v569_v10 = vld [vmem:[%s7407_s1 + $0xb18] sm:$0xff]  ;;  %v576_v19 = vld [vmem:[%s7407_s1 + $0xb50] sm:$0xff] }
  0x3e   : > { %3056 = vmatpush1.bf16.msra.mxu0 %v3055_v43  ;;  %v518_v43 = vld [vmem:[%s7407_s1 + $0x980] sm:$0xff]  ;;  %v577_v11 = vld [vmem:[%s7407_s1 + $0xb58] sm:$0xff]  ;;  %v207_v12 = vld [vmem:[%s4448_s11 + $0x48] sm:$0xff] }
  0x3f   : > { %3312 = vmatpush1.bf16.msra.mxu1 %v3311_v44  ;;  %3058 = vmatprep.subr.bf16.mxu0 %v3057_v45  ;;  %v526_v44 = vld [vmem:[%s7407_s1 + $0x9c0] sm:$0xff]  ;;  %v520_v45 = vld [vmem:[%s7407_s1 + $0x990] sm:$0xff]  ;;  %v3345_v21 = vpack.c.bf16 %v577_v11, %v569_v10  ;;  %v591_v23 = vld [vmem:[%s7407_s1 + $0xbc8] sm:$0xff] }
  0x40   : > { %3314 = vmatprep.subr.bf16.mxu1 %v3313_v49  ;;  %v543_v49 = vld [vmem:[%s7407_s1 + $0xa48] sm:$0xff]  ;;  %v3079_v52 = vpack.c.bf16 %v526_v44, %v518_v43  ;;  %v3335_v53 = vpack.c.bf16 %v528_v47, %v520_v45  ;;  %v206_v20 = vld [vmem:[%s4448_s11 + $0x40] sm:$0xff]  ;;  %v201_v24 = vld [vmem:[%s4448_s11 + $0x18] sm:$0xff] }
  0x41   : > { %v3081_v54 = vpack.c.bf16 %v543_v49, %v535_v48  ;;  %v585_v25 = vld [vmem:[%s7407_s1 + $0xb98] sm:$0xff]  ;;  %v590_v31 = vld [vmem:[%s7407_s1 + $0xbc0] sm:$0xff]  ;;  %v584_v32 = vld [vmem:[%s7407_s1 + $0xb90] sm:$0xff] }
  0x42   : > { %3060 = vmatpush1.bf16.msra.mxu0 %v3059_v55  ;;  %v534_v55 = vld [vmem:[%s7407_s1 + $0xa00] sm:$0xff]  ;;  %v593_v26 = vld [vmem:[%s7407_s1 + $0xbd8] sm:$0xff]  ;;  %v599_v35 = vld [vmem:[%s7407_s1 + $0xc08] sm:$0xff] }
  0x43   : > { %3316 = vmatpush1.bf16.msra.mxu1 %v3315_v56  ;;  %3062 = vmatprep.subr.bf16.mxu0 %v3061_v57  ;;  %v542_v56 = vld [vmem:[%s7407_s1 + $0xa40] sm:$0xff]  ;;  %v536_v57 = vld [vmem:[%s7407_s1 + $0xa10] sm:$0xff]  ;;  %v3349_v33 = vpack.c.bf16 %v593_v26, %v585_v25  ;;  %v607_v36 = vld [vmem:[%s7407_s1 + $0xc48] sm:$0xff] }
  0x44   : > { %3318 = vmatprep.subr.bf16.mxu1 %v3317_v61  ;;  %v559_v61 = vld [vmem:[%s7407_s1 + $0xac8] sm:$0xff]  ;;  %v3083_v0 = vpack.c.bf16 %v542_v56, %v534_v55  ;;  %v3339_v1 = vpack.c.bf16 %v544_v59, %v536_v57  ;;  %v601_v37 = vld [vmem:[%s7407_s1 + $0xc18] sm:$0xff]  ;;  %v606_v43 = vld [vmem:[%s7407_s1 + $0xc40] sm:$0xff] }
  0x45   : > { %v3085_v2 = vpack.c.bf16 %v559_v61, %v551_v60  ;;  %v609_v38 = vld [vmem:[%s7407_s1 + $0xc58] sm:$0xff]  ;;  %v600_v44 = vld [vmem:[%s7407_s1 + $0xc10] sm:$0xff]  ;;  %v615_v47 = vld [vmem:[%s7407_s1 + $0xc88] sm:$0xff] }
  0x46   : > { %3064 = vmatpush1.bf16.msra.mxu0 %v3063_v3  ;;  %v550_v3 = vld [vmem:[%s7407_s1 + $0xa80] sm:$0xff]  ;;  %v3353_v45 = vpack.c.bf16 %v609_v38, %v601_v37  ;;  %v623_v48 = vld [vmem:[%s7407_s1 + $0xcc8] sm:$0xff]  ;;  %v617_v49 = vld [vmem:[%s7407_s1 + $0xc98] sm:$0xff] }
  0x47   : > { %3320 = vmatpush1.bf16.msra.mxu1 %v3319_v4  ;;  %3066 = vmatprep.subr.bf16.mxu0 %v3065_v5  ;;  %v558_v4 = vld [vmem:[%s7407_s1 + $0xac0] sm:$0xff]  ;;  %v552_v5 = vld [vmem:[%s7407_s1 + $0xa90] sm:$0xff]  ;;  %v625_v50 = vld [vmem:[%s7407_s1 + $0xcd8] sm:$0xff] }
  0x48   : > { %3322 = vmatprep.subr.bf16.mxu1 %v3321_v9  ;;  %v575_v9 = vld [vmem:[%s7407_s1 + $0xb48] sm:$0xff]  ;;  %v3087_v13 = vpack.c.bf16 %v558_v4, %v550_v3  ;;  %v622_v55 = vld [vmem:[%s7407_s1 + $0xcc0] sm:$0xff]  ;;  %v616_v56 = vld [vmem:[%s7407_s1 + $0xc90] sm:$0xff]  ;;  %v3357_v57 = vpack.c.bf16 %v625_v50, %v617_v49 }
  0x49   : > { %1303 = vmatmul.mubr.f32.vlgmr.msra.gmra.mrb[0].mxu0 %v198_v15  ;;  %v631_v59 = vld [vmem:[%s7407_s1 + $0xd08] sm:$0xff]  ;;  %v633_v61 = vld [vmem:[%s7407_s1 + $0xd18] sm:$0xff]  ;;  %v638_v3 = vld [vmem:[%s7407_s1 + $0xd40] sm:$0xff] }
  0x4a   : > { %3068 = vmatpush1.bf16.msra.mxu0 %v3067_v16  ;;  %1611 = vmatmul.mubr.f32.vlgmr.msra.gmra.mrb[0].mxu1 %v198_v15  ;;  %v574_v15 = vld [vmem:[%s7407_s1 + $0xb40] sm:$0xff]  ;;  %v3343_v16 = vpack.c.bf16 %v560_v7, %v552_v5  ;;  %v639_v60 = vld [vmem:[%s7407_s1 + $0xd48] sm:$0xff]  ;;  %v641_v62 = vld [vmem:[%s7407_s1 + $0xd58] sm:$0xff] }
  0x4b   : > { %3324 = vmatpush1.bf16.msra.mxu1 %v3323_v17  ;;  %3070 = vmatprep.subr.bf16.mxu0 %v3069_v18  ;;  %v3089_v17 = vpack.c.bf16 %v575_v9, %v567_v8  ;;  %v568_v18 = vld [vmem:[%s7407_s1 + $0xb10] sm:$0xff]  ;;  %v3091_v27 = vpack.c.bf16 %v574_v15, %v566_v14  ;;  %v3361_v5 = vpack.c.bf16 %v641_v62, %v633_v61  ;;  %v647_v7 = vld [vmem:[%s7407_s1 + $0xd88] sm:$0xff]  ;;  %v649_v9 = vld [vmem:[%s7407_s1 + $0xd98] sm:$0xff] }
  0x4c   : > { %3326 = vmatprep.subr.bf16.mxu1 %v3325_v22  ;;  %1308 = vmatprep.mubr.f32.mxu0 %v207_v12  ;;  %v583_v22 = vld [vmem:[%s7407_s1 + $0xb88] sm:$0xff]  ;;  %v632_v4 = vld [vmem:[%s7407_s1 + $0xd10] sm:$0xff]  ;;  %v657_v10 = vld [vmem:[%s7407_s1 + $0xdd8] sm:$0xff] }
  0x4d   : > { %1616 = vmatprep.mubr.f32.mxu1 %v207_v12  ;;  %1309 = vmatmul.mubr.f32.gmra.mrb[2].mxu0 %v206_v20  ;;  %v655_v8 = vld [vmem:[%s7407_s1 + $0xdc8] sm:$0xff]  ;;  %v646_v14 = vld [vmem:[%s7407_s1 + $0xd80] sm:$0xff] }
  0x4e   : > { %3072 = vmatpush1.bf16.msra.mxu0 %v3071_v28  ;;  %1617 = vmatmul.mubr.f32.gmra.mrb[2].mxu1 %v206_v20  ;;  %v3347_v28 = vpack.c.bf16 %v576_v19, %v568_v18  ;;  %v654_v15 = vld [vmem:[%s7407_s1 + $0xdc0] sm:$0xff]  ;;  %v656_v18 = vld [vmem:[%s7407_s1 + $0xdd0] sm:$0xff]  ;;  %v663_v19 = vld [vmem:[%s7407_s1 + $0xe08] sm:$0xff] }
  0x4f   : > { %3328 = vmatpush1.bf16.msra.mxu1 %v3327_v29  ;;  %3074 = vmatprep.subr.bf16.mxu0 %v3073_v30  ;;  %v3093_v29 = vpack.c.bf16 %v591_v23, %v583_v22  ;;  %v582_v30 = vld [vmem:[%s7407_s1 + $0xb80] sm:$0xff]  ;;  %v671_v20 = vld [vmem:[%s7407_s1 + $0xe48] sm:$0xff]  ;;  %v673_v22 = vld [vmem:[%s7407_s1 + $0xe58] sm:$0xff]  ;;  %v3111_v23 = vpack.c.bf16 %v654_v15, %v646_v14 }
  0x50   : > { %3330 = vmatprep.subr.bf16.mxu1 %v3329_v34  ;;  %1379 = vmatprep.mubr.f32.mxu0 %v201_v24  ;;  %v592_v34 = vld [vmem:[%s7407_s1 + $0xbd0] sm:$0xff]  ;;  %v3095_v39 = vpack.c.bf16 %v590_v31, %v582_v30  ;;  %v3113_v25 = vpack.c.bf16 %v671_v20, %v663_v19  ;;  %v662_v26 = vld [vmem:[%s7407_s1 + $0xe00] sm:$0xff]  ;;  %v679_v31 = vld [vmem:[%s7407_s1 + $0xe88] sm:$0xff] }
  0x51   : > { %1687 = vmatprep.mubr.f32.mxu1 %v201_v24  ;;  %v672_v30 = vld [vmem:[%s7407_s1 + $0xe50] sm:$0xff]  ;;  %v678_v38 = vld [vmem:[%s7407_s1 + $0xe80] sm:$0xff]  ;;  %v743_v15 = vld [vmem:[%s7407_s1 + $0x1088] sm:$0xff] }
  0x52   : > { %3076 = vmatpush1.bf16.msra.mxu0 %v3075_v40  ;;  %v3351_v40 = vpack.c.bf16 %v592_v34, %v584_v32  ;;  %v687_v32 = vld [vmem:[%s7407_s1 + $0xec8] sm:$0xff]  ;;  %v689_v34 = vld [vmem:[%s7407_s1 + $0xed8] sm:$0xff]  ;;  %v694_v50 = vld [vmem:[%s7407_s1 + $0xf00] sm:$0xff] }
  0x53   : > { %3332 = vmatpush1.bf16.msra.mxu1 %v3331_v41  ;;  %3078 = vmatprep.subr.bf16.mxu0 %v3077_v42  ;;  %v3097_v41 = vpack.c.bf16 %v607_v36, %v599_v35  ;;  %v598_v42 = vld [vmem:[%s7407_s1 + $0xc00] sm:$0xff]  ;;  %v3117_v37 = vpack.c.bf16 %v687_v32, %v679_v31  ;;  %v736_v14 = vld [vmem:[%s7407_s1 + $0x1050] sm:$0xff]  ;;  %v769_v31 = vld [vmem:[%s7407_s1 + $0x1158] sm:$0xff] }
  0x54   : > { %3334 = vmatprep.subr.bf16.mxu1 %v3333_v46  ;;  %v608_v46 = vld [vmem:[%s7407_s1 + $0xc50] sm:$0xff]  ;;  %v3099_v51 = vpack.c.bf16 %v606_v43, %v598_v42  ;;  %v695_v43 = vld [vmem:[%s7407_s1 + $0xf08] sm:$0xff]  ;;  %v710_v62 = vld [vmem:[%s7407_s1 + $0xf80] sm:$0xff] }
  0x55   : > { %v688_v42 = vld [vmem:[%s7407_s1 + $0xed0] sm:$0xff]  ;;  %v209_v32 = vld [vmem:[%s4448_s11 + $0x58] sm:$0xff] }
  0x56   : > { %3080 = vmatpush1.bf16.msra.mxu0 %v3079_v52  ;;  %v3355_v52 = vpack.c.bf16 %v608_v46, %v600_v44  ;;  %v703_v44 = vld [vmem:[%s7407_s1 + $0xf48] sm:$0xff]  ;;  %v705_v46 = vld [vmem:[%s7407_s1 + $0xf58] sm:$0xff]  ;;  %v200_v19 = vld [vmem:[%s4448_s11 + $0x10] sm:$0xff] }
  0x57   : > { %3336 = vmatpush1.bf16.msra.mxu1 %v3335_v53  ;;  %3082 = vmatprep.subr.bf16.mxu0 %v3081_v54  ;;  %v3101_v53 = vpack.c.bf16 %v623_v48, %v615_v47  ;;  %v614_v54 = vld [vmem:[%s7407_s1 + $0xc80] sm:$0xff]  ;;  %v3121_v49 = vpack.c.bf16 %v703_v44, %v695_v43  ;;  %v783_v43 = vld [vmem:[%s7407_s1 + $0x11c8] sm:$0xff]  ;;  %v777_v44 = vld [vmem:[%s7407_s1 + $0x1198] sm:$0xff] }
  0x58   : > { %3338 = vmatprep.subr.bf16.mxu1 %v3337_v58  ;;  %v624_v58 = vld [vmem:[%s7407_s1 + $0xcd0] sm:$0xff]  ;;  %v3103_v63 = vpack.c.bf16 %v622_v55, %v614_v54  ;;  %v711_v55 = vld [vmem:[%s7407_s1 + $0xf88] sm:$0xff] }
  0x59   : > { %v704_v54 = vld [vmem:[%s7407_s1 + $0xf50] sm:$0xff] }
  0x5a   : > { %3084 = vmatpush1.bf16.msra.mxu0 %v3083_v0  ;;  %v3359_v0 = vpack.c.bf16 %v624_v58, %v616_v56  ;;  %v719_v56 = vld [vmem:[%s7407_s1 + $0xfc8] sm:$0xff]  ;;  %v721_v58 = vld [vmem:[%s7407_s1 + $0xfd8] sm:$0xff] }
  0x5b   : > { %3340 = vmatpush1.bf16.msra.mxu1 %v3339_v1  ;;  %3086 = vmatprep.subr.bf16.mxu0 %v3085_v2  ;;  %v3105_v1 = vpack.c.bf16 %v639_v60, %v631_v59  ;;  %v630_v2 = vld [vmem:[%s7407_s1 + $0xd00] sm:$0xff]  ;;  %v3125_v61 = vpack.c.bf16 %v719_v56, %v711_v55  ;;  %v791_v55 = vld [vmem:[%s7407_s1 + $0x1208] sm:$0xff] }
  0x5c   : > { %3342 = vmatprep.subr.bf16.mxu1 %v3341_v6  ;;  %v640_v6 = vld [vmem:[%s7407_s1 + $0xd50] sm:$0xff]  ;;  %v3107_v11 = vpack.c.bf16 %v638_v3, %v630_v2  ;;  %v727_v3 = vld [vmem:[%s7407_s1 + $0x1008] sm:$0xff] }
  0x5d   : > { %v3363_v12 = vpack.c.bf16 %v640_v6, %v632_v4  ;;  %v720_v2 = vld [vmem:[%s7407_s1 + $0xfd0] sm:$0xff]  ;;  %v735_v4 = vld [vmem:[%s7407_s1 + $0x1048] sm:$0xff]  ;;  %v737_v6 = vld [vmem:[%s7407_s1 + $0x1058] sm:$0xff] }
  0x5e   : > { %3088 = vmatpush1.bf16.msra.mxu0 %v3087_v13  ;;  %v3109_v13 = vpack.c.bf16 %v655_v8, %v647_v7  ;;  %v799_v56 = vld [vmem:[%s7407_s1 + $0x1248] sm:$0xff] }
  0x5f   : > { %3344 = vmatpush1.bf16.msra.mxu1 %v3343_v16  ;;  %3090 = vmatprep.subr.bf16.mxu0 %v3089_v17  ;;  %v648_v16 = vld [vmem:[%s7407_s1 + $0xd90] sm:$0xff]  ;;  %v3365_v17 = vpack.c.bf16 %v657_v10, %v649_v9  ;;  %v3129_v9 = vpack.c.bf16 %v735_v4, %v727_v3  ;;  %v726_v10 = vld [vmem:[%s7407_s1 + $0x1000] sm:$0xff]  ;;  %v807_v3 = vld [vmem:[%s7407_s1 + $0x1288] sm:$0xff] }
  0x60   : > { %3346 = vmatprep.subr.bf16.mxu1 %v3345_v21  ;;  %v665_v21 = vld [vmem:[%s7407_s1 + $0xe18] sm:$0xff]  ;;  %v3367_v24 = vpack.c.bf16 %v656_v18, %v648_v16  ;;  %v751_v16 = vld [vmem:[%s7407_s1 + $0x10c8] sm:$0xff] }
  0x61   : > { %v753_v18 = vld [vmem:[%s7407_s1 + $0x10d8] sm:$0xff]  ;;  %v815_v4 = vld [vmem:[%s7407_s1 + $0x12c8] sm:$0xff] }
  0x62   : > { %3092 = vmatpush1.bf16.msra.mxu0 %v3091_v27  ;;  %v670_v27 = vld [vmem:[%s7407_s1 + $0xe40] sm:$0xff] }
  0x63   : > { %3348 = vmatpush1.bf16.msra.mxu1 %v3347_v28  ;;  %3094 = vmatprep.subr.bf16.mxu0 %v3093_v29  ;;  %v664_v28 = vld [vmem:[%s7407_s1 + $0xe10] sm:$0xff]  ;;  %v3369_v29 = vpack.c.bf16 %v673_v22, %v665_v21  ;;  %v3115_v35 = vpack.c.bf16 %v670_v27, %v662_v26  ;;  %v3133_v22 = vpack.c.bf16 %v751_v16, %v743_v15  ;;  %v823_v15 = vld [vmem:[%s7407_s1 + $0x1308] sm:$0xff] }
  0x64   : > { %3350 = vmatprep.subr.bf16.mxu1 %v3349_v33  ;;  %v681_v33 = vld [vmem:[%s7407_s1 + $0xe98] sm:$0xff]  ;;  %v3371_v36 = vpack.c.bf16 %v672_v30, %v664_v28  ;;  %v752_v27 = vld [vmem:[%s7407_s1 + $0x10d0] sm:$0xff]  ;;  %v759_v28 = vld [vmem:[%s7407_s1 + $0x1108] sm:$0xff] }
  0x65   : > { %v761_v30 = vld [vmem:[%s7407_s1 + $0x1118] sm:$0xff]  ;;  %v831_v16 = vld [vmem:[%s7407_s1 + $0x1348] sm:$0xff] }
  0x66   : > { %3096 = vmatpush1.bf16.msra.mxu0 %v3095_v39  ;;  %v686_v39 = vld [vmem:[%s7407_s1 + $0xec0] sm:$0xff] }
  0x67   : > { %3352 = vmatpush1.bf16.msra.mxu1 %v3351_v40  ;;  %3098 = vmatprep.subr.bf16.mxu0 %v3097_v41  ;;  %v680_v40 = vld [vmem:[%s7407_s1 + $0xe90] sm:$0xff]  ;;  %v3373_v41 = vpack.c.bf16 %v689_v34, %v681_v33  ;;  %v3119_v47 = vpack.c.bf16 %v686_v39, %v678_v38  ;;  %v766_v38 = vld [vmem:[%s7407_s1 + $0x1140] sm:$0xff] }
  0x68   : > { %3354 = vmatprep.subr.bf16.mxu1 %v3353_v45  ;;  %v697_v45 = vld [vmem:[%s7407_s1 + $0xf18] sm:$0xff]  ;;  %v3375_v48 = vpack.c.bf16 %v688_v42, %v680_v40  ;;  %v208_v34 = vld [vmem:[%s4448_s11 + $0x50] sm:$0xff]  ;;  %v3393_v40 = vpack.c.bf16 %v769_v31, %v761_v30  ;;  %v775_v42 = vld [vmem:[%s7407_s1 + $0x1188] sm:$0xff] }
  0x69   : > { %v760_v39 = vld [vmem:[%s7407_s1 + $0x1110] sm:$0xff]  ;;  %v849_v30 = vld [vmem:[%s7407_s1 + $0x13d8] sm:$0xff] }
  0x6a   : > { %3100 = vmatpush1.bf16.msra.mxu0 %v3099_v51  ;;  %v702_v51 = vld [vmem:[%s7407_s1 + $0xf40] sm:$0xff] }
  0x6b   : > { %3356 = vmatpush1.bf16.msra.mxu1 %v3355_v52  ;;  %3102 = vmatprep.subr.bf16.mxu0 %v3101_v53  ;;  %v696_v52 = vld [vmem:[%s7407_s1 + $0xf10] sm:$0xff]  ;;  %v3377_v53 = vpack.c.bf16 %v705_v46, %v697_v45  ;;  %v3123_v59 = vpack.c.bf16 %v702_v51, %v694_v50  ;;  %v785_v45 = vld [vmem:[%s7407_s1 + $0x11d8] sm:$0xff]  ;;  %v203_v46 = vld [vmem:[%s4448_s11 + $0x28] sm:$0xff] }
  0x6c   : > { %3358 = vmatprep.subr.bf16.mxu1 %v3357_v57  ;;  %v713_v57 = vld [vmem:[%s7407_s1 + $0xf98] sm:$0xff]  ;;  %v3379_v60 = vpack.c.bf16 %v704_v54, %v696_v52  ;;  %v774_v50 = vld [vmem:[%s7407_s1 + $0x1180] sm:$0xff]  ;;  %v776_v52 = vld [vmem:[%s7407_s1 + $0x1190] sm:$0xff] }
  0x6d   : > { %v782_v51 = vld [vmem:[%s7407_s1 + $0x11c0] sm:$0xff]  ;;  %v784_v54 = vld [vmem:[%s7407_s1 + $0x11d0] sm:$0xff] }
  0x6e   : > { %3104 = vmatpush1.bf16.msra.mxu0 %v3103_v63  ;;  %v718_v63 = vld [vmem:[%s7407_s1 + $0xfc0] sm:$0xff] }
  0x6f   : > { %3360 = vmatpush1.bf16.msra.mxu1 %v3359_v0  ;;  %3106 = vmatprep.subr.bf16.mxu0 %v3105_v1  ;;  %v712_v0 = vld [vmem:[%s7407_s1 + $0xf90] sm:$0xff]  ;;  %v3381_v1 = vpack.c.bf16 %v721_v58, %v713_v57  ;;  %v3127_v7 = vpack.c.bf16 %v718_v63, %v710_v62  ;;  %v793_v57 = vld [vmem:[%s7407_s1 + $0x1218] sm:$0xff]  ;;  %v790_v62 = vld [vmem:[%s7407_s1 + $0x1200] sm:$0xff] }
  0x70   : > { %3362 = vmatprep.subr.bf16.mxu1 %v3361_v5  ;;  %v729_v5 = vld [vmem:[%s7407_s1 + $0x1018] sm:$0xff]  ;;  %v3383_v8 = vpack.c.bf16 %v720_v2, %v712_v0  ;;  %v798_v63 = vld [vmem:[%s7407_s1 + $0x1240] sm:$0xff]  ;;  %v792_v0 = vld [vmem:[%s7407_s1 + $0x1210] sm:$0xff] }
  0x71   : > { %v801_v58 = vld [vmem:[%s7407_s1 + $0x1258] sm:$0xff]  ;;  %v800_v2 = vld [vmem:[%s7407_s1 + $0x1250] sm:$0xff] }
  0x72   : > { %3108 = vmatpush1.bf16.msra.mxu0 %v3107_v11  ;;  %v734_v11 = vld [vmem:[%s7407_s1 + $0x1040] sm:$0xff] }
  0x73   : > { %3364 = vmatpush1.bf16.msra.mxu1 %v3363_v12  ;;  %3110 = vmatprep.subr.bf16.mxu0 %v3109_v13  ;;  %v728_v12 = vld [vmem:[%s7407_s1 + $0x1010] sm:$0xff]  ;;  %v3385_v13 = vpack.c.bf16 %v737_v6, %v729_v5  ;;  %v3131_v20 = vpack.c.bf16 %v734_v11, %v726_v10  ;;  %v809_v5 = vld [vmem:[%s7407_s1 + $0x1298] sm:$0xff]  ;;  %v806_v10 = vld [vmem:[%s7407_s1 + $0x1280] sm:$0xff] }
  0x74   : > { %3366 = vmatprep.subr.bf16.mxu1 %v3365_v17  ;;  %v745_v17 = vld [vmem:[%s7407_s1 + $0x1098] sm:$0xff]  ;;  %v3387_v21 = vpack.c.bf16 %v736_v14, %v728_v12  ;;  %v814_v11 = vld [vmem:[%s7407_s1 + $0x12c0] sm:$0xff]  ;;  %v808_v12 = vld [vmem:[%s7407_s1 + $0x1290] sm:$0xff] }
  0x75   : > { %v3389_v26 = vpack.c.bf16 %v753_v18, %v745_v17  ;;  %v817_v6 = vld [vmem:[%s7407_s1 + $0x12d8] sm:$0xff]  ;;  %v816_v14 = vld [vmem:[%s7407_s1 + $0x12d0] sm:$0xff] }
  0x76   : > { %3112 = vmatpush1.bf16.msra.mxu0 %v3111_v23  ;;  %v742_v23 = vld [vmem:[%s7407_s1 + $0x1080] sm:$0xff]  ;;  %v825_v17 = vld [vmem:[%s7407_s1 + $0x1318] sm:$0xff] }
  0x77   : > { %3368 = vmatpush1.bf16.msra.mxu1 %v3367_v24  ;;  %3114 = vmatprep.subr.bf16.mxu0 %v3113_v25  ;;  %v750_v24 = vld [vmem:[%s7407_s1 + $0x10c0] sm:$0xff]  ;;  %v744_v25 = vld [vmem:[%s7407_s1 + $0x1090] sm:$0xff]  ;;  %v833_v18 = vld [vmem:[%s7407_s1 + $0x1358] sm:$0xff] }
  0x78   : > { %3370 = vmatprep.subr.bf16.mxu1 %v3369_v29  ;;  %v767_v29 = vld [vmem:[%s7407_s1 + $0x1148] sm:$0xff]  ;;  %v3135_v33 = vpack.c.bf16 %v750_v24, %v742_v23  ;;  %v830_v23 = vld [vmem:[%s7407_s1 + $0x1340] sm:$0xff]  ;;  %v824_v24 = vld [vmem:[%s7407_s1 + $0x1310] sm:$0xff] }
  0x7a   : > { %3116 = vmatpush1.bf16.msra.mxu0 %v3115_v35  ;;  %v3391_v35 = vpack.c.bf16 %v752_v27, %v744_v25  ;;  %v3409_v25 = vpack.c.bf16 %v833_v18, %v825_v17  ;;  %v839_v27 = vld [vmem:[%s7407_s1 + $0x1388] sm:$0xff]  ;;  %v902_v18 = vld [vmem:[%s7407_s1 + $0x1580] sm:$0xff] }
  0x7b   : > { %3372 = vmatpush1.bf16.msra.mxu1 %v3371_v36  ;;  %3118 = vmatprep.subr.bf16.mxu0 %v3117_v37  ;;  %v3137_v36 = vpack.c.bf16 %v767_v29, %v759_v28  ;;  %v758_v37 = vld [vmem:[%s7407_s1 + $0x1100] sm:$0xff]  ;;  %v847_v28 = vld [vmem:[%s7407_s1 + $0x13c8] sm:$0xff]  ;;  %v841_v29 = vld [vmem:[%s7407_s1 + $0x1398] sm:$0xff] }
  0x7c   : > { %3374 = vmatprep.subr.bf16.mxu1 %v3373_v41  ;;  %v768_v41 = vld [vmem:[%s7407_s1 + $0x1150] sm:$0xff] }
  0x7e   : > { %3120 = vmatpush1.bf16.msra.mxu0 %v3119_v47  ;;  %v3139_v47 = vpack.c.bf16 %v766_v38, %v758_v37  ;;  %v3413_v37 = vpack.c.bf16 %v849_v30, %v841_v29  ;;  %v848_v38 = vld [vmem:[%s7407_s1 + $0x13d0] sm:$0xff]  ;;  %v918_v30 = vld [vmem:[%s7407_s1 + $0x1600] sm:$0xff] }
  0x7f   : > { %3376 = vmatpush1.bf16.msra.mxu1 %v3375_v48  ;;  %3122 = vmatprep.subr.bf16.mxu0 %v3121_v49  ;;  %v3395_v48 = vpack.c.bf16 %v768_v41, %v760_v39  ;;  %v3141_v49 = vpack.c.bf16 %v783_v43, %v775_v42  ;;  %v855_v39 = vld [vmem:[%s7407_s1 + $0x1408] sm:$0xff]  ;;  %v857_v41 = vld [vmem:[%s7407_s1 + $0x1418] sm:$0xff] }
  0x80   : > { %3378 = vmatprep.subr.bf16.mxu1 %v3377_v53  ;;  %v3397_v53 = vpack.c.bf16 %v785_v45, %v777_v44  ;;  %v865_v42 = vld [vmem:[%s7407_s1 + $0x1458] sm:$0xff] }
  0x82   : > { %3124 = vmatpush1.bf16.msra.mxu0 %v3123_v59  ;;  %v3143_v59 = vpack.c.bf16 %v782_v51, %v774_v50  ;;  %v864_v50 = vld [vmem:[%s7407_s1 + $0x1450] sm:$0xff]  ;;  %v871_v51 = vld [vmem:[%s7407_s1 + $0x1488] sm:$0xff] }
  0x83   : > { %3380 = vmatpush1.bf16.msra.mxu1 %v3379_v60  ;;  %3126 = vmatprep.subr.bf16.mxu0 %v3125_v61  ;;  %v3399_v60 = vpack.c.bf16 %v784_v54, %v776_v52  ;;  %v3145_v61 = vpack.c.bf16 %v799_v56, %v791_v55  ;;  %v879_v52 = vld [vmem:[%s7407_s1 + $0x14c8] sm:$0xff]  ;;  %v881_v54 = vld [vmem:[%s7407_s1 + $0x14d8] sm:$0xff] }
  0x84   : > { %3382 = vmatprep.subr.bf16.mxu1 %v3381_v1  ;;  %v3401_v1 = vpack.c.bf16 %v801_v58, %v793_v57  ;;  %v3165_v57 = vpack.c.bf16 %v879_v52, %v871_v51  ;;  %v870_v58 = vld [vmem:[%s7407_s1 + $0x1480] sm:$0xff] }
  0x86   : > { %3128 = vmatpush1.bf16.msra.mxu0 %v3127_v7  ;;  %v3147_v7 = vpack.c.bf16 %v798_v63, %v790_v62  ;;  %v880_v62 = vld [vmem:[%s7407_s1 + $0x14d0] sm:$0xff]  ;;  %v887_v63 = vld [vmem:[%s7407_s1 + $0x1508] sm:$0xff] }
  0x87   : > { %3384 = vmatpush1.bf16.msra.mxu1 %v3383_v8  ;;  %3130 = vmatprep.subr.bf16.mxu0 %v3129_v9  ;;  %v3403_v8 = vpack.c.bf16 %v800_v2, %v792_v0  ;;  %v3149_v9 = vpack.c.bf16 %v815_v4, %v807_v3  ;;  %v895_v0 = vld [vmem:[%s7407_s1 + $0x1548] sm:$0xff]  ;;  %v897_v2 = vld [vmem:[%s7407_s1 + $0x1558] sm:$0xff] }
  0x88   : > { %3386 = vmatprep.subr.bf16.mxu1 %v3385_v13  ;;  %v3405_v13 = vpack.c.bf16 %v817_v6, %v809_v5  ;;  %v3169_v5 = vpack.c.bf16 %v895_v0, %v887_v63  ;;  %v886_v6 = vld [vmem:[%s7407_s1 + $0x1500] sm:$0xff] }
  0x89   : > { %1380 = vmatmul.mubr.f32.vlgmr.msra.gmra.mrb[0].mxu0 %v200_v19 }
  0x8a   : > { %3132 = vmatpush1.bf16.msra.mxu0 %v3131_v20  ;;  %1688 = vmatmul.mubr.f32.vlgmr.msra.gmra.mrb[0].mxu1 %v200_v19  ;;  %v3151_v19 = vpack.c.bf16 %v814_v11, %v806_v10  ;;  %v3407_v20 = vpack.c.bf16 %v816_v14, %v808_v12  ;;  %v896_v10 = vld [vmem:[%s7407_s1 + $0x1550] sm:$0xff]  ;;  %v903_v11 = vld [vmem:[%s7407_s1 + $0x1588] sm:$0xff]  ;;  %v913_v14 = vld [vmem:[%s7407_s1 + $0x15d8] sm:$0xff] }
  0x8b   : > { %3388 = vmatpush1.bf16.msra.mxu1 %v3387_v21  ;;  %3134 = vmatprep.subr.bf16.mxu0 %v3133_v22  ;;  %v3153_v21 = vpack.c.bf16 %v831_v16, %v823_v15  ;;  %v822_v22 = vld [vmem:[%s7407_s1 + $0x1300] sm:$0xff]  ;;  %v911_v12 = vld [vmem:[%s7407_s1 + $0x15c8] sm:$0xff] }
  0x8c   : > { %3390 = vmatprep.subr.bf16.mxu1 %v3389_v26  ;;  %1385 = vmatprep.mubr.f32.mxu0 %v209_v32  ;;  %v832_v26 = vld [vmem:[%s7407_s1 + $0x1350] sm:$0xff]  ;;  %v3155_v31 = vpack.c.bf16 %v830_v23, %v822_v22  ;;  %v3173_v17 = vpack.c.bf16 %v911_v12, %v903_v11  ;;  %v919_v23 = vld [vmem:[%s7407_s1 + $0x1608] sm:$0xff] }
  0x8d   : > { %1693 = vmatprep.mubr.f32.mxu1 %v209_v32  ;;  %1386 = vmatmul.mubr.f32.gmra.mrb[2].mxu0 %v208_v34  ;;  %v3411_v32 = vpack.c.bf16 %v832_v26, %v824_v24  ;;  %v912_v22 = vld [vmem:[%s7407_s1 + $0x15d0] sm:$0xff]  ;;  %v927_v24 = vld [vmem:[%s7407_s1 + $0x1648] sm:$0xff]  ;;  %v929_v26 = vld [vmem:[%s7407_s1 + $0x1658] sm:$0xff] }
  0x8e   : > { %3136 = vmatpush1.bf16.msra.mxu0 %v3135_v33  ;;  %1694 = vmatmul.mubr.f32.gmra.mrb[2].mxu1 %v208_v34  ;;  %v3157_v33 = vpack.c.bf16 %v847_v28, %v839_v27  ;;  %v838_v34 = vld [vmem:[%s7407_s1 + $0x1380] sm:$0xff]  ;;  %v3177_v29 = vpack.c.bf16 %v927_v24, %v919_v23 }
  0x8f   : > { %3392 = vmatpush1.bf16.msra.mxu1 %v3391_v35  ;;  %3138 = vmatprep.subr.bf16.mxu0 %v3137_v36  ;;  %v846_v35 = vld [vmem:[%s7407_s1 + $0x13c0] sm:$0xff]  ;;  %v840_v36 = vld [vmem:[%s7407_s1 + $0x1390] sm:$0xff] }
  0x90   : > { %3394 = vmatprep.subr.bf16.mxu1 %v3393_v40  ;;  %1456 = vmatprep.mubr.f32.mxu0 %v203_v46  ;;  %v863_v40 = vld [vmem:[%s7407_s1 + $0x1448] sm:$0xff]  ;;  %v3159_v43 = vpack.c.bf16 %v846_v35, %v838_v34  ;;  %v3415_v44 = vpack.c.bf16 %v848_v38, %v840_v36  ;;  %v928_v34 = vld [vmem:[%s7407_s1 + $0x1650] sm:$0xff]  ;;  %v945_v38 = vld [vmem:[%s7407_s1 + $0x16d8] sm:$0xff] }
  0x91   : > { %1764 = vmatprep.mubr.f32.mxu1 %v203_v46  ;;  %v3161_v45 = vpack.c.bf16 %v863_v40, %v855_v39  ;;  %v854_v46 = vld [vmem:[%s7407_s1 + $0x1400] sm:$0xff]  ;;  %v935_v35 = vld [vmem:[%s7407_s1 + $0x1688] sm:$0xff] }
  0x92   : > { %3140 = vmatpush1.bf16.msra.mxu0 %v3139_v47  ;;  %v862_v47 = vld [vmem:[%s7407_s1 + $0x1440] sm:$0xff]  ;;  %v943_v36 = vld [vmem:[%s7407_s1 + $0x16c8] sm:$0xff] }
  0x93   : > { %3396 = vmatpush1.bf16.msra.mxu1 %v3395_v48  ;;  %3142 = vmatprep.subr.bf16.mxu0 %v3141_v49  ;;  %v856_v48 = vld [vmem:[%s7407_s1 + $0x1410] sm:$0xff]  ;;  %v3417_v49 = vpack.c.bf16 %v865_v42, %v857_v41  ;;  %v3163_v55 = vpack.c.bf16 %v862_v47, %v854_v46  ;;  %v3181_v41 = vpack.c.bf16 %v943_v36, %v935_v35  ;;  %v934_v42 = vld [vmem:[%s7407_s1 + $0x1680] sm:$0xff]  ;;  %v951_v47 = vld [vmem:[%s7407_s1 + $0x1708] sm:$0xff] }
  0x94   : > { %3398 = vmatprep.subr.bf16.mxu1 %v3397_v53  ;;  %v873_v53 = vld [vmem:[%s7407_s1 + $0x1498] sm:$0xff]  ;;  %v3419_v56 = vpack.c.bf16 %v864_v50, %v856_v48  ;;  %v944_v46 = vld [vmem:[%s7407_s1 + $0x16d0] sm:$0xff]  ;;  %v959_v48 = vld [vmem:[%s7407_s1 + $0x1748] sm:$0xff] }
  0x95   : > { %v961_v50 = vld [vmem:[%s7407_s1 + $0x1758] sm:$0xff]  ;;  %v202_v23 = vld [vmem:[%s4448_s11 + $0x20] sm:$0xff]  ;;  %v211_v36 = vld [vmem:[%s4448_s11 + $0x68] sm:$0xff] }
  0x96   : > { %3144 = vmatpush1.bf16.msra.mxu0 %v3143_v59  ;;  %v878_v59 = vld [vmem:[%s7407_s1 + $0x14c0] sm:$0xff]  ;;  %v1025_v35 = vld [vmem:[%s7407_s1 + $0x1958] sm:$0xff] }
  0x97   : > { %3400 = vmatpush1.bf16.msra.mxu1 %v3399_v60  ;;  %3146 = vmatprep.subr.bf16.mxu0 %v3145_v61  ;;  %v872_v60 = vld [vmem:[%s7407_s1 + $0x1490] sm:$0xff]  ;;  %v3421_v61 = vpack.c.bf16 %v881_v54, %v873_v53  ;;  %v3167_v3 = vpack.c.bf16 %v878_v59, %v870_v58  ;;  %v3185_v53 = vpack.c.bf16 %v959_v48, %v951_v47  ;;  %v950_v54 = vld [vmem:[%s7407_s1 + $0x1700] sm:$0xff]  ;;  %v967_v59 = vld [vmem:[%s7407_s1 + $0x1788] sm:$0xff] }
  0x98   : > { %3402 = vmatprep.subr.bf16.mxu1 %v3401_v1  ;;  %v889_v1 = vld [vmem:[%s7407_s1 + $0x1518] sm:$0xff]  ;;  %v3423_v4 = vpack.c.bf16 %v880_v62, %v872_v60  ;;  %v960_v58 = vld [vmem:[%s7407_s1 + $0x1750] sm:$0xff]  ;;  %v975_v60 = vld [vmem:[%s7407_s1 + $0x17c8] sm:$0xff] }
  0x99   : > { %v977_v62 = vld [vmem:[%s7407_s1 + $0x17d8] sm:$0xff]  ;;  %v1039_v47 = vld [vmem:[%s7407_s1 + $0x19c8] sm:$0xff] }
  0x9a   : > { %3148 = vmatpush1.bf16.msra.mxu0 %v3147_v7  ;;  %v894_v7 = vld [vmem:[%s7407_s1 + $0x1540] sm:$0xff]  ;;  %v1033_v48 = vld [vmem:[%s7407_s1 + $0x1998] sm:$0xff] }
  0x9b   : > { %3404 = vmatpush1.bf16.msra.mxu1 %v3403_v8  ;;  %3150 = vmatprep.subr.bf16.mxu0 %v3149_v9  ;;  %v888_v8 = vld [vmem:[%s7407_s1 + $0x1510] sm:$0xff]  ;;  %v3425_v9 = vpack.c.bf16 %v897_v2, %v889_v1  ;;  %v3171_v15 = vpack.c.bf16 %v894_v7, %v886_v6  ;;  %v3189_v1 = vpack.c.bf16 %v975_v60, %v967_v59  ;;  %v966_v2 = vld [vmem:[%s7407_s1 + $0x1780] sm:$0xff]  ;;  %v983_v7 = vld [vmem:[%s7407_s1 + $0x1808] sm:$0xff] }
  0x9c   : > { %3406 = vmatprep.subr.bf16.mxu1 %v3405_v13  ;;  %v905_v13 = vld [vmem:[%s7407_s1 + $0x1598] sm:$0xff]  ;;  %v3427_v16 = vpack.c.bf16 %v896_v10, %v888_v8  ;;  %v976_v6 = vld [vmem:[%s7407_s1 + $0x17d0] sm:$0xff]  ;;  %v991_v8 = vld [vmem:[%s7407_s1 + $0x1848] sm:$0xff] }
  0x9d   : > { %v993_v10 = vld [vmem:[%s7407_s1 + $0x1858] sm:$0xff]  ;;  %v1047_v59 = vld [vmem:[%s7407_s1 + $0x1a08] sm:$0xff] }
  0x9e   : > { %3152 = vmatpush1.bf16.msra.mxu0 %v3151_v19  ;;  %v910_v19 = vld [vmem:[%s7407_s1 + $0x15c0] sm:$0xff]  ;;  %v1055_v60 = vld [vmem:[%s7407_s1 + $0x1a48] sm:$0xff] }
  0x9f   : > { %3408 = vmatpush1.bf16.msra.mxu1 %v3407_v20  ;;  %3154 = vmatprep.subr.bf16.mxu0 %v3153_v21  ;;  %v904_v20 = vld [vmem:[%s7407_s1 + $0x1590] sm:$0xff]  ;;  %v3429_v21 = vpack.c.bf16 %v913_v14, %v905_v13  ;;  %v3175_v27 = vpack.c.bf16 %v910_v19, %v902_v18  ;;  %v3193_v13 = vpack.c.bf16 %v991_v8, %v983_v7  ;;  %v982_v14 = vld [vmem:[%s7407_s1 + $0x1800] sm:$0xff]  ;;  %v999_v19 = vld [vmem:[%s7407_s1 + $0x1888] sm:$0xff] }
  0xa0   : > { %3410 = vmatprep.subr.bf16.mxu1 %v3409_v25  ;;  %v921_v25 = vld [vmem:[%s7407_s1 + $0x1618] sm:$0xff]  ;;  %v3431_v28 = vpack.c.bf16 %v912_v22, %v904_v20  ;;  %v992_v18 = vld [vmem:[%s7407_s1 + $0x1850] sm:$0xff]  ;;  %v1007_v20 = vld [vmem:[%s7407_s1 + $0x18c8] sm:$0xff] }
  0xa1   : > { %v1009_v22 = vld [vmem:[%s7407_s1 + $0x18d8] sm:$0xff]  ;;  %v1063_v7 = vld [vmem:[%s7407_s1 + $0x1a88] sm:$0xff] }
  0xa2   : > { %3156 = vmatpush1.bf16.msra.mxu0 %v3155_v31  ;;  %v926_v31 = vld [vmem:[%s7407_s1 + $0x1640] sm:$0xff]  ;;  %v1071_v8 = vld [vmem:[%s7407_s1 + $0x1ac8] sm:$0xff] }
  0xa3   : > { %3412 = vmatpush1.bf16.msra.mxu1 %v3411_v32  ;;  %3158 = vmatprep.subr.bf16.mxu0 %v3157_v33  ;;  %v920_v32 = vld [vmem:[%s7407_s1 + $0x1610] sm:$0xff]  ;;  %v3433_v33 = vpack.c.bf16 %v929_v26, %v921_v25  ;;  %v3179_v39 = vpack.c.bf16 %v926_v31, %v918_v30  ;;  %v3197_v26 = vpack.c.bf16 %v1007_v20, %v999_v19  ;;  %v1079_v19 = vld [vmem:[%s7407_s1 + $0x1b08] sm:$0xff] }
  0xa4   : > { %3414 = vmatprep.subr.bf16.mxu1 %v3413_v37  ;;  %v937_v37 = vld [vmem:[%s7407_s1 + $0x1698] sm:$0xff]  ;;  %v3435_v40 = vpack.c.bf16 %v928_v34, %v920_v32  ;;  %v1008_v31 = vld [vmem:[%s7407_s1 + $0x18d0] sm:$0xff]  ;;  %v1015_v32 = vld [vmem:[%s7407_s1 + $0x1908] sm:$0xff] }
  0xa5   : > { %v1017_v34 = vld [vmem:[%s7407_s1 + $0x1918] sm:$0xff]  ;;  %v1087_v20 = vld [vmem:[%s7407_s1 + $0x1b48] sm:$0xff] }
  0xa6   : > { %3160 = vmatpush1.bf16.msra.mxu0 %v3159_v43  ;;  %v942_v43 = vld [vmem:[%s7407_s1 + $0x16c0] sm:$0xff] }
  0xa7   : > { %3416 = vmatpush1.bf16.msra.mxu1 %v3415_v44  ;;  %3162 = vmatprep.subr.bf16.mxu0 %v3161_v45  ;;  %v936_v44 = vld [vmem:[%s7407_s1 + $0x1690] sm:$0xff]  ;;  %v3437_v45 = vpack.c.bf16 %v945_v38, %v937_v37  ;;  %v3183_v51 = vpack.c.bf16 %v942_v43, %v934_v42  ;;  %v210_v38 = vld [vmem:[%s4448_s11 + $0x60] sm:$0xff] }
  0xa8   : > { %3418 = vmatprep.subr.bf16.mxu1 %v3417_v49  ;;  %v953_v49 = vld [vmem:[%s7407_s1 + $0x1718] sm:$0xff]  ;;  %v3439_v52 = vpack.c.bf16 %v944_v46, %v936_v44  ;;  %v1022_v42 = vld [vmem:[%s7407_s1 + $0x1940] sm:$0xff]  ;;  %v1016_v43 = vld [vmem:[%s7407_s1 + $0x1910] sm:$0xff]  ;;  %v3457_v44 = vpack.c.bf16 %v1025_v35, %v1017_v34 }
  0xa9   : > { %v1031_v46 = vld [vmem:[%s7407_s1 + $0x1988] sm:$0xff]  ;;  %v1105_v34 = vld [vmem:[%s7407_s1 + $0x1bd8] sm:$0xff] }
  0xaa   : > { %3164 = vmatpush1.bf16.msra.mxu0 %v3163_v55  ;;  %v958_v55 = vld [vmem:[%s7407_s1 + $0x1740] sm:$0xff] }
  0xab   : > { %3420 = vmatpush1.bf16.msra.mxu1 %v3419_v56  ;;  %3166 = vmatprep.subr.bf16.mxu0 %v3165_v57  ;;  %v952_v56 = vld [vmem:[%s7407_s1 + $0x1710] sm:$0xff]  ;;  %v3441_v57 = vpack.c.bf16 %v961_v50, %v953_v49  ;;  %v3187_v63 = vpack.c.bf16 %v958_v55, %v950_v54  ;;  %v1041_v49 = vld [vmem:[%s7407_s1 + $0x19d8] sm:$0xff]  ;;  %v1030_v54 = vld [vmem:[%s7407_s1 + $0x1980] sm:$0xff] }
  0xac   : > { %3422 = vmatprep.subr.bf16.mxu1 %v3421_v61  ;;  %v969_v61 = vld [vmem:[%s7407_s1 + $0x1798] sm:$0xff]  ;;  %v3443_v0 = vpack.c.bf16 %v960_v58, %v952_v56  ;;  %v1038_v55 = vld [vmem:[%s7407_s1 + $0x19c0] sm:$0xff]  ;;  %v1032_v56 = vld [vmem:[%s7407_s1 + $0x1990] sm:$0xff] }
  0xad   : > { %v205_v50 = vld [vmem:[%s4448_s11 + $0x38] sm:$0xff]  ;;  %v1040_v58 = vld [vmem:[%s7407_s1 + $0x19d0] sm:$0xff] }
  0xae   : > { %3168 = vmatpush1.bf16.msra.mxu0 %v3167_v3  ;;  %v974_v3 = vld [vmem:[%s7407_s1 + $0x17c0] sm:$0xff] }
  0xaf   : > { %3424 = vmatpush1.bf16.msra.mxu1 %v3423_v4  ;;  %3170 = vmatprep.subr.bf16.mxu0 %v3169_v5  ;;  %v968_v4 = vld [vmem:[%s7407_s1 + $0x1790] sm:$0xff]  ;;  %v3445_v5 = vpack.c.bf16 %v977_v62, %v969_v61  ;;  %v3191_v11 = vpack.c.bf16 %v974_v3, %v966_v2  ;;  %v1049_v61 = vld [vmem:[%s7407_s1 + $0x1a18] sm:$0xff]  ;;  %v1046_v2 = vld [vmem:[%s7407_s1 + $0x1a00] sm:$0xff] }
  0xb0   : > { %3426 = vmatprep.subr.bf16.mxu1 %v3425_v9  ;;  %v985_v9 = vld [vmem:[%s7407_s1 + $0x1818] sm:$0xff]  ;;  %v3447_v12 = vpack.c.bf16 %v976_v6, %v968_v4  ;;  %v1054_v3 = vld [vmem:[%s7407_s1 + $0x1a40] sm:$0xff]  ;;  %v1048_v4 = vld [vmem:[%s7407_s1 + $0x1a10] sm:$0xff] }
  0xb1   : > { %v1057_v62 = vld [vmem:[%s7407_s1 + $0x1a58] sm:$0xff]  ;;  %v1056_v6 = vld [vmem:[%s7407_s1 + $0x1a50] sm:$0xff] }
  0xb2   : > { %3172 = vmatpush1.bf16.msra.mxu0 %v3171_v15  ;;  %v990_v15 = vld [vmem:[%s7407_s1 + $0x1840] sm:$0xff] }
  0xb3   : > { %3428 = vmatpush1.bf16.msra.mxu1 %v3427_v16  ;;  %3174 = vmatprep.subr.bf16.mxu0 %v3173_v17  ;;  %v984_v16 = vld [vmem:[%s7407_s1 + $0x1810] sm:$0xff]  ;;  %v3449_v17 = vpack.c.bf16 %v993_v10, %v985_v9  ;;  %v3195_v24 = vpack.c.bf16 %v990_v15, %v982_v14  ;;  %v1065_v9 = vld [vmem:[%s7407_s1 + $0x1a98] sm:$0xff]  ;;  %v1062_v14 = vld [vmem:[%s7407_s1 + $0x1a80] sm:$0xff] }
  0xb4   : > { %3430 = vmatprep.subr.bf16.mxu1 %v3429_v21  ;;  %v1001_v21 = vld [vmem:[%s7407_s1 + $0x1898] sm:$0xff]  ;;  %v3451_v25 = vpack.c.bf16 %v992_v18, %v984_v16  ;;  %v1070_v15 = vld [vmem:[%s7407_s1 + $0x1ac0] sm:$0xff]  ;;  %v1064_v16 = vld [vmem:[%s7407_s1 + $0x1a90] sm:$0xff] }
  0xb5   : > { %v3453_v30 = vpack.c.bf16 %v1009_v22, %v1001_v21  ;;  %v1073_v10 = vld [vmem:[%s7407_s1 + $0x1ad8] sm:$0xff]  ;;  %v1072_v18 = vld [vmem:[%s7407_s1 + $0x1ad0] sm:$0xff] }
  0xb6   : > { %3176 = vmatpush1.bf16.msra.mxu0 %v3175_v27  ;;  %v998_v27 = vld [vmem:[%s7407_s1 + $0x1880] sm:$0xff]  ;;  %v1081_v21 = vld [vmem:[%s7407_s1 + $0x1b18] sm:$0xff] }
  0xb7   : > { %3432 = vmatpush1.bf16.msra.mxu1 %v3431_v28  ;;  %3178 = vmatprep.subr.bf16.mxu0 %v3177_v29  ;;  %v1006_v28 = vld [vmem:[%s7407_s1 + $0x18c0] sm:$0xff]  ;;  %v1000_v29 = vld [vmem:[%s7407_s1 + $0x1890] sm:$0xff]  ;;  %v1089_v22 = vld [vmem:[%s7407_s1 + $0x1b58] sm:$0xff] }
  0xb8   : > { %3434 = vmatprep.subr.bf16.mxu1 %v3433_v33  ;;  %v1023_v33 = vld [vmem:[%s7407_s1 + $0x1948] sm:$0xff]  ;;  %v3199_v37 = vpack.c.bf16 %v1006_v28, %v998_v27  ;;  %v1086_v27 = vld [vmem:[%s7407_s1 + $0x1b40] sm:$0xff]  ;;  %v1080_v28 = vld [vmem:[%s7407_s1 + $0x1b10] sm:$0xff] }
  0xba   : > { %3180 = vmatpush1.bf16.msra.mxu0 %v3179_v39  ;;  %v3455_v39 = vpack.c.bf16 %v1008_v31, %v1000_v29  ;;  %v3473_v29 = vpack.c.bf16 %v1089_v22, %v1081_v21  ;;  %v1095_v31 = vld [vmem:[%s7407_s1 + $0x1b88] sm:$0xff]  ;;  %v1158_v22 = vld [vmem:[%s7407_s1 + $0x1d80] sm:$0xff] }
  0xbb   : > { %3436 = vmatpush1.bf16.msra.mxu1 %v3435_v40  ;;  %3182 = vmatprep.subr.bf16.mxu0 %v3181_v41  ;;  %v3201_v40 = vpack.c.bf16 %v1023_v33, %v1015_v32  ;;  %v1014_v41 = vld [vmem:[%s7407_s1 + $0x1900] sm:$0xff]  ;;  %v1103_v32 = vld [vmem:[%s7407_s1 + $0x1bc8] sm:$0xff]  ;;  %v1097_v33 = vld [vmem:[%s7407_s1 + $0x1b98] sm:$0xff] }
  0xbc   : > { %3438 = vmatprep.subr.bf16.mxu1 %v3437_v45  ;;  %v1024_v45 = vld [vmem:[%s7407_s1 + $0x1950] sm:$0xff] }
  0xbe   : > { %3184 = vmatpush1.bf16.msra.mxu0 %v3183_v51  ;;  %v3203_v51 = vpack.c.bf16 %v1022_v42, %v1014_v41  ;;  %v3477_v41 = vpack.c.bf16 %v1105_v34, %v1097_v33  ;;  %v1104_v42 = vld [vmem:[%s7407_s1 + $0x1bd0] sm:$0xff]  ;;  %v1174_v34 = vld [vmem:[%s7407_s1 + $0x1e00] sm:$0xff] }
  0xbf   : > { %3440 = vmatpush1.bf16.msra.mxu1 %v3439_v52  ;;  %3186 = vmatprep.subr.bf16.mxu0 %v3185_v53  ;;  %v3459_v52 = vpack.c.bf16 %v1024_v45, %v1016_v43  ;;  %v3205_v53 = vpack.c.bf16 %v1039_v47, %v1031_v46  ;;  %v1111_v43 = vld [vmem:[%s7407_s1 + $0x1c08] sm:$0xff]  ;;  %v1113_v45 = vld [vmem:[%s7407_s1 + $0x1c18] sm:$0xff] }
  0xc0   : > { %3442 = vmatprep.subr.bf16.mxu1 %v3441_v57  ;;  %v3461_v57 = vpack.c.bf16 %v1041_v49, %v1033_v48  ;;  %v1121_v46 = vld [vmem:[%s7407_s1 + $0x1c58] sm:$0xff] }
  0xc2   : > { %3188 = vmatpush1.bf16.msra.mxu0 %v3187_v63  ;;  %v3207_v63 = vpack.c.bf16 %v1038_v55, %v1030_v54  ;;  %v1120_v54 = vld [vmem:[%s7407_s1 + $0x1c50] sm:$0xff]  ;;  %v1127_v55 = vld [vmem:[%s7407_s1 + $0x1c88] sm:$0xff] }
  0xc3   : > { %3444 = vmatpush1.bf16.msra.mxu1 %v3443_v0  ;;  %3190 = vmatprep.subr.bf16.mxu0 %v3189_v1  ;;  %v3463_v0 = vpack.c.bf16 %v1040_v58, %v1032_v56  ;;  %v3209_v1 = vpack.c.bf16 %v1055_v60, %v1047_v59  ;;  %v1135_v56 = vld [vmem:[%s7407_s1 + $0x1cc8] sm:$0xff]  ;;  %v1137_v58 = vld [vmem:[%s7407_s1 + $0x1cd8] sm:$0xff] }
  0xc4   : > { %3446 = vmatprep.subr.bf16.mxu1 %v3445_v5  ;;  %v3465_v5 = vpack.c.bf16 %v1057_v62, %v1049_v61  ;;  %v3229_v61 = vpack.c.bf16 %v1135_v56, %v1127_v55  ;;  %v1126_v62 = vld [vmem:[%s7407_s1 + $0x1c80] sm:$0xff] }
  0xc6   : > { %3192 = vmatpush1.bf16.msra.mxu0 %v3191_v11  ;;  %v3211_v11 = vpack.c.bf16 %v1054_v3, %v1046_v2  ;;  %v1136_v2 = vld [vmem:[%s7407_s1 + $0x1cd0] sm:$0xff]  ;;  %v1143_v3 = vld [vmem:[%s7407_s1 + $0x1d08] sm:$0xff] }
  0xc7   : > { %3448 = vmatpush1.bf16.msra.mxu1 %v3447_v12  ;;  %3194 = vmatprep.subr.bf16.mxu0 %v3193_v13  ;;  %v3467_v12 = vpack.c.bf16 %v1056_v6, %v1048_v4  ;;  %v3213_v13 = vpack.c.bf16 %v1071_v8, %v1063_v7  ;;  %v1151_v4 = vld [vmem:[%s7407_s1 + $0x1d48] sm:$0xff]  ;;  %v1153_v6 = vld [vmem:[%s7407_s1 + $0x1d58] sm:$0xff] }
  0xc8   : > { %3450 = vmatprep.subr.bf16.mxu1 %v3449_v17  ;;  %v3469_v17 = vpack.c.bf16 %v1073_v10, %v1065_v9  ;;  %v3233_v9 = vpack.c.bf16 %v1151_v4, %v1143_v3  ;;  %v1142_v10 = vld [vmem:[%s7407_s1 + $0x1d00] sm:$0xff] }
  0xc9   : > { %1457 = vmatmul.mubr.f32.vlgmr.msra.gmra.mrb[0].mxu0 %v202_v23 }
  0xca   : > { %3196 = vmatpush1.bf16.msra.mxu0 %v3195_v24  ;;  %1765 = vmatmul.mubr.f32.vlgmr.msra.gmra.mrb[0].mxu1 %v202_v23  ;;  %v3215_v23 = vpack.c.bf16 %v1070_v15, %v1062_v14  ;;  %v3471_v24 = vpack.c.bf16 %v1072_v18, %v1064_v16  ;;  %v1152_v14 = vld [vmem:[%s7407_s1 + $0x1d50] sm:$0xff]  ;;  %v1159_v15 = vld [vmem:[%s7407_s1 + $0x1d88] sm:$0xff]  ;;  %v1169_v18 = vld [vmem:[%s7407_s1 + $0x1dd8] sm:$0xff] }
  0xcb   : > { %3452 = vmatpush1.bf16.msra.mxu1 %v3451_v25  ;;  %3198 = vmatprep.subr.bf16.mxu0 %v3197_v26  ;;  %v3217_v25 = vpack.c.bf16 %v1087_v20, %v1079_v19  ;;  %v1078_v26 = vld [vmem:[%s7407_s1 + $0x1b00] sm:$0xff]  ;;  %v1167_v16 = vld [vmem:[%s7407_s1 + $0x1dc8] sm:$0xff] }
  0xcc   : > { %3454 = vmatprep.subr.bf16.mxu1 %v3453_v30  ;;  %1462 = vmatprep.mubr.f32.mxu0 %v211_v36  ;;  %v1088_v30 = vld [vmem:[%s7407_s1 + $0x1b50] sm:$0xff]  ;;  %v3219_v35 = vpack.c.bf16 %v1086_v27, %v1078_v26  ;;  %v3237_v21 = vpack.c.bf16 %v1167_v16, %v1159_v15  ;;  %v1175_v27 = vld [vmem:[%s7407_s1 + $0x1e08] sm:$0xff] }
  0xcd   : > { %1770 = vmatprep.mubr.f32.mxu1 %v211_v36  ;;  %1463 = vmatmul.mubr.f32.gmra.mrb[2].mxu0 %v210_v38  ;;  %v3475_v36 = vpack.c.bf16 %v1088_v30, %v1080_v28  ;;  %v1168_v26 = vld [vmem:[%s7407_s1 + $0x1dd0] sm:$0xff]  ;;  %v1183_v28 = vld [vmem:[%s7407_s1 + $0x1e48] sm:$0xff]  ;;  %v1185_v30 = vld [vmem:[%s7407_s1 + $0x1e58] sm:$0xff] }
  0xce   : > { %3200 = vmatpush1.bf16.msra.mxu0 %v3199_v37  ;;  %1771 = vmatmul.mubr.f32.gmra.mrb[2].mxu1 %v210_v38  ;;  %v3221_v37 = vpack.c.bf16 %v1103_v32, %v1095_v31  ;;  %v1094_v38 = vld [vmem:[%s7407_s1 + $0x1b80] sm:$0xff]  ;;  %v3241_v33 = vpack.c.bf16 %v1183_v28, %v1175_v27  ;;  %v213_v27 = vld [vmem:[%s4448_s11 + $0x78] sm:$0xff] }
  0xcf   : > { %3456 = vmatpush1.bf16.msra.mxu1 %v3455_v39  ;;  %3202 = vmatprep.subr.bf16.mxu0 %v3201_v40  ;;  %v1102_v39 = vld [vmem:[%s7407_s1 + $0x1bc0] sm:$0xff]  ;;  %v1096_v40 = vld [vmem:[%s7407_s1 + $0x1b90] sm:$0xff]  ;;  %v237_v28 = vld [vmem:[%s7407_s1 + $0xb8] sm:$0xff] }
  0xd0   : > { %3458 = vmatprep.subr.bf16.mxu1 %v3457_v44  ;;  %1533 = vmatprep.mubr.f32.mxu0 %v205_v50  ;;  %v1119_v44 = vld [vmem:[%s7407_s1 + $0x1c48] sm:$0xff]  ;;  %v3223_v47 = vpack.c.bf16 %v1102_v39, %v1094_v38  ;;  %v3479_v48 = vpack.c.bf16 %v1104_v42, %v1096_v40  ;;  %v1184_v38 = vld [vmem:[%s7407_s1 + $0x1e50] sm:$0xff]  ;;  %v1201_v42 = vld [vmem:[%s7407_s1 + $0x1ed8] sm:$0xff] }
  0xd1   : > { %1841 = vmatprep.mubr.f32.mxu1 %v205_v50  ;;  %v3225_v49 = vpack.c.bf16 %v1119_v44, %v1111_v43  ;;  %v1110_v50 = vld [vmem:[%s7407_s1 + $0x1c00] sm:$0xff]  ;;  %v1191_v39 = vld [vmem:[%s7407_s1 + $0x1e88] sm:$0xff] }
  0xd2   : > { %3204 = vmatpush1.bf16.msra.mxu0 %v3203_v51  ;;  %v1118_v51 = vld [vmem:[%s7407_s1 + $0x1c40] sm:$0xff]  ;;  %v1199_v40 = vld [vmem:[%s7407_s1 + $0x1ec8] sm:$0xff] }
  0xd3   : > { %3460 = vmatpush1.bf16.msra.mxu1 %v3459_v52  ;;  %3206 = vmatprep.subr.bf16.mxu0 %v3205_v53  ;;  %v1112_v52 = vld [vmem:[%s7407_s1 + $0x1c10] sm:$0xff]  ;;  %v3481_v53 = vpack.c.bf16 %v1121_v46, %v1113_v45  ;;  %v3227_v59 = vpack.c.bf16 %v1118_v51, %v1110_v50  ;;  %v3245_v45 = vpack.c.bf16 %v1199_v40, %v1191_v39  ;;  %v1190_v46 = vld [vmem:[%s7407_s1 + $0x1e80] sm:$0xff]  ;;  %v1207_v51 = vld [vmem:[%s7407_s1 + $0x1f08] sm:$0xff] }
  0xd4   : > { %3462 = vmatprep.subr.bf16.mxu1 %v3461_v57  ;;  %v1129_v57 = vld [vmem:[%s7407_s1 + $0x1c98] sm:$0xff]  ;;  %v3483_v60 = vpack.c.bf16 %v1120_v54, %v1112_v52  ;;  %v1200_v50 = vld [vmem:[%s7407_s1 + $0x1ed0] sm:$0xff]  ;;  %v1215_v52 = vld [vmem:[%s7407_s1 + $0x1f48] sm:$0xff] }
  0xd5   : > { %v1217_v54 = vld [vmem:[%s7407_s1 + $0x1f58] sm:$0xff] }
  0xd6   : > { %3208 = vmatpush1.bf16.msra.mxu0 %v3207_v63  ;;  %v1134_v63 = vld [vmem:[%s7407_s1 + $0x1cc0] sm:$0xff]  ;;  %v253_v39 = vld [vmem:[%s7407_s1 + $0x138] sm:$0xff] }
  0xd7   : > { %3464 = vmatpush1.bf16.msra.mxu1 %v3463_v0  ;;  %3210 = vmatprep.subr.bf16.mxu0 %v3209_v1  ;;  %v1128_v0 = vld [vmem:[%s7407_s1 + $0x1c90] sm:$0xff]  ;;  %v3485_v1 = vpack.c.bf16 %v1137_v58, %v1129_v57  ;;  %v3231_v7 = vpack.c.bf16 %v1134_v63, %v1126_v62  ;;  %v3249_v57 = vpack.c.bf16 %v1215_v52, %v1207_v51  ;;  %v1206_v58 = vld [vmem:[%s7407_s1 + $0x1f00] sm:$0xff]  ;;  %v1223_v63 = vld [vmem:[%s7407_s1 + $0x1f88] sm:$0xff] }
  0xd8   : > { %3466 = vmatprep.subr.bf16.mxu1 %v3465_v5  ;;  %v1145_v5 = vld [vmem:[%s7407_s1 + $0x1d18] sm:$0xff]  ;;  %v3487_v8 = vpack.c.bf16 %v1136_v2, %v1128_v0  ;;  %v1216_v62 = vld [vmem:[%s7407_s1 + $0x1f50] sm:$0xff]  ;;  %v1231_v0 = vld [vmem:[%s7407_s1 + $0x1fc8] sm:$0xff] }
  0xd9   : > { %v1233_v2 = vld [vmem:[%s7407_s1 + $0x1fd8] sm:$0xff]  ;;  %v275_v51 = vld [vmem:[%s7407_s1 + $0x1e8] sm:$0xff] }
  0xda   : > { %3212 = vmatpush1.bf16.msra.mxu0 %v3211_v11  ;;  %v1150_v11 = vld [vmem:[%s7407_s1 + $0x1d40] sm:$0xff]  ;;  %v261_v40 = vld [vmem:[%s7407_s1 + $0x178] sm:$0xff] }
  0xdb   : > { %3468 = vmatpush1.bf16.msra.mxu1 %v3467_v12  ;;  %3214 = vmatprep.subr.bf16.mxu0 %v3213_v13  ;;  %v1144_v12 = vld [vmem:[%s7407_s1 + $0x1d10] sm:$0xff]  ;;  %v3489_v13 = vpack.c.bf16 %v1153_v6, %v1145_v5  ;;  %v3235_v19 = vpack.c.bf16 %v1150_v11, %v1142_v10  ;;  %v3253_v5 = vpack.c.bf16 %v1231_v0, %v1223_v63  ;;  %v1222_v6 = vld [vmem:[%s7407_s1 + $0x1f80] sm:$0xff]  ;;  %v219_v11 = vld [vmem:[%s7407_s1 + $0x28] sm:$0xff] }
  0xdc   : > { %3470 = vmatprep.subr.bf16.mxu1 %v3469_v17  ;;  %v1161_v17 = vld [vmem:[%s7407_s1 + $0x1d98] sm:$0xff]  ;;  %v3491_v20 = vpack.c.bf16 %v1152_v14, %v1144_v12  ;;  %v1232_v10 = vld [vmem:[%s7407_s1 + $0x1fd0] sm:$0xff]  ;;  %v227_v12 = vld [vmem:[%s7407_s1 + $0x68] sm:$0xff] }
  0xdd   : > { %v229_v14 = vld [vmem:[%s7407_s1 + $0x78] sm:$0xff]  ;;  %v291_v63 = vld [vmem:[%s7407_s1 + $0x268] sm:$0xff] }
  0xde   : > { %3216 = vmatpush1.bf16.msra.mxu0 %v3215_v23  ;;  %v1166_v23 = vld [vmem:[%s7407_s1 + $0x1dc0] sm:$0xff]  ;;  %v269_v52 = vld [vmem:[%s7407_s1 + $0x1b8] sm:$0xff]  ;;  %v4098_v0 = vld [vmem:[%s4448_s11 + $0x8] sm:$0xff] }
  0xdf   : > { %3472 = vmatpush1.bf16.msra.mxu1 %v3471_v24  ;;  %3218 = vmatprep.subr.bf16.mxu0 %v3217_v25  ;;  %v1160_v24 = vld [vmem:[%s7407_s1 + $0x1d90] sm:$0xff]  ;;  %v3493_v25 = vpack.c.bf16 %v1169_v18, %v1161_v17  ;;  %v3239_v31 = vpack.c.bf16 %v1166_v23, %v1158_v22  ;;  %v3513_v17 = vpack.c.bf16 %v227_v12, %v219_v11  ;;  %v218_v18 = vld [vmem:[%s7407_s1 + $0x20] sm:$0xff]  ;;  %v299_v11 = vld [vmem:[%s7407_s1 + $0x2a8] sm:$0xff] }
  0xe0   : > { %3474 = vmatprep.subr.bf16.mxu1 %v3473_v29  ;;  %v1177_v29 = vld [vmem:[%s7407_s1 + $0x1e18] sm:$0xff]  ;;  %v3495_v32 = vpack.c.bf16 %v1168_v26, %v1160_v24  ;;  %v228_v22 = vld [vmem:[%s7407_s1 + $0x70] sm:$0xff]  ;;  %v235_v24 = vld [vmem:[%s7407_s1 + $0xa8] sm:$0xff] }
  0xe1   : > { %v204_v23 = vld [vmem:[%s4448_s11 + $0x30] sm:$0xff]  ;;  %v307_v12 = vld [vmem:[%s7407_s1 + $0x2e8] sm:$0xff] }
  0xe2   : > { %3220 = vmatpush1.bf16.msra.mxu0 %v3219_v35  ;;  %v1182_v35 = vld [vmem:[%s7407_s1 + $0x1e40] sm:$0xff] }
  0xe3   : > { %3476 = vmatpush1.bf16.msra.mxu1 %v3475_v36  ;;  %3222 = vmatprep.subr.bf16.mxu0 %v3221_v37  ;;  %v1176_v36 = vld [vmem:[%s7407_s1 + $0x1e10] sm:$0xff]  ;;  %v3497_v37 = vpack.c.bf16 %v1185_v30, %v1177_v29  ;;  %v3243_v43 = vpack.c.bf16 %v1182_v35, %v1174_v34  ;;  %v245_v29 = vld [vmem:[%s7407_s1 + $0xf8] sm:$0xff] }
  0xe4   : > { %3478 = vmatprep.subr.bf16.mxu1 %v3477_v41  ;;  %v1193_v41 = vld [vmem:[%s7407_s1 + $0x1e98] sm:$0xff]  ;;  %v3499_v44 = vpack.c.bf16 %v1184_v38, %v1176_v36  ;;  %v244_v35 = vld [vmem:[%s7407_s1 + $0xf0] sm:$0xff]  ;;  %v251_v36 = vld [vmem:[%s7407_s1 + $0x128] sm:$0xff]  ;;  %v3773_v38 = vpack.c.bf16 %v245_v29, %v237_v28 }
  0xe6   : > { %3224 = vmatpush1.bf16.msra.mxu0 %v3223_v47  ;;  %v1198_v47 = vld [vmem:[%s7407_s1 + $0x1ec0] sm:$0xff] }
  0xe7   : > { %3480 = vmatpush1.bf16.msra.mxu1 %v3479_v48  ;;  %3226 = vmatprep.subr.bf16.mxu0 %v3225_v49  ;;  %v1192_v48 = vld [vmem:[%s7407_s1 + $0x1e90] sm:$0xff]  ;;  %v3501_v49 = vpack.c.bf16 %v1201_v42, %v1193_v41  ;;  %v3247_v55 = vpack.c.bf16 %v1198_v47, %v1190_v46  ;;  %v258_v46 = vld [vmem:[%s7407_s1 + $0x160] sm:$0xff] }
  0xe8   : > { %3482 = vmatprep.subr.bf16.mxu1 %v3481_v53  ;;  %v1209_v53 = vld [vmem:[%s7407_s1 + $0x1f18] sm:$0xff]  ;;  %v3503_v56 = vpack.c.bf16 %v1200_v50, %v1192_v48  ;;  %v212_v41 = vld [vmem:[%s4448_s11 + $0x70] sm:$0xff]  ;;  %v3777_v48 = vpack.c.bf16 %v261_v40, %v253_v39  ;;  %v267_v50 = vld [vmem:[%s7407_s1 + $0x1a8] sm:$0xff] }
  0xe9   : > { %v252_v47 = vld [vmem:[%s7407_s1 + $0x130] sm:$0xff] }
  0xea   : > { %3228 = vmatpush1.bf16.msra.mxu0 %v3227_v59  ;;  %v1214_v59 = vld [vmem:[%s7407_s1 + $0x1f40] sm:$0xff] }
  0xeb   : > { %3484 = vmatpush1.bf16.msra.mxu1 %v3483_v60  ;;  %3230 = vmatprep.subr.bf16.mxu0 %v3229_v61  ;;  %v1208_v60 = vld [vmem:[%s7407_s1 + $0x1f10] sm:$0xff]  ;;  %v3505_v61 = vpack.c.bf16 %v1217_v54, %v1209_v53  ;;  %v3251_v3 = vpack.c.bf16 %v1214_v59, %v1206_v58  ;;  %v277_v53 = vld [vmem:[%s7407_s1 + $0x1f8] sm:$0xff]  ;;  %v274_v58 = vld [vmem:[%s7407_s1 + $0x1e0] sm:$0xff] }
  0xec   : > { %3486 = vmatprep.subr.bf16.mxu1 %v3485_v1  ;;  %v1225_v1 = vld [vmem:[%s7407_s1 + $0x1f98] sm:$0xff]  ;;  %v3507_v4 = vpack.c.bf16 %v1216_v62, %v1208_v60  ;;  %v268_v59 = vld [vmem:[%s7407_s1 + $0x1b0] sm:$0xff]  ;;  %v3781_v60 = vpack.c.bf16 %v277_v53, %v269_v52  ;;  %v283_v62 = vld [vmem:[%s7407_s1 + $0x228] sm:$0xff] }
  0xee   : > { %3232 = vmatpush1.bf16.msra.mxu0 %v3231_v7  ;;  %v1230_v7 = vld [vmem:[%s7407_s1 + $0x1fc0] sm:$0xff] }
  0xef   : > { %3488 = vmatpush1.bf16.msra.mxu1 %v3487_v8  ;;  %3234 = vmatprep.subr.bf16.mxu0 %v3233_v9  ;;  %v1224_v8 = vld [vmem:[%s7407_s1 + $0x1f90] sm:$0xff]  ;;  %v3509_v9 = vpack.c.bf16 %v1233_v2, %v1225_v1  ;;  %v3255_v15 = vpack.c.bf16 %v1230_v7, %v1222_v6  ;;  %v285_v1 = vld [vmem:[%s7407_s1 + $0x238] sm:$0xff]  ;;  %v282_v6 = vld [vmem:[%s7407_s1 + $0x220] sm:$0xff] }
  0xf0   : > { %3490 = vmatprep.subr.bf16.mxu1 %v3489_v13  ;;  %v221_v13 = vld [vmem:[%s7407_s1 + $0x38] sm:$0xff]  ;;  %v3511_v16 = vpack.c.bf16 %v1232_v10, %v1224_v8  ;;  %v290_v7 = vld [vmem:[%s7407_s1 + $0x260] sm:$0xff]  ;;  %v284_v8 = vld [vmem:[%s7407_s1 + $0x230] sm:$0xff] }
  0xf1   : > { %v293_v2 = vld [vmem:[%s7407_s1 + $0x278] sm:$0xff]  ;;  %v292_v10 = vld [vmem:[%s7407_s1 + $0x270] sm:$0xff] }
  0xf2   : > { %3236 = vmatpush1.bf16.msra.mxu0 %v3235_v19  ;;  %v226_v19 = vld [vmem:[%s7407_s1 + $0x60] sm:$0xff] }
  0xf3   : > { %3492 = vmatpush1.bf16.msra.mxu1 %v3491_v20  ;;  %3238 = vmatprep.subr.bf16.mxu0 %v3237_v21  ;;  %v3769_v20 = vpack.c.bf16 %v229_v14, %v221_v13  ;;  %v220_v21 = vld [vmem:[%s7407_s1 + $0x30] sm:$0xff]  ;;  %v3515_v26 = vpack.c.bf16 %v226_v19, %v218_v18  ;;  %v301_v13 = vld [vmem:[%s7407_s1 + $0x2b8] sm:$0xff]  ;;  %v298_v18 = vld [vmem:[%s7407_s1 + $0x2a0] sm:$0xff] }
  0xf4   : > { %3494 = vmatprep.subr.bf16.mxu1 %v3493_v25  ;;  %v243_v25 = vld [vmem:[%s7407_s1 + $0xe8] sm:$0xff]  ;;  %v3771_v30 = vpack.c.bf16 %v228_v22, %v220_v21  ;;  %v309_v14 = vld [vmem:[%s7407_s1 + $0x2f8] sm:$0xff]  ;;  %v306_v19 = vld [vmem:[%s7407_s1 + $0x2e0] sm:$0xff] }
  0xf5   : > { %v3517_v34 = vpack.c.bf16 %v243_v25, %v235_v24  ;;  %v3789_v21 = vpack.c.bf16 %v309_v14, %v301_v13  ;;  %v308_v22 = vld [vmem:[%s7407_s1 + $0x2f0] sm:$0xff]  ;;  %v323_v24 = vld [vmem:[%s7407_s1 + $0x368] sm:$0xff]  ;;  %v317_v25 = vld [vmem:[%s7407_s1 + $0x338] sm:$0xff] }
  0xf6   : > { %3240 = vmatpush1.bf16.msra.mxu0 %v3239_v31  ;;  %v234_v31 = vld [vmem:[%s7407_s1 + $0xa0] sm:$0xff] }
  0xf7   : > { %3496 = vmatpush1.bf16.msra.mxu1 %v3495_v32  ;;  %3242 = vmatprep.subr.bf16.mxu0 %v3241_v33  ;;  %v242_v32 = vld [vmem:[%s7407_s1 + $0xe0] sm:$0xff]  ;;  %v236_v33 = vld [vmem:[%s7407_s1 + $0xb0] sm:$0xff] }
  0xf8   : > { %3498 = vmatprep.subr.bf16.mxu1 %v3497_v37  ;;  %v259_v37 = vld [vmem:[%s7407_s1 + $0x168] sm:$0xff]  ;;  %v3519_v42 = vpack.c.bf16 %v242_v32, %v234_v31  ;;  %v322_v31 = vld [vmem:[%s7407_s1 + $0x360] sm:$0xff]  ;;  %v316_v32 = vld [vmem:[%s7407_s1 + $0x330] sm:$0xff] }
  0xf9   : > { %v378_v14 = vld [vmem:[%s7407_s1 + $0x520] sm:$0xff] }
  0xfa   : > { %3244 = vmatpush1.bf16.msra.mxu0 %v3243_v43  ;;  %v3775_v43 = vpack.c.bf16 %v244_v35, %v236_v33  ;;  %v331_v35 = vld [vmem:[%s7407_s1 + $0x3a8] sm:$0xff] }
  0xfb   : > { %3500 = vmatpush1.bf16.msra.mxu1 %v3499_v44  ;;  %3246 = vmatprep.subr.bf16.mxu0 %v3245_v45  ;;  %v3521_v44 = vpack.c.bf16 %v259_v37, %v251_v36  ;;  %v250_v45 = vld [vmem:[%s7407_s1 + $0x120] sm:$0xff]  ;;  %v339_v36 = vld [vmem:[%s7407_s1 + $0x3e8] sm:$0xff]  ;;  %v333_v37 = vld [vmem:[%s7407_s1 + $0x3b8] sm:$0xff] }
  0xfc   : > { %3502 = vmatprep.subr.bf16.mxu1 %v3501_v49  ;;  %v260_v49 = vld [vmem:[%s7407_s1 + $0x170] sm:$0xff]  ;;  %v3523_v54 = vpack.c.bf16 %v258_v46, %v250_v45 }
  0xfd   : > { %v340_v46 = vld [vmem:[%s7407_s1 + $0x3f0] sm:$0xff] }
  0xfe   : > { %3248 = vmatpush1.bf16.msra.mxu0 %v3247_v55  ;;  %v3779_v55 = vpack.c.bf16 %v260_v49, %v252_v47  ;;  %v347_v47 = vld [vmem:[%s7407_s1 + $0x428] sm:$0xff]  ;;  %v349_v49 = vld [vmem:[%s7407_s1 + $0x438] sm:$0xff] }
  0xff   : > { %3504 = vmatpush1.bf16.msra.mxu1 %v3503_v56  ;;  %3250 = vmatprep.subr.bf16.mxu0 %v3249_v57  ;;  %v3525_v56 = vpack.c.bf16 %v275_v51, %v267_v50  ;;  %v266_v57 = vld [vmem:[%s7407_s1 + $0x1a0] sm:$0xff]  ;;  %v357_v50 = vld [vmem:[%s7407_s1 + $0x478] sm:$0xff] }
 0x100   : > { %3506 = vmatprep.subr.bf16.mxu1 %v3505_v61  ;;  %v276_v61 = vld [vmem:[%s7407_s1 + $0x1f0] sm:$0xff] }
 0x102   : > { %3252 = vmatpush1.bf16.msra.mxu0 %v3251_v3  ;;  %v3527_v3 = vpack.c.bf16 %v274_v58, %v266_v57  ;;  %v3801_v57 = vpack.c.bf16 %v357_v50, %v349_v49  ;;  %v356_v58 = vld [vmem:[%s7407_s1 + $0x470] sm:$0xff]  ;;  %v426_v50 = vld [vmem:[%s7407_s1 + $0x6a0] sm:$0xff] }
 0x103   : > { %3508 = vmatpush1.bf16.msra.mxu1 %v3507_v4  ;;  %3254 = vmatprep.subr.bf16.mxu0 %v3253_v5  ;;  %v3783_v4 = vpack.c.bf16 %v276_v61, %v268_v59  ;;  %v3529_v5 = vpack.c.bf16 %v291_v63, %v283_v62  ;;  %v363_v59 = vld [vmem:[%s7407_s1 + $0x4a8] sm:$0xff]  ;;  %v365_v61 = vld [vmem:[%s7407_s1 + $0x4b8] sm:$0xff] }
 0x104   : > { %3510 = vmatprep.subr.bf16.mxu1 %v3509_v9  ;;  %v3785_v9 = vpack.c.bf16 %v293_v2, %v285_v1  ;;  %v373_v62 = vld [vmem:[%s7407_s1 + $0x4f8] sm:$0xff]  ;;  %v362_v2 = vld [vmem:[%s7407_s1 + $0x4a0] sm:$0xff] }
 0x106   : > { %3256 = vmatpush1.bf16.msra.mxu0 %v3255_v15  ;;  %v3531_v15 = vpack.c.bf16 %v290_v7, %v282_v6  ;;  %v372_v6 = vld [vmem:[%s7407_s1 + $0x4f0] sm:$0xff]  ;;  %v379_v7 = vld [vmem:[%s7407_s1 + $0x528] sm:$0xff] }
 0x107   : > { %3512 = vmatpush1.bf16.msra.mxu1 %v3511_v16  ;;  %3514 = vmatprep.subr.bf16.mxu0 %v3513_v17  ;;  %v3787_v16 = vpack.c.bf16 %v292_v10, %v284_v8  ;;  %v3533_v17 = vpack.c.bf16 %v307_v12, %v299_v11  ;;  %v387_v8 = vld [vmem:[%s7407_s1 + $0x568] sm:$0xff]  ;;  %v389_v10 = vld [vmem:[%s7407_s1 + $0x578] sm:$0xff] }
 0x108   : > { %3770 = vmatprep.subr.bf16.mxu1 %v3769_v20  ;;  %v300_v20 = vld [vmem:[%s7407_s1 + $0x2b0] sm:$0xff]  ;;  %v3553_v13 = vpack.c.bf16 %v387_v8, %v379_v7 }
 0x109   : > { %1534 = vmatmul.mubr.f32.vlgmr.msra.gmra.mrb[0].mxu0 %v204_v23  ;;  %v3791_v28 = vpack.c.bf16 %v308_v22, %v300_v20  ;;  %v403_v20 = vld [vmem:[%s7407_s1 + $0x5e8] sm:$0xff]  ;;  %v405_v22 = vld [vmem:[%s7407_s1 + $0x5f8] sm:$0xff] }
 0x10a   : > { %1842 = vmatmul.mubr.f32.vlgmr.msra.gmra.mrb[0].mxu1 %v204_v23  ;;  %3516 = vmatpush1.bf16.msra.mxu0 %v3515_v26  ;;  %v315_v23 = vld [vmem:[%s7407_s1 + $0x328] sm:$0xff]  ;;  %v325_v26 = vld [vmem:[%s7407_s1 + $0x378] sm:$0xff] }
 0x10b   : > { %3772 = vmatpush1.bf16.msra.mxu1 %v3771_v30  ;;  %1539 = vmatprep.mubr.f32.mxu0 %v213_v27  ;;  %v3537_v29 = vpack.c.bf16 %v323_v24, %v315_v23  ;;  %v314_v30 = vld [vmem:[%s7407_s1 + $0x320] sm:$0xff]  ;;  %v3793_v33 = vpack.c.bf16 %v325_v26, %v317_v25 }
 0x10c   : > { %1847 = vmatprep.mubr.f32.mxu1 %v213_v27  ;;  %3518 = vmatprep.subr.bf16.mxu0 %v3517_v34  ;;  %v3535_v27 = vpack.c.bf16 %v306_v19, %v298_v18  ;;  %v324_v34 = vld [vmem:[%s7407_s1 + $0x370] sm:$0xff]  ;;  %v3539_v39 = vpack.c.bf16 %v322_v31, %v314_v30  ;;  %v395_v19 = vld [vmem:[%s7407_s1 + $0x5a8] sm:$0xff]  ;;  %v394_v26 = vld [vmem:[%s7407_s1 + $0x5a0] sm:$0xff] }
 0x10d   : > { %1540 = vmatmul.mubr.f32.gmra.mrb[2].mxu0 %v212_v41  ;;  %3774 = vmatprep.subr.bf16.mxu1 %v3773_v38  ;;  %v341_v38 = vld [vmem:[%s7407_s1 + $0x3f8] sm:$0xff]  ;;  %v3795_v40 = vpack.c.bf16 %v324_v34, %v316_v32  ;;  %v388_v18 = vld [vmem:[%s7407_s1 + $0x570] sm:$0xff]  ;;  %v3557_v25 = vpack.c.bf16 %v403_v20, %v395_v19  ;;  %v411_v31 = vld [vmem:[%s7407_s1 + $0x628] sm:$0xff] }
 0x10e   : > { %1848 = vmatmul.mubr.f32.gmra.mrb[2].mxu1 %v212_v41  ;;  %3520 = vmatpush1.bf16.msra.mxu0 %v3519_v42  ;;  %v3541_v41 = vpack.c.bf16 %v339_v36, %v331_v35  ;;  %v330_v42 = vld [vmem:[%s7407_s1 + $0x3a0] sm:$0xff]  ;;  %v3797_v45 = vpack.c.bf16 %v341_v38, %v333_v37  ;;  %v404_v30 = vld [vmem:[%s7407_s1 + $0x5f0] sm:$0xff]  ;;  %v419_v32 = vld [vmem:[%s7407_s1 + $0x668] sm:$0xff] }
 0x10f   : > { %3776 = vmatpush1.bf16.msra.mxu1 %v3775_v43  ;;  %3522 = vmatprep.subr.bf16.mxu0 %v3521_v44  ;;  %v338_v43 = vld [vmem:[%s7407_s1 + $0x3e0] sm:$0xff]  ;;  %v332_v44 = vld [vmem:[%s7407_s1 + $0x3b0] sm:$0xff]  ;;  %v421_v34 = vld [vmem:[%s7407_s1 + $0x678] sm:$0xff]  ;;  %v3561_v37 = vpack.c.bf16 %v419_v32, %v411_v31 }
 0x110   : > { %3778 = vmatprep.subr.bf16.mxu1 %v3777_v48  ;;  %1918 = vmatprep.mubr.f32.mxu0 %v4098_v0  ;;  %v355_v48 = vld [vmem:[%s7407_s1 + $0x468] sm:$0xff]  ;;  %v3543_v51 = vpack.c.bf16 %v338_v43, %v330_v42  ;;  %v3799_v52 = vpack.c.bf16 %v340_v46, %v332_v44  ;;  %v410_v38 = vld [vmem:[%s7407_s1 + $0x620] sm:$0xff]  ;;  %v420_v42 = vld [vmem:[%s7407_s1 + $0x670] sm:$0xff] }
 0x111   : > { %2226 = vmatprep.mubr.f32.mxu1 %v4098_v0  ;;  %v3545_v53 = vpack.c.bf16 %v355_v48, %v347_v47  ;;  %v427_v43 = vld [vmem:[%s7407_s1 + $0x6a8] sm:$0xff]  ;;  %v437_v46 = vld [vmem:[%s7407_s1 + $0x6f8] sm:$0xff] }
 0x112   : > { %3524 = vmatpush1.bf16.msra.mxu0 %v3523_v54  ;;  %v346_v54 = vld [vmem:[%s7407_s1 + $0x420] sm:$0xff]  ;;  %v435_v44 = vld [vmem:[%s7407_s1 + $0x6e8] sm:$0xff] }
 0x113   : > { %3780 = vmatpush1.bf16.msra.mxu1 %v3779_v55  ;;  %3526 = vmatprep.subr.bf16.mxu0 %v3525_v56  ;;  %v354_v55 = vld [vmem:[%s7407_s1 + $0x460] sm:$0xff]  ;;  %v348_v56 = vld [vmem:[%s7407_s1 + $0x430] sm:$0xff]  ;;  %v3565_v49 = vpack.c.bf16 %v435_v44, %v427_v43  ;;  %v517_v43 = vld [vmem:[%s7407_s1 + $0x978] sm:$0xff] }
 0x114   : > { %3782 = vmatprep.subr.bf16.mxu1 %v3781_v60  ;;  %v371_v60 = vld [vmem:[%s7407_s1 + $0x4e8] sm:$0xff]  ;;  %v3547_v63 = vpack.c.bf16 %v354_v55, %v346_v54  ;;  %v3803_v0 = vpack.c.bf16 %v356_v58, %v348_v56  ;;  %v436_v54 = vld [vmem:[%s7407_s1 + $0x6f0] sm:$0xff]  ;;  %v453_v58 = vld [vmem:[%s7407_s1 + $0x778] sm:$0xff] }
 0x115   : > { %v3549_v1 = vpack.c.bf16 %v371_v60, %v363_v59  ;;  %v443_v55 = vld [vmem:[%s7407_s1 + $0x728] sm:$0xff] }
 0x116   : > { %3528 = vmatpush1.bf16.msra.mxu0 %v3527_v3  ;;  %v370_v3 = vld [vmem:[%s7407_s1 + $0x4e0] sm:$0xff]  ;;  %v451_v56 = vld [vmem:[%s7407_s1 + $0x768] sm:$0xff] }
 0x117   : > { %3784 = vmatpush1.bf16.msra.mxu1 %v3783_v4  ;;  %3530 = vmatprep.subr.bf16.mxu0 %v3529_v5  ;;  %v364_v4 = vld [vmem:[%s7407_s1 + $0x4b0] sm:$0xff]  ;;  %v3805_v5 = vpack.c.bf16 %v373_v62, %v365_v61  ;;  %v3551_v11 = vpack.c.bf16 %v370_v3, %v362_v2  ;;  %v3569_v61 = vpack.c.bf16 %v451_v56, %v443_v55  ;;  %v442_v62 = vld [vmem:[%s7407_s1 + $0x720] sm:$0xff]  ;;  %v459_v3 = vld [vmem:[%s7407_s1 + $0x7a8] sm:$0xff] }
 0x118   : > { %3786 = vmatprep.subr.bf16.mxu1 %v3785_v9  ;;  %v381_v9 = vld [vmem:[%s7407_s1 + $0x538] sm:$0xff]  ;;  %v3807_v12 = vpack.c.bf16 %v372_v6, %v364_v4  ;;  %v452_v2 = vld [vmem:[%s7407_s1 + $0x770] sm:$0xff]  ;;  %v467_v4 = vld [vmem:[%s7407_s1 + $0x7e8] sm:$0xff] }
 0x119   : > { %v469_v6 = vld [vmem:[%s7407_s1 + $0x7f8] sm:$0xff] }
 0x11a   : > { %3532 = vmatpush1.bf16.msra.mxu0 %v3531_v15  ;;  %v386_v15 = vld [vmem:[%s7407_s1 + $0x560] sm:$0xff]  ;;  %v525_v55 = vld [vmem:[%s7407_s1 + $0x9b8] sm:$0xff] }
 0x11b   : > { %3788 = vmatpush1.bf16.msra.mxu1 %v3787_v16  ;;  %3534 = vmatprep.subr.bf16.mxu0 %v3533_v17  ;;  %v380_v16 = vld [vmem:[%s7407_s1 + $0x530] sm:$0xff]  ;;  %v3809_v17 = vpack.c.bf16 %v389_v10, %v381_v9  ;;  %v3555_v23 = vpack.c.bf16 %v386_v15, %v378_v14  ;;  %v3573_v9 = vpack.c.bf16 %v467_v4, %v459_v3  ;;  %v458_v10 = vld [vmem:[%s7407_s1 + $0x7a0] sm:$0xff]  ;;  %v475_v15 = vld [vmem:[%s7407_s1 + $0x828] sm:$0xff] }
 0x11c   : > { %3790 = vmatprep.subr.bf16.mxu1 %v3789_v21  ;;  %v397_v21 = vld [vmem:[%s7407_s1 + $0x5b8] sm:$0xff]  ;;  %v3811_v24 = vpack.c.bf16 %v388_v18, %v380_v16  ;;  %v468_v14 = vld [vmem:[%s7407_s1 + $0x7f0] sm:$0xff]  ;;  %v483_v16 = vld [vmem:[%s7407_s1 + $0x868] sm:$0xff] }
 0x11d   : > { %v485_v18 = vld [vmem:[%s7407_s1 + $0x878] sm:$0xff]  ;;  %v547_v3 = vld [vmem:[%s7407_s1 + $0xa68] sm:$0xff] }
 0x11e   : > { %3536 = vmatpush1.bf16.msra.mxu0 %v3535_v27  ;;  %v402_v27 = vld [vmem:[%s7407_s1 + $0x5e0] sm:$0xff]  ;;  %v533_v56 = vld [vmem:[%s7407_s1 + $0x9f8] sm:$0xff] }
 0x11f   : > { %3792 = vmatpush1.bf16.msra.mxu1 %v3791_v28  ;;  %3538 = vmatprep.subr.bf16.mxu0 %v3537_v29  ;;  %v396_v28 = vld [vmem:[%s7407_s1 + $0x5b0] sm:$0xff]  ;;  %v3813_v29 = vpack.c.bf16 %v405_v22, %v397_v21  ;;  %v3559_v35 = vpack.c.bf16 %v402_v27, %v394_v26  ;;  %v3577_v21 = vpack.c.bf16 %v483_v16, %v475_v15  ;;  %v474_v22 = vld [vmem:[%s7407_s1 + $0x820] sm:$0xff]  ;;  %v491_v27 = vld [vmem:[%s7407_s1 + $0x8a8] sm:$0xff] }
 0x120   : > { %3794 = vmatprep.subr.bf16.mxu1 %v3793_v33  ;;  %v413_v33 = vld [vmem:[%s7407_s1 + $0x638] sm:$0xff]  ;;  %v3815_v36 = vpack.c.bf16 %v404_v30, %v396_v28  ;;  %v484_v26 = vld [vmem:[%s7407_s1 + $0x870] sm:$0xff]  ;;  %v499_v28 = vld [vmem:[%s7407_s1 + $0x8e8] sm:$0xff] }
 0x121   : > { %v501_v30 = vld [vmem:[%s7407_s1 + $0x8f8] sm:$0xff]  ;;  %v555_v15 = vld [vmem:[%s7407_s1 + $0xaa8] sm:$0xff] }
 0x122   : > { %3540 = vmatpush1.bf16.msra.mxu0 %v3539_v39  ;;  %v418_v39 = vld [vmem:[%s7407_s1 + $0x660] sm:$0xff]  ;;  %v4102_v4 = vld [vmem:[%s4448_s11 + $0x18] sm:$0xff]  ;;  %v563_v16 = vld [vmem:[%s7407_s1 + $0xae8] sm:$0xff] }
 0x123   : > { %3796 = vmatpush1.bf16.msra.mxu1 %v3795_v40  ;;  %3542 = vmatprep.subr.bf16.mxu0 %v3541_v41  ;;  %v412_v40 = vld [vmem:[%s7407_s1 + $0x630] sm:$0xff]  ;;  %v3817_v41 = vpack.c.bf16 %v421_v34, %v413_v33  ;;  %v3563_v47 = vpack.c.bf16 %v418_v39, %v410_v38  ;;  %v3581_v33 = vpack.c.bf16 %v499_v28, %v491_v27  ;;  %v490_v34 = vld [vmem:[%s7407_s1 + $0x8a0] sm:$0xff]  ;;  %v507_v39 = vld [vmem:[%s7407_s1 + $0x928] sm:$0xff] }
 0x124   : > { %3798 = vmatprep.subr.bf16.mxu1 %v3797_v45  ;;  %v429_v45 = vld [vmem:[%s7407_s1 + $0x6b8] sm:$0xff]  ;;  %v3819_v48 = vpack.c.bf16 %v420_v42, %v412_v40  ;;  %v500_v38 = vld [vmem:[%s7407_s1 + $0x8f0] sm:$0xff]  ;;  %v515_v40 = vld [vmem:[%s7407_s1 + $0x968] sm:$0xff] }
 0x125   : > { %v509_v42 = vld [vmem:[%s7407_s1 + $0x938] sm:$0xff]  ;;  %v571_v27 = vld [vmem:[%s7407_s1 + $0xb28] sm:$0xff] }
 0x126   : > { %3544 = vmatpush1.bf16.msra.mxu0 %v3543_v51  ;;  %v434_v51 = vld [vmem:[%s7407_s1 + $0x6e0] sm:$0xff]  ;;  %v579_v28 = vld [vmem:[%s7407_s1 + $0xb68] sm:$0xff] }
 0x127   : > { %3800 = vmatpush1.bf16.msra.mxu1 %v3799_v52  ;;  %3546 = vmatprep.subr.bf16.mxu0 %v3545_v53  ;;  %v428_v52 = vld [vmem:[%s7407_s1 + $0x6b0] sm:$0xff]  ;;  %v3821_v53 = vpack.c.bf16 %v437_v46, %v429_v45  ;;  %v3567_v59 = vpack.c.bf16 %v434_v51, %v426_v50  ;;  %v3585_v46 = vpack.c.bf16 %v515_v40, %v507_v39  ;;  %v587_v39 = vld [vmem:[%s7407_s1 + $0xba8] sm:$0xff] }
 0x128   : > { %3802 = vmatprep.subr.bf16.mxu1 %v3801_v57  ;;  %v445_v57 = vld [vmem:[%s7407_s1 + $0x738] sm:$0xff]  ;;  %v3823_v60 = vpack.c.bf16 %v436_v54, %v428_v52  ;;  %v3841_v50 = vpack.c.bf16 %v517_v43, %v509_v42  ;;  %v516_v51 = vld [vmem:[%s7407_s1 + $0x970] sm:$0xff]  ;;  %v523_v52 = vld [vmem:[%s7407_s1 + $0x9a8] sm:$0xff] }
 0x129   : > { %v4100_v54 = vld [vmem:[%s4448_s11 + $0x48] sm:$0xff]  ;;  %v597_v42 = vld [vmem:[%s7407_s1 + $0xbf8] sm:$0xff] }
 0x12a   : > { %3548 = vmatpush1.bf16.msra.mxu0 %v3547_v63  ;;  %v450_v63 = vld [vmem:[%s7407_s1 + $0x760] sm:$0xff]  ;;  %v595_v40 = vld [vmem:[%s7407_s1 + $0xbe8] sm:$0xff] }
 0x12b   : > { %3804 = vmatpush1.bf16.msra.mxu1 %v3803_v0  ;;  %3550 = vmatprep.subr.bf16.mxu0 %v3549_v1  ;;  %v444_v0 = vld [vmem:[%s7407_s1 + $0x730] sm:$0xff]  ;;  %v3825_v1 = vpack.c.bf16 %v453_v58, %v445_v57  ;;  %v3571_v7 = vpack.c.bf16 %v450_v63, %v442_v62  ;;  %v4101_v57 = vld [vmem:[%s4448_s11 + $0x40] sm:$0xff] }
 0x12c   : > { %3806 = vmatprep.subr.bf16.mxu1 %v3805_v5  ;;  %v461_v5 = vld [vmem:[%s7407_s1 + $0x7b8] sm:$0xff]  ;;  %v3827_v8 = vpack.c.bf16 %v452_v2, %v444_v0  ;;  %v530_v62 = vld [vmem:[%s7407_s1 + $0x9e0] sm:$0xff]  ;;  %v524_v63 = vld [vmem:[%s7407_s1 + $0x9b0] sm:$0xff]  ;;  %v3845_v0 = vpack.c.bf16 %v533_v56, %v525_v55 }
 0x12d   : > { %v539_v2 = vld [vmem:[%s7407_s1 + $0xa28] sm:$0xff] }
 0x12e   : > { %3552 = vmatpush1.bf16.msra.mxu0 %v3551_v11  ;;  %v466_v11 = vld [vmem:[%s7407_s1 + $0x7e0] sm:$0xff] }
 0x12f   : > { %3808 = vmatpush1.bf16.msra.mxu1 %v3807_v12  ;;  %3554 = vmatprep.subr.bf16.mxu0 %v3553_v13  ;;  %v460_v12 = vld [vmem:[%s7407_s1 + $0x7b0] sm:$0xff]  ;;  %v3829_v13 = vpack.c.bf16 %v469_v6, %v461_v5  ;;  %v3575_v19 = vpack.c.bf16 %v466_v11, %v458_v10  ;;  %v541_v5 = vld [vmem:[%s7407_s1 + $0xa38] sm:$0xff]  ;;  %v538_v10 = vld [vmem:[%s7407_s1 + $0xa20] sm:$0xff] }
 0x130   : > { %3810 = vmatprep.subr.bf16.mxu1 %v3809_v17  ;;  %v477_v17 = vld [vmem:[%s7407_s1 + $0x838] sm:$0xff]  ;;  %v3831_v20 = vpack.c.bf16 %v468_v14, %v460_v12  ;;  %v546_v11 = vld [vmem:[%s7407_s1 + $0xa60] sm:$0xff]  ;;  %v540_v12 = vld [vmem:[%s7407_s1 + $0xa30] sm:$0xff] }
 0x131   : > { %v549_v6 = vld [vmem:[%s7407_s1 + $0xa78] sm:$0xff]  ;;  %v548_v14 = vld [vmem:[%s7407_s1 + $0xa70] sm:$0xff] }
 0x132   : > { %3556 = vmatpush1.bf16.msra.mxu0 %v3555_v23  ;;  %v482_v23 = vld [vmem:[%s7407_s1 + $0x860] sm:$0xff] }
 0x133   : > { %3812 = vmatpush1.bf16.msra.mxu1 %v3811_v24  ;;  %3558 = vmatprep.subr.bf16.mxu0 %v3557_v25  ;;  %v476_v24 = vld [vmem:[%s7407_s1 + $0x830] sm:$0xff]  ;;  %v3833_v25 = vpack.c.bf16 %v485_v18, %v477_v17  ;;  %v3579_v31 = vpack.c.bf16 %v482_v23, %v474_v22  ;;  %v557_v17 = vld [vmem:[%s7407_s1 + $0xab8] sm:$0xff]  ;;  %v554_v22 = vld [vmem:[%s7407_s1 + $0xaa0] sm:$0xff] }
 0x134   : > { %3814 = vmatprep.subr.bf16.mxu1 %v3813_v29  ;;  %v493_v29 = vld [vmem:[%s7407_s1 + $0x8b8] sm:$0xff]  ;;  %v3835_v32 = vpack.c.bf16 %v484_v26, %v476_v24  ;;  %v562_v23 = vld [vmem:[%s7407_s1 + $0xae0] sm:$0xff]  ;;  %v556_v24 = vld [vmem:[%s7407_s1 + $0xab0] sm:$0xff] }
 0x135   : > { %v565_v18 = vld [vmem:[%s7407_s1 + $0xaf8] sm:$0xff]  ;;  %v564_v26 = vld [vmem:[%s7407_s1 + $0xaf0] sm:$0xff] }
 0x136   : > { %3560 = vmatpush1.bf16.msra.mxu0 %v3559_v35  ;;  %v498_v35 = vld [vmem:[%s7407_s1 + $0x8e0] sm:$0xff] }
 0x137   : > { %3816 = vmatpush1.bf16.msra.mxu1 %v3815_v36  ;;  %3562 = vmatprep.subr.bf16.mxu0 %v3561_v37  ;;  %v492_v36 = vld [vmem:[%s7407_s1 + $0x8b0] sm:$0xff]  ;;  %v3837_v37 = vpack.c.bf16 %v501_v30, %v493_v29  ;;  %v3583_v44 = vpack.c.bf16 %v498_v35, %v490_v34  ;;  %v573_v29 = vld [vmem:[%s7407_s1 + $0xb38] sm:$0xff]  ;;  %v570_v34 = vld [vmem:[%s7407_s1 + $0xb20] sm:$0xff] }
 0x138   : > { %3818 = vmatprep.subr.bf16.mxu1 %v3817_v41  ;;  %v4099_v41 = vld [vmem:[%s4448_s11] sm:$0xff]  ;;  %v3839_v45 = vpack.c.bf16 %v500_v38, %v492_v36  ;;  %v581_v30 = vld [vmem:[%s7407_s1 + $0xb78] sm:$0xff]  ;;  %v572_v36 = vld [vmem:[%s7407_s1 + $0xb30] sm:$0xff] }
 0x139   : > { %v578_v35 = vld [vmem:[%s7407_s1 + $0xb60] sm:$0xff]  ;;  %v580_v38 = vld [vmem:[%s7407_s1 + $0xb70] sm:$0xff] }
 0x13a   : > { %3564 = vmatpush1.bf16.msra.mxu0 %v3563_v47  ;;  %v506_v47 = vld [vmem:[%s7407_s1 + $0x920] sm:$0xff]  ;;  %v3603_v43 = vpack.c.bf16 %v578_v35, %v570_v34  ;;  %v660_v34 = vld [vmem:[%s7407_s1 + $0xdf0] sm:$0xff]  ;;  %v667_v35 = vld [vmem:[%s7407_s1 + $0xe28] sm:$0xff] }
 0x13b   : > { %3820 = vmatpush1.bf16.msra.mxu1 %v3819_v48  ;;  %3566 = vmatprep.subr.bf16.mxu0 %v3565_v49  ;;  %v514_v48 = vld [vmem:[%s7407_s1 + $0x960] sm:$0xff]  ;;  %v508_v49 = vld [vmem:[%s7407_s1 + $0x930] sm:$0xff] }
 0x13c   : > { %3822 = vmatprep.subr.bf16.mxu1 %v3821_v53  ;;  %v531_v53 = vld [vmem:[%s7407_s1 + $0x9e8] sm:$0xff]  ;;  %v3587_v58 = vpack.c.bf16 %v514_v48, %v506_v47  ;;  %v594_v47 = vld [vmem:[%s7407_s1 + $0xbe0] sm:$0xff]  ;;  %v588_v48 = vld [vmem:[%s7407_s1 + $0xbb0] sm:$0xff] }
 0x13e   : > { %3568 = vmatpush1.bf16.msra.mxu0 %v3567_v59  ;;  %v3843_v59 = vpack.c.bf16 %v516_v51, %v508_v49  ;;  %v603_v51 = vld [vmem:[%s7407_s1 + $0xc28] sm:$0xff] }
 0x13f   : > { %3824 = vmatpush1.bf16.msra.mxu1 %v3823_v60  ;;  %3570 = vmatprep.subr.bf16.mxu0 %v3569_v61  ;;  %v3589_v60 = vpack.c.bf16 %v531_v53, %v523_v52  ;;  %v522_v61 = vld [vmem:[%s7407_s1 + $0x9a0] sm:$0xff]  ;;  %v611_v52 = vld [vmem:[%s7407_s1 + $0xc68] sm:$0xff]  ;;  %v605_v53 = vld [vmem:[%s7407_s1 + $0xc38] sm:$0xff] }
 0x140   : > { %3826 = vmatprep.subr.bf16.mxu1 %v3825_v1  ;;  %v532_v1 = vld [vmem:[%s7407_s1 + $0x9f0] sm:$0xff] }
 0x142   : > { %3572 = vmatpush1.bf16.msra.mxu0 %v3571_v7  ;;  %v3591_v7 = vpack.c.bf16 %v530_v62, %v522_v61  ;;  %v612_v62 = vld [vmem:[%s7407_s1 + $0xc70] sm:$0xff] }
 0x143   : > { %3828 = vmatpush1.bf16.msra.mxu1 %v3827_v8  ;;  %3574 = vmatprep.subr.bf16.mxu0 %v3573_v9  ;;  %v3847_v8 = vpack.c.bf16 %v532_v1, %v524_v63  ;;  %v3593_v9 = vpack.c.bf16 %v547_v3, %v539_v2  ;;  %v619_v63 = vld [vmem:[%s7407_s1 + $0xca8] sm:$0xff]  ;;  %v621_v1 = vld [vmem:[%s7407_s1 + $0xcb8] sm:$0xff] }
 0x144   : > { %3830 = vmatprep.subr.bf16.mxu1 %v3829_v13  ;;  %v3849_v13 = vpack.c.bf16 %v549_v6, %v541_v5  ;;  %v629_v2 = vld [vmem:[%s7407_s1 + $0xcf8] sm:$0xff]  ;;  %v618_v6 = vld [vmem:[%s7407_s1 + $0xca0] sm:$0xff] }
 0x146   : > { %3576 = vmatpush1.bf16.msra.mxu0 %v3575_v19  ;;  %v3595_v19 = vpack.c.bf16 %v546_v11, %v538_v10  ;;  %v628_v10 = vld [vmem:[%s7407_s1 + $0xcf0] sm:$0xff]  ;;  %v635_v11 = vld [vmem:[%s7407_s1 + $0xd28] sm:$0xff] }
 0x147   : > { %3832 = vmatpush1.bf16.msra.mxu1 %v3831_v20  ;;  %3578 = vmatprep.subr.bf16.mxu0 %v3577_v21  ;;  %v3851_v20 = vpack.c.bf16 %v548_v14, %v540_v12  ;;  %v3597_v21 = vpack.c.bf16 %v563_v16, %v555_v15  ;;  %v643_v12 = vld [vmem:[%s7407_s1 + $0xd68] sm:$0xff]  ;;  %v645_v14 = vld [vmem:[%s7407_s1 + $0xd78] sm:$0xff] }
 0x148   : > { %3834 = vmatprep.subr.bf16.mxu1 %v3833_v25  ;;  %v3853_v25 = vpack.c.bf16 %v565_v18, %v557_v17  ;;  %v3617_v17 = vpack.c.bf16 %v643_v12, %v635_v11  ;;  %v634_v18 = vld [vmem:[%s7407_s1 + $0xd20] sm:$0xff] }
 0x149   : > { %1919 = vmatmul.mubr.f32.vlgmr.msra.gmra.mrb[4].mxu0 %v4099_v41 }
 0x14a   : > { %3580 = vmatpush1.bf16.msra.mxu0 %v3579_v31  ;;  %2227 = vmatmul.mubr.f32.vlgmr.msra.gmra.mrb[4].mxu1 %v4099_v41  ;;  %v3599_v31 = vpack.c.bf16 %v562_v23, %v554_v22  ;;  %v589_v41 = vld [vmem:[%s7407_s1 + $0xbb8] sm:$0xff]  ;;  %v644_v22 = vld [vmem:[%s7407_s1 + $0xd70] sm:$0xff]  ;;  %v651_v23 = vld [vmem:[%s7407_s1 + $0xda8] sm:$0xff] }
 0x14b   : > { %3836 = vmatpush1.bf16.msra.mxu1 %v3835_v32  ;;  %3582 = vmatprep.subr.bf16.mxu0 %v3581_v33  ;;  %v3855_v32 = vpack.c.bf16 %v564_v26, %v556_v24  ;;  %v3601_v33 = vpack.c.bf16 %v579_v28, %v571_v27  ;;  %v3861_v49 = vpack.c.bf16 %v597_v42, %v589_v41  ;;  %v659_v24 = vld [vmem:[%s7407_s1 + $0xde8] sm:$0xff]  ;;  %v661_v26 = vld [vmem:[%s7407_s1 + $0xdf8] sm:$0xff]  ;;  %v666_v42 = vld [vmem:[%s7407_s1 + $0xe20] sm:$0xff] }
 0x14c   : > { %3838 = vmatprep.subr.bf16.mxu1 %v3837_v37  ;;  %1924 = vmatprep.mubr.f32.mxu0 %v4100_v54  ;;  %v3857_v37 = vpack.c.bf16 %v581_v30, %v573_v29  ;;  %v3621_v29 = vpack.c.bf16 %v659_v24, %v651_v23  ;;  %v650_v30 = vld [vmem:[%s7407_s1 + $0xda0] sm:$0xff] }
 0x14d   : > { %2232 = vmatprep.mubr.f32.mxu1 %v4100_v54  ;;  %1925 = vmatmul.mubr.f32.gmra.mrb[6].mxu0 %v4101_v57  ;;  %v613_v54 = vld [vmem:[%s7407_s1 + $0xc78] sm:$0xff] }
 0x14e   : > { %3584 = vmatpush1.bf16.msra.mxu0 %v3583_v44  ;;  %2233 = vmatmul.mubr.f32.gmra.mrb[6].mxu1 %v4101_v57  ;;  %v3859_v44 = vpack.c.bf16 %v580_v38, %v572_v36  ;;  %v3609_v57 = vpack.c.bf16 %v611_v52, %v603_v51  ;;  %v3865_v61 = vpack.c.bf16 %v613_v54, %v605_v53  ;;  %v675_v36 = vld [vmem:[%s7407_s1 + $0xe68] sm:$0xff]  ;;  %v677_v38 = vld [vmem:[%s7407_s1 + $0xe78] sm:$0xff]  ;;  %v682_v54 = vld [vmem:[%s7407_s1 + $0xea0] sm:$0xff] }
 0x14f   : > { %3840 = vmatpush1.bf16.msra.mxu1 %v3839_v45  ;;  %3586 = vmatprep.subr.bf16.mxu0 %v3585_v46  ;;  %v3605_v45 = vpack.c.bf16 %v595_v40, %v587_v39  ;;  %v586_v46 = vld [vmem:[%s7407_s1 + $0xba0] sm:$0xff]  ;;  %v3625_v41 = vpack.c.bf16 %v675_v36, %v667_v35 }
 0x150   : > { %3842 = vmatprep.subr.bf16.mxu1 %v3841_v50  ;;  %1995 = vmatprep.mubr.f32.mxu0 %v4102_v4  ;;  %v596_v50 = vld [vmem:[%s7407_s1 + $0xbf0] sm:$0xff]  ;;  %v3607_v55 = vpack.c.bf16 %v594_v47, %v586_v46  ;;  %v683_v47 = vld [vmem:[%s7407_s1 + $0xea8] sm:$0xff] }
 0x151   : > { %2303 = vmatprep.mubr.f32.mxu1 %v4102_v4  ;;  %v3863_v56 = vpack.c.bf16 %v596_v50, %v588_v48  ;;  %v676_v46 = vld [vmem:[%s7407_s1 + $0xe70] sm:$0xff]  ;;  %v691_v48 = vld [vmem:[%s7407_s1 + $0xee8] sm:$0xff]  ;;  %v693_v50 = vld [vmem:[%s7407_s1 + $0xef8] sm:$0xff] }
 0x152   : > { %3588 = vmatpush1.bf16.msra.mxu0 %v3587_v58  ;;  %v602_v58 = vld [vmem:[%s7407_s1 + $0xc20] sm:$0xff]  ;;  %v3629_v53 = vpack.c.bf16 %v691_v48, %v683_v47  ;;  %v773_v47 = vld [vmem:[%s7407_s1 + $0x1178] sm:$0xff] }
 0x153   : > { %3844 = vmatpush1.bf16.msra.mxu1 %v3843_v59  ;;  %3590 = vmatprep.subr.bf16.mxu0 %v3589_v60  ;;  %v610_v59 = vld [vmem:[%s7407_s1 + $0xc60] sm:$0xff]  ;;  %v604_v60 = vld [vmem:[%s7407_s1 + $0xc30] sm:$0xff] }
 0x154   : > { %3846 = vmatprep.subr.bf16.mxu1 %v3845_v0  ;;  %v627_v0 = vld [vmem:[%s7407_s1 + $0xce8] sm:$0xff]  ;;  %v3611_v3 = vpack.c.bf16 %v610_v59, %v602_v58  ;;  %v3867_v4 = vpack.c.bf16 %v612_v62, %v604_v60  ;;  %v692_v58 = vld [vmem:[%s7407_s1 + $0xef0] sm:$0xff]  ;;  %v709_v62 = vld [vmem:[%s7407_s1 + $0xf78] sm:$0xff] }
 0x155   : > { %v3613_v5 = vpack.c.bf16 %v627_v0, %v619_v63  ;;  %v699_v59 = vld [vmem:[%s7407_s1 + $0xf28] sm:$0xff] }
 0x156   : > { %3592 = vmatpush1.bf16.msra.mxu0 %v3591_v7  ;;  %v626_v7 = vld [vmem:[%s7407_s1 + $0xce0] sm:$0xff]  ;;  %v707_v60 = vld [vmem:[%s7407_s1 + $0xf68] sm:$0xff] }
 0x157   : > { %3848 = vmatpush1.bf16.msra.mxu1 %v3847_v8  ;;  %3594 = vmatprep.subr.bf16.mxu0 %v3593_v9  ;;  %v620_v8 = vld [vmem:[%s7407_s1 + $0xcb0] sm:$0xff]  ;;  %v3869_v9 = vpack.c.bf16 %v629_v2, %v621_v1  ;;  %v3615_v15 = vpack.c.bf16 %v626_v7, %v618_v6  ;;  %v3633_v1 = vpack.c.bf16 %v707_v60, %v699_v59  ;;  %v698_v2 = vld [vmem:[%s7407_s1 + $0xf20] sm:$0xff]  ;;  %v715_v7 = vld [vmem:[%s7407_s1 + $0xfa8] sm:$0xff] }
 0x158   : > { %3850 = vmatprep.subr.bf16.mxu1 %v3849_v13  ;;  %v637_v13 = vld [vmem:[%s7407_s1 + $0xd38] sm:$0xff]  ;;  %v3871_v16 = vpack.c.bf16 %v628_v10, %v620_v8  ;;  %v708_v6 = vld [vmem:[%s7407_s1 + $0xf70] sm:$0xff]  ;;  %v723_v8 = vld [vmem:[%s7407_s1 + $0xfe8] sm:$0xff] }
 0x159   : > { %v725_v10 = vld [vmem:[%s7407_s1 + $0xff8] sm:$0xff] }
 0x15a   : > { %3596 = vmatpush1.bf16.msra.mxu0 %v3595_v19  ;;  %v642_v19 = vld [vmem:[%s7407_s1 + $0xd60] sm:$0xff]  ;;  %v781_v59 = vld [vmem:[%s7407_s1 + $0x11b8] sm:$0xff] }
 0x15b   : > { %3852 = vmatpush1.bf16.msra.mxu1 %v3851_v20  ;;  %3598 = vmatprep.subr.bf16.mxu0 %v3597_v21  ;;  %v636_v20 = vld [vmem:[%s7407_s1 + $0xd30] sm:$0xff]  ;;  %v3873_v21 = vpack.c.bf16 %v645_v14, %v637_v13  ;;  %v3619_v27 = vpack.c.bf16 %v642_v19, %v634_v18  ;;  %v3637_v13 = vpack.c.bf16 %v723_v8, %v715_v7  ;;  %v714_v14 = vld [vmem:[%s7407_s1 + $0xfa0] sm:$0xff]  ;;  %v731_v19 = vld [vmem:[%s7407_s1 + $0x1028] sm:$0xff] }
 0x15c   : > { %3854 = vmatprep.subr.bf16.mxu1 %v3853_v25  ;;  %v653_v25 = vld [vmem:[%s7407_s1 + $0xdb8] sm:$0xff]  ;;  %v3875_v28 = vpack.c.bf16 %v644_v22, %v636_v20  ;;  %v724_v18 = vld [vmem:[%s7407_s1 + $0xff0] sm:$0xff]  ;;  %v739_v20 = vld [vmem:[%s7407_s1 + $0x1068] sm:$0xff] }
 0x15d   : > { %v741_v22 = vld [vmem:[%s7407_s1 + $0x1078] sm:$0xff]  ;;  %v803_v7 = vld [vmem:[%s7407_s1 + $0x1268] sm:$0xff] }
 0x15e   : > { %3600 = vmatpush1.bf16.msra.mxu0 %v3599_v31  ;;  %v658_v31 = vld [vmem:[%s7407_s1 + $0xde0] sm:$0xff]  ;;  %v789_v60 = vld [vmem:[%s7407_s1 + $0x11f8] sm:$0xff]  ;;  %v4106_v8 = vld [vmem:[%s4448_s11 + $0x28] sm:$0xff] }
 0x15f   : > { %3856 = vmatpush1.bf16.msra.mxu1 %v3855_v32  ;;  %3602 = vmatprep.subr.bf16.mxu0 %v3601_v33  ;;  %v652_v32 = vld [vmem:[%s7407_s1 + $0xdb0] sm:$0xff]  ;;  %v3877_v33 = vpack.c.bf16 %v661_v26, %v653_v25  ;;  %v3623_v39 = vpack.c.bf16 %v658_v31, %v650_v30  ;;  %v3641_v25 = vpack.c.bf16 %v739_v20, %v731_v19  ;;  %v730_v26 = vld [vmem:[%s7407_s1 + $0x1020] sm:$0xff]  ;;  %v747_v31 = vld [vmem:[%s7407_s1 + $0x10a8] sm:$0xff] }
 0x160   : > { %3858 = vmatprep.subr.bf16.mxu1 %v3857_v37  ;;  %v669_v37 = vld [vmem:[%s7407_s1 + $0xe38] sm:$0xff]  ;;  %v3879_v40 = vpack.c.bf16 %v660_v34, %v652_v32  ;;  %v740_v30 = vld [vmem:[%s7407_s1 + $0x1070] sm:$0xff]  ;;  %v755_v32 = vld [vmem:[%s7407_s1 + $0x10e8] sm:$0xff] }
 0x161   : > { %v757_v34 = vld [vmem:[%s7407_s1 + $0x10f8] sm:$0xff]  ;;  %v811_v19 = vld [vmem:[%s7407_s1 + $0x12a8] sm:$0xff] }
 0x162   : > { %3604 = vmatpush1.bf16.msra.mxu0 %v3603_v43  ;;  %v674_v43 = vld [vmem:[%s7407_s1 + $0xe60] sm:$0xff]  ;;  %v819_v20 = vld [vmem:[%s7407_s1 + $0x12e8] sm:$0xff] }
 0x163   : > { %3860 = vmatpush1.bf16.msra.mxu1 %v3859_v44  ;;  %3606 = vmatprep.subr.bf16.mxu0 %v3605_v45  ;;  %v668_v44 = vld [vmem:[%s7407_s1 + $0xe30] sm:$0xff]  ;;  %v3881_v45 = vpack.c.bf16 %v677_v38, %v669_v37  ;;  %v3627_v51 = vpack.c.bf16 %v674_v43, %v666_v42  ;;  %v3645_v37 = vpack.c.bf16 %v755_v32, %v747_v31  ;;  %v746_v38 = vld [vmem:[%s7407_s1 + $0x10a0] sm:$0xff]  ;;  %v763_v43 = vld [vmem:[%s7407_s1 + $0x1128] sm:$0xff] }
 0x164   : > { %3862 = vmatprep.subr.bf16.mxu1 %v3861_v49  ;;  %v685_v49 = vld [vmem:[%s7407_s1 + $0xeb8] sm:$0xff]  ;;  %v3883_v52 = vpack.c.bf16 %v676_v46, %v668_v44  ;;  %v756_v42 = vld [vmem:[%s7407_s1 + $0x10f0] sm:$0xff]  ;;  %v771_v44 = vld [vmem:[%s7407_s1 + $0x1168] sm:$0xff] }
 0x165   : > { %v765_v46 = vld [vmem:[%s7407_s1 + $0x1138] sm:$0xff]  ;;  %v827_v31 = vld [vmem:[%s7407_s1 + $0x1328] sm:$0xff] }
 0x166   : > { %3608 = vmatpush1.bf16.msra.mxu0 %v3607_v55  ;;  %v690_v55 = vld [vmem:[%s7407_s1 + $0xee0] sm:$0xff]  ;;  %v835_v32 = vld [vmem:[%s7407_s1 + $0x1368] sm:$0xff] }
 0x167   : > { %3864 = vmatpush1.bf16.msra.mxu1 %v3863_v56  ;;  %3610 = vmatprep.subr.bf16.mxu0 %v3609_v57  ;;  %v684_v56 = vld [vmem:[%s7407_s1 + $0xeb0] sm:$0xff]  ;;  %v3885_v57 = vpack.c.bf16 %v693_v50, %v685_v49  ;;  %v3631_v63 = vpack.c.bf16 %v690_v55, %v682_v54  ;;  %v3649_v50 = vpack.c.bf16 %v771_v44, %v763_v43  ;;  %v843_v43 = vld [vmem:[%s7407_s1 + $0x13a8] sm:$0xff] }
 0x168   : > { %3866 = vmatprep.subr.bf16.mxu1 %v3865_v61  ;;  %v701_v61 = vld [vmem:[%s7407_s1 + $0xf38] sm:$0xff]  ;;  %v3887_v0 = vpack.c.bf16 %v692_v58, %v684_v56  ;;  %v3905_v54 = vpack.c.bf16 %v773_v47, %v765_v46  ;;  %v772_v55 = vld [vmem:[%s7407_s1 + $0x1170] sm:$0xff]  ;;  %v779_v56 = vld [vmem:[%s7407_s1 + $0x11a8] sm:$0xff] }
 0x169   : > { %v4104_v58 = vld [vmem:[%s4448_s11 + $0x58] sm:$0xff]  ;;  %v851_v44 = vld [vmem:[%s7407_s1 + $0x13e8] sm:$0xff] }
 0x16a   : > { %3612 = vmatpush1.bf16.msra.mxu0 %v3611_v3  ;;  %v706_v3 = vld [vmem:[%s7407_s1 + $0xf60] sm:$0xff]  ;;  %v853_v46 = vld [vmem:[%s7407_s1 + $0x13f8] sm:$0xff] }
 0x16b   : > { %3868 = vmatpush1.bf16.msra.mxu1 %v3867_v4  ;;  %3614 = vmatprep.subr.bf16.mxu0 %v3613_v5  ;;  %v700_v4 = vld [vmem:[%s7407_s1 + $0xf30] sm:$0xff]  ;;  %v3889_v5 = vpack.c.bf16 %v709_v62, %v701_v61  ;;  %v3635_v11 = vpack.c.bf16 %v706_v3, %v698_v2  ;;  %v786_v2 = vld [vmem:[%s7407_s1 + $0x11e0] sm:$0xff] }
 0x16c   : > { %3870 = vmatprep.subr.bf16.mxu1 %v3869_v9  ;;  %v717_v9 = vld [vmem:[%s7407_s1 + $0xfb8] sm:$0xff]  ;;  %v3891_v12 = vpack.c.bf16 %v708_v6, %v700_v4  ;;  %v4105_v61 = vld [vmem:[%s4448_s11 + $0x50] sm:$0xff]  ;;  %v3909_v4 = vpack.c.bf16 %v789_v60, %v781_v59  ;;  %v795_v6 = vld [vmem:[%s7407_s1 + $0x1228] sm:$0xff] }
 0x16d   : > { %v780_v3 = vld [vmem:[%s7407_s1 + $0x11b0] sm:$0xff] }
 0x16e   : > { %3616 = vmatpush1.bf16.msra.mxu0 %v3615_v15  ;;  %v722_v15 = vld [vmem:[%s7407_s1 + $0xfe0] sm:$0xff] }
 0x16f   : > { %3872 = vmatpush1.bf16.msra.mxu1 %v3871_v16  ;;  %3618 = vmatprep.subr.bf16.mxu0 %v3617_v17  ;;  %v716_v16 = vld [vmem:[%s7407_s1 + $0xfb0] sm:$0xff]  ;;  %v3893_v17 = vpack.c.bf16 %v725_v10, %v717_v9  ;;  %v3639_v23 = vpack.c.bf16 %v722_v15, %v714_v14  ;;  %v797_v9 = vld [vmem:[%s7407_s1 + $0x1238] sm:$0xff]  ;;  %v794_v14 = vld [vmem:[%s7407_s1 + $0x1220] sm:$0xff] }
 0x170   : > { %3874 = vmatprep.subr.bf16.mxu1 %v3873_v21  ;;  %v733_v21 = vld [vmem:[%s7407_s1 + $0x1038] sm:$0xff]  ;;  %v3895_v24 = vpack.c.bf16 %v724_v18, %v716_v16  ;;  %v802_v15 = vld [vmem:[%s7407_s1 + $0x1260] sm:$0xff]  ;;  %v796_v16 = vld [vmem:[%s7407_s1 + $0x1230] sm:$0xff] }
 0x171   : > { %v805_v10 = vld [vmem:[%s7407_s1 + $0x1278] sm:$0xff]  ;;  %v804_v18 = vld [vmem:[%s7407_s1 + $0x1270] sm:$0xff] }
 0x172   : > { %3620 = vmatpush1.bf16.msra.mxu0 %v3619_v27  ;;  %v738_v27 = vld [vmem:[%s7407_s1 + $0x1060] sm:$0xff] }
 0x173   : > { %3876 = vmatpush1.bf16.msra.mxu1 %v3875_v28  ;;  %3622 = vmatprep.subr.bf16.mxu0 %v3621_v29  ;;  %v732_v28 = vld [vmem:[%s7407_s1 + $0x1030] sm:$0xff]  ;;  %v3897_v29 = vpack.c.bf16 %v741_v22, %v733_v21  ;;  %v3643_v35 = vpack.c.bf16 %v738_v27, %v730_v26  ;;  %v813_v21 = vld [vmem:[%s7407_s1 + $0x12b8] sm:$0xff]  ;;  %v810_v26 = vld [vmem:[%s7407_s1 + $0x12a0] sm:$0xff] }
 0x174   : > { %3878 = vmatprep.subr.bf16.mxu1 %v3877_v33  ;;  %v749_v33 = vld [vmem:[%s7407_s1 + $0x10b8] sm:$0xff]  ;;  %v3899_v36 = vpack.c.bf16 %v740_v30, %v732_v28  ;;  %v818_v27 = vld [vmem:[%s7407_s1 + $0x12e0] sm:$0xff]  ;;  %v812_v28 = vld [vmem:[%s7407_s1 + $0x12b0] sm:$0xff] }
 0x175   : > { %v821_v22 = vld [vmem:[%s7407_s1 + $0x12f8] sm:$0xff]  ;;  %v820_v30 = vld [vmem:[%s7407_s1 + $0x12f0] sm:$0xff] }
 0x176   : > { %3624 = vmatpush1.bf16.msra.mxu0 %v3623_v39  ;;  %v754_v39 = vld [vmem:[%s7407_s1 + $0x10e0] sm:$0xff] }
 0x177   : > { %3880 = vmatpush1.bf16.msra.mxu1 %v3879_v40  ;;  %3626 = vmatprep.subr.bf16.mxu0 %v3625_v41  ;;  %v748_v40 = vld [vmem:[%s7407_s1 + $0x10b0] sm:$0xff]  ;;  %v3901_v41 = vpack.c.bf16 %v757_v34, %v749_v33  ;;  %v3647_v48 = vpack.c.bf16 %v754_v39, %v746_v38  ;;  %v829_v33 = vld [vmem:[%s7407_s1 + $0x1338] sm:$0xff]  ;;  %v826_v38 = vld [vmem:[%s7407_s1 + $0x1320] sm:$0xff] }
 0x178   : > { %3882 = vmatprep.subr.bf16.mxu1 %v3881_v45  ;;  %v4103_v45 = vld [vmem:[%s4448_s11 + $0x10] sm:$0xff]  ;;  %v3903_v49 = vpack.c.bf16 %v756_v42, %v748_v40  ;;  %v837_v34 = vld [vmem:[%s7407_s1 + $0x1378] sm:$0xff]  ;;  %v834_v39 = vld [vmem:[%s7407_s1 + $0x1360] sm:$0xff] }
 0x179   : > { %v828_v40 = vld [vmem:[%s7407_s1 + $0x1330] sm:$0xff]  ;;  %v3667_v47 = vpack.c.bf16 %v834_v39, %v826_v38  ;;  %v923_v39 = vld [vmem:[%s7407_s1 + $0x1628] sm:$0xff] }
 0x17a   : > { %3628 = vmatpush1.bf16.msra.mxu0 %v3627_v51  ;;  %v762_v51 = vld [vmem:[%s7407_s1 + $0x1120] sm:$0xff]  ;;  %v836_v42 = vld [vmem:[%s7407_s1 + $0x1370] sm:$0xff] }
 0x17b   : > { %3884 = vmatpush1.bf16.msra.mxu1 %v3883_v52  ;;  %3630 = vmatprep.subr.bf16.mxu0 %v3629_v53  ;;  %v770_v52 = vld [vmem:[%s7407_s1 + $0x1160] sm:$0xff]  ;;  %v764_v53 = vld [vmem:[%s7407_s1 + $0x1130] sm:$0xff] }
 0x17c   : > { %3886 = vmatprep.subr.bf16.mxu1 %v3885_v57  ;;  %v787_v57 = vld [vmem:[%s7407_s1 + $0x11e8] sm:$0xff]  ;;  %v3651_v62 = vpack.c.bf16 %v770_v52, %v762_v51  ;;  %v850_v51 = vld [vmem:[%s7407_s1 + $0x13e0] sm:$0xff]  ;;  %v844_v52 = vld [vmem:[%s7407_s1 + $0x13b0] sm:$0xff] }
 0x17d   : > { %v916_v38 = vld [vmem:[%s7407_s1 + $0x15f0] sm:$0xff] }
 0x17e   : > { %3632 = vmatpush1.bf16.msra.mxu0 %v3631_v63  ;;  %v3907_v63 = vpack.c.bf16 %v772_v55, %v764_v53  ;;  %v859_v55 = vld [vmem:[%s7407_s1 + $0x1428] sm:$0xff] }
 0x17f   : > { %3888 = vmatpush1.bf16.msra.mxu1 %v3887_v0  ;;  %3634 = vmatprep.subr.bf16.mxu0 %v3633_v1  ;;  %v3653_v0 = vpack.c.bf16 %v787_v57, %v779_v56  ;;  %v778_v1 = vld [vmem:[%s7407_s1 + $0x11a0] sm:$0xff]  ;;  %v867_v56 = vld [vmem:[%s7407_s1 + $0x1468] sm:$0xff]  ;;  %v861_v57 = vld [vmem:[%s7407_s1 + $0x1438] sm:$0xff] }
 0x180   : > { %3890 = vmatprep.subr.bf16.mxu1 %v3889_v5  ;;  %v788_v5 = vld [vmem:[%s7407_s1 + $0x11f0] sm:$0xff] }
 0x182   : > { %3636 = vmatpush1.bf16.msra.mxu0 %v3635_v11  ;;  %v3655_v11 = vpack.c.bf16 %v786_v2, %v778_v1  ;;  %v868_v2 = vld [vmem:[%s7407_s1 + $0x1470] sm:$0xff] }
 0x183   : > { %3892 = vmatpush1.bf16.msra.mxu1 %v3891_v12  ;;  %3638 = vmatprep.subr.bf16.mxu0 %v3637_v13  ;;  %v3911_v12 = vpack.c.bf16 %v788_v5, %v780_v3  ;;  %v3657_v13 = vpack.c.bf16 %v803_v7, %v795_v6  ;;  %v875_v3 = vld [vmem:[%s7407_s1 + $0x14a8] sm:$0xff]  ;;  %v877_v5 = vld [vmem:[%s7407_s1 + $0x14b8] sm:$0xff] }
 0x184   : > { %3894 = vmatprep.subr.bf16.mxu1 %v3893_v17  ;;  %v3913_v17 = vpack.c.bf16 %v805_v10, %v797_v9  ;;  %v885_v6 = vld [vmem:[%s7407_s1 + $0x14f8] sm:$0xff]  ;;  %v874_v10 = vld [vmem:[%s7407_s1 + $0x14a0] sm:$0xff] }
 0x186   : > { %3640 = vmatpush1.bf16.msra.mxu0 %v3639_v23  ;;  %v3659_v23 = vpack.c.bf16 %v802_v15, %v794_v14  ;;  %v884_v14 = vld [vmem:[%s7407_s1 + $0x14f0] sm:$0xff]  ;;  %v891_v15 = vld [vmem:[%s7407_s1 + $0x1528] sm:$0xff] }
 0x187   : > { %3896 = vmatpush1.bf16.msra.mxu1 %v3895_v24  ;;  %3642 = vmatprep.subr.bf16.mxu0 %v3641_v25  ;;  %v3915_v24 = vpack.c.bf16 %v804_v18, %v796_v16  ;;  %v3661_v25 = vpack.c.bf16 %v819_v20, %v811_v19  ;;  %v899_v16 = vld [vmem:[%s7407_s1 + $0x1568] sm:$0xff]  ;;  %v901_v18 = vld [vmem:[%s7407_s1 + $0x1578] sm:$0xff] }
 0x188   : > { %3898 = vmatprep.subr.bf16.mxu1 %v3897_v29  ;;  %v3917_v29 = vpack.c.bf16 %v821_v22, %v813_v21  ;;  %v3681_v21 = vpack.c.bf16 %v899_v16, %v891_v15  ;;  %v890_v22 = vld [vmem:[%s7407_s1 + $0x1520] sm:$0xff] }
 0x189   : > { %1996 = vmatmul.mubr.f32.vlgmr.msra.gmra.mrb[4].mxu0 %v4103_v45 }
 0x18a   : > { %3644 = vmatpush1.bf16.msra.mxu0 %v3643_v35  ;;  %2304 = vmatmul.mubr.f32.vlgmr.msra.gmra.mrb[4].mxu1 %v4103_v45  ;;  %v3663_v35 = vpack.c.bf16 %v818_v27, %v810_v26  ;;  %v845_v45 = vld [vmem:[%s7407_s1 + $0x13b8] sm:$0xff]  ;;  %v900_v26 = vld [vmem:[%s7407_s1 + $0x1570] sm:$0xff]  ;;  %v907_v27 = vld [vmem:[%s7407_s1 + $0x15a8] sm:$0xff] }
 0x18b   : > { %3900 = vmatpush1.bf16.msra.mxu1 %v3899_v36  ;;  %3646 = vmatprep.subr.bf16.mxu0 %v3645_v37  ;;  %v3919_v36 = vpack.c.bf16 %v820_v30, %v812_v28  ;;  %v3665_v37 = vpack.c.bf16 %v835_v32, %v827_v31  ;;  %v3925_v53 = vpack.c.bf16 %v853_v46, %v845_v45  ;;  %v915_v28 = vld [vmem:[%s7407_s1 + $0x15e8] sm:$0xff]  ;;  %v917_v30 = vld [vmem:[%s7407_s1 + $0x15f8] sm:$0xff]  ;;  %v922_v46 = vld [vmem:[%s7407_s1 + $0x1620] sm:$0xff] }
 0x18c   : > { %3902 = vmatprep.subr.bf16.mxu1 %v3901_v41  ;;  %2001 = vmatprep.mubr.f32.mxu0 %v4104_v58  ;;  %v3921_v41 = vpack.c.bf16 %v837_v34, %v829_v33  ;;  %v3685_v33 = vpack.c.bf16 %v915_v28, %v907_v27  ;;  %v906_v34 = vld [vmem:[%s7407_s1 + $0x15a0] sm:$0xff] }
 0x18d   : > { %2309 = vmatprep.mubr.f32.mxu1 %v4104_v58  ;;  %2002 = vmatmul.mubr.f32.gmra.mrb[6].mxu0 %v4105_v61  ;;  %v869_v58 = vld [vmem:[%s7407_s1 + $0x1478] sm:$0xff] }
 0x18e   : > { %3648 = vmatpush1.bf16.msra.mxu0 %v3647_v48  ;;  %2310 = vmatmul.mubr.f32.gmra.mrb[6].mxu1 %v4105_v61  ;;  %v3923_v48 = vpack.c.bf16 %v836_v42, %v828_v40  ;;  %v3673_v61 = vpack.c.bf16 %v867_v56, %v859_v55  ;;  %v3929_v1 = vpack.c.bf16 %v869_v58, %v861_v57  ;;  %v931_v40 = vld [vmem:[%s7407_s1 + $0x1668] sm:$0xff]  ;;  %v933_v42 = vld [vmem:[%s7407_s1 + $0x1678] sm:$0xff]  ;;  %v938_v58 = vld [vmem:[%s7407_s1 + $0x16a0] sm:$0xff] }
 0x18f   : > { %3904 = vmatpush1.bf16.msra.mxu1 %v3903_v49  ;;  %3650 = vmatprep.subr.bf16.mxu0 %v3649_v50  ;;  %v3669_v49 = vpack.c.bf16 %v851_v44, %v843_v43  ;;  %v842_v50 = vld [vmem:[%s7407_s1 + $0x13a0] sm:$0xff]  ;;  %v3689_v45 = vpack.c.bf16 %v931_v40, %v923_v39 }
 0x190   : > { %3906 = vmatprep.subr.bf16.mxu1 %v3905_v54  ;;  %2072 = vmatprep.mubr.f32.mxu0 %v4106_v8  ;;  %v852_v54 = vld [vmem:[%s7407_s1 + $0x13f0] sm:$0xff]  ;;  %v3671_v59 = vpack.c.bf16 %v850_v51, %v842_v50  ;;  %v939_v51 = vld [vmem:[%s7407_s1 + $0x16a8] sm:$0xff] }
 0x191   : > { %2380 = vmatprep.mubr.f32.mxu1 %v4106_v8  ;;  %v3927_v60 = vpack.c.bf16 %v852_v54, %v844_v52  ;;  %v932_v50 = vld [vmem:[%s7407_s1 + $0x1670] sm:$0xff]  ;;  %v947_v52 = vld [vmem:[%s7407_s1 + $0x16e8] sm:$0xff]  ;;  %v949_v54 = vld [vmem:[%s7407_s1 + $0x16f8] sm:$0xff] }
 0x192   : > { %3652 = vmatpush1.bf16.msra.mxu0 %v3651_v62  ;;  %v858_v62 = vld [vmem:[%s7407_s1 + $0x1420] sm:$0xff]  ;;  %v3693_v57 = vpack.c.bf16 %v947_v52, %v939_v51  ;;  %v1029_v51 = vld [vmem:[%s7407_s1 + $0x1978] sm:$0xff] }
 0x193   : > { %3908 = vmatpush1.bf16.msra.mxu1 %v3907_v63  ;;  %3654 = vmatprep.subr.bf16.mxu0 %v3653_v0  ;;  %v866_v63 = vld [vmem:[%s7407_s1 + $0x1460] sm:$0xff]  ;;  %v860_v0 = vld [vmem:[%s7407_s1 + $0x1430] sm:$0xff] }
 0x194   : > { %3910 = vmatprep.subr.bf16.mxu1 %v3909_v4  ;;  %v883_v4 = vld [vmem:[%s7407_s1 + $0x14e8] sm:$0xff]  ;;  %v3675_v7 = vpack.c.bf16 %v866_v63, %v858_v62  ;;  %v3931_v8 = vpack.c.bf16 %v868_v2, %v860_v0  ;;  %v948_v62 = vld [vmem:[%s7407_s1 + $0x16f0] sm:$0xff]  ;;  %v965_v2 = vld [vmem:[%s7407_s1 + $0x1778] sm:$0xff] }
 0x195   : > { %v3677_v9 = vpack.c.bf16 %v883_v4, %v875_v3  ;;  %v955_v63 = vld [vmem:[%s7407_s1 + $0x1728] sm:$0xff] }
 0x196   : > { %3656 = vmatpush1.bf16.msra.mxu0 %v3655_v11  ;;  %v882_v11 = vld [vmem:[%s7407_s1 + $0x14e0] sm:$0xff]  ;;  %v963_v0 = vld [vmem:[%s7407_s1 + $0x1768] sm:$0xff] }
 0x197   : > { %3912 = vmatpush1.bf16.msra.mxu1 %v3911_v12  ;;  %3658 = vmatprep.subr.bf16.mxu0 %v3657_v13  ;;  %v876_v12 = vld [vmem:[%s7407_s1 + $0x14b0] sm:$0xff]  ;;  %v3933_v13 = vpack.c.bf16 %v885_v6, %v877_v5  ;;  %v3679_v19 = vpack.c.bf16 %v882_v11, %v874_v10  ;;  %v3697_v5 = vpack.c.bf16 %v963_v0, %v955_v63  ;;  %v954_v6 = vld [vmem:[%s7407_s1 + $0x1720] sm:$0xff]  ;;  %v971_v11 = vld [vmem:[%s7407_s1 + $0x17a8] sm:$0xff] }
 0x198   : > { %3914 = vmatprep.subr.bf16.mxu1 %v3913_v17  ;;  %v893_v17 = vld [vmem:[%s7407_s1 + $0x1538] sm:$0xff]  ;;  %v3935_v20 = vpack.c.bf16 %v884_v14, %v876_v12  ;;  %v964_v10 = vld [vmem:[%s7407_s1 + $0x1770] sm:$0xff]  ;;  %v979_v12 = vld [vmem:[%s7407_s1 + $0x17e8] sm:$0xff] }
 0x199   : > { %v981_v14 = vld [vmem:[%s7407_s1 + $0x17f8] sm:$0xff] }
 0x19a   : > { %3660 = vmatpush1.bf16.msra.mxu0 %v3659_v23  ;;  %v898_v23 = vld [vmem:[%s7407_s1 + $0x1560] sm:$0xff]  ;;  %v1037_v63 = vld [vmem:[%s7407_s1 + $0x19b8] sm:$0xff] }
 0x19b   : > { %3916 = vmatpush1.bf16.msra.mxu1 %v3915_v24  ;;  %3662 = vmatprep.subr.bf16.mxu0 %v3661_v25  ;;  %v892_v24 = vld [vmem:[%s7407_s1 + $0x1530] sm:$0xff]  ;;  %v3937_v25 = vpack.c.bf16 %v901_v18, %v893_v17  ;;  %v3683_v31 = vpack.c.bf16 %v898_v23, %v890_v22  ;;  %v3701_v17 = vpack.c.bf16 %v979_v12, %v971_v11  ;;  %v970_v18 = vld [vmem:[%s7407_s1 + $0x17a0] sm:$0xff]  ;;  %v987_v23 = vld [vmem:[%s7407_s1 + $0x1828] sm:$0xff] }
 0x19c   : > { %3918 = vmatprep.subr.bf16.mxu1 %v3917_v29  ;;  %v909_v29 = vld [vmem:[%s7407_s1 + $0x15b8] sm:$0xff]  ;;  %v3939_v32 = vpack.c.bf16 %v900_v26, %v892_v24  ;;  %v980_v22 = vld [vmem:[%s7407_s1 + $0x17f0] sm:$0xff]  ;;  %v995_v24 = vld [vmem:[%s7407_s1 + $0x1868] sm:$0xff] }
 0x19d   : > { %v997_v26 = vld [vmem:[%s7407_s1 + $0x1878] sm:$0xff]  ;;  %v1059_v11 = vld [vmem:[%s7407_s1 + $0x1a68] sm:$0xff] }
 0x19e   : > { %3664 = vmatpush1.bf16.msra.mxu0 %v3663_v35  ;;  %v914_v35 = vld [vmem:[%s7407_s1 + $0x15e0] sm:$0xff]  ;;  %v1045_v0 = vld [vmem:[%s7407_s1 + $0x19f8] sm:$0xff] }
 0x19f   : > { %3920 = vmatpush1.bf16.msra.mxu1 %v3919_v36  ;;  %3666 = vmatprep.subr.bf16.mxu0 %v3665_v37  ;;  %v908_v36 = vld [vmem:[%s7407_s1 + $0x15b0] sm:$0xff]  ;;  %v3941_v37 = vpack.c.bf16 %v917_v30, %v909_v29  ;;  %v3687_v43 = vpack.c.bf16 %v914_v35, %v906_v34  ;;  %v3705_v29 = vpack.c.bf16 %v995_v24, %v987_v23  ;;  %v986_v30 = vld [vmem:[%s7407_s1 + $0x1820] sm:$0xff]  ;;  %v1003_v35 = vld [vmem:[%s7407_s1 + $0x18a8] sm:$0xff] }
 0x1a0   : > { %3922 = vmatprep.subr.bf16.mxu1 %v3921_v41  ;;  %v925_v41 = vld [vmem:[%s7407_s1 + $0x1638] sm:$0xff]  ;;  %v3943_v44 = vpack.c.bf16 %v916_v38, %v908_v36  ;;  %v996_v34 = vld [vmem:[%s7407_s1 + $0x1870] sm:$0xff]  ;;  %v1011_v36 = vld [vmem:[%s7407_s1 + $0x18e8] sm:$0xff] }
 0x1a1   : > { %v1013_v38 = vld [vmem:[%s7407_s1 + $0x18f8] sm:$0xff]  ;;  %v1067_v23 = vld [vmem:[%s7407_s1 + $0x1aa8] sm:$0xff] }
 0x1a2   : > { %3668 = vmatpush1.bf16.msra.mxu0 %v3667_v47  ;;  %v930_v47 = vld [vmem:[%s7407_s1 + $0x1660] sm:$0xff]  ;;  %v4110_v12 = vld [vmem:[%s4448_s11 + $0x38] sm:$0xff]  ;;  %v1075_v24 = vld [vmem:[%s7407_s1 + $0x1ae8] sm:$0xff] }
 0x1a3   : > { %3924 = vmatpush1.bf16.msra.mxu1 %v3923_v48  ;;  %3670 = vmatprep.subr.bf16.mxu0 %v3669_v49  ;;  %v924_v48 = vld [vmem:[%s7407_s1 + $0x1630] sm:$0xff]  ;;  %v3945_v49 = vpack.c.bf16 %v933_v42, %v925_v41  ;;  %v3691_v55 = vpack.c.bf16 %v930_v47, %v922_v46  ;;  %v3709_v41 = vpack.c.bf16 %v1011_v36, %v1003_v35  ;;  %v1002_v42 = vld [vmem:[%s7407_s1 + $0x18a0] sm:$0xff]  ;;  %v1019_v47 = vld [vmem:[%s7407_s1 + $0x1928] sm:$0xff] }
 0x1a4   : > { %3926 = vmatprep.subr.bf16.mxu1 %v3925_v53  ;;  %v941_v53 = vld [vmem:[%s7407_s1 + $0x16b8] sm:$0xff]  ;;  %v3947_v56 = vpack.c.bf16 %v932_v50, %v924_v48  ;;  %v1012_v46 = vld [vmem:[%s7407_s1 + $0x18f0] sm:$0xff]  ;;  %v1027_v48 = vld [vmem:[%s7407_s1 + $0x1968] sm:$0xff] }
 0x1a5   : > { %v1021_v50 = vld [vmem:[%s7407_s1 + $0x1938] sm:$0xff]  ;;  %v1083_v35 = vld [vmem:[%s7407_s1 + $0x1b28] sm:$0xff] }
 0x1a6   : > { %3672 = vmatpush1.bf16.msra.mxu0 %v3671_v59  ;;  %v946_v59 = vld [vmem:[%s7407_s1 + $0x16e0] sm:$0xff]  ;;  %v1091_v36 = vld [vmem:[%s7407_s1 + $0x1b68] sm:$0xff] }
 0x1a7   : > { %3928 = vmatpush1.bf16.msra.mxu1 %v3927_v60  ;;  %3674 = vmatprep.subr.bf16.mxu0 %v3673_v61  ;;  %v940_v60 = vld [vmem:[%s7407_s1 + $0x16b0] sm:$0xff]  ;;  %v3949_v61 = vpack.c.bf16 %v949_v54, %v941_v53  ;;  %v3695_v3 = vpack.c.bf16 %v946_v59, %v938_v58  ;;  %v3713_v54 = vpack.c.bf16 %v1027_v48, %v1019_v47  ;;  %v1099_v48 = vld [vmem:[%s7407_s1 + $0x1ba8] sm:$0xff] }
 0x1a8   : > { %3930 = vmatprep.subr.bf16.mxu1 %v3929_v1  ;;  %v957_v1 = vld [vmem:[%s7407_s1 + $0x1738] sm:$0xff]  ;;  %v3951_v4 = vpack.c.bf16 %v948_v62, %v940_v60  ;;  %v3969_v58 = vpack.c.bf16 %v1029_v51, %v1021_v50  ;;  %v1028_v59 = vld [vmem:[%s7407_s1 + $0x1970] sm:$0xff]  ;;  %v1035_v60 = vld [vmem:[%s7407_s1 + $0x19a8] sm:$0xff] }
 0x1a9   : > { %v4108_v62 = vld [vmem:[%s4448_s11 + $0x68] sm:$0xff]  ;;  %v1092_v47 = vld [vmem:[%s7407_s1 + $0x1b70] sm:$0xff] }
 0x1aa   : > { %3676 = vmatpush1.bf16.msra.mxu0 %v3675_v7  ;;  %v962_v7 = vld [vmem:[%s7407_s1 + $0x1760] sm:$0xff] }
 0x1ab   : > { %3932 = vmatpush1.bf16.msra.mxu1 %v3931_v8  ;;  %3678 = vmatprep.subr.bf16.mxu0 %v3677_v9  ;;  %v956_v8 = vld [vmem:[%s7407_s1 + $0x1730] sm:$0xff]  ;;  %v3953_v9 = vpack.c.bf16 %v965_v2, %v957_v1  ;;  %v3699_v15 = vpack.c.bf16 %v962_v7, %v954_v6  ;;  %v4109_v1 = vld [vmem:[%s4448_s11 + $0x60] sm:$0xff] }
 0x1ac   : > { %3934 = vmatprep.subr.bf16.mxu1 %v3933_v13  ;;  %v973_v13 = vld [vmem:[%s7407_s1 + $0x17b8] sm:$0xff]  ;;  %v3955_v16 = vpack.c.bf16 %v964_v10, %v956_v8  ;;  %v1042_v6 = vld [vmem:[%s7407_s1 + $0x19e0] sm:$0xff]  ;;  %v1036_v7 = vld [vmem:[%s7407_s1 + $0x19b0] sm:$0xff]  ;;  %v3973_v8 = vpack.c.bf16 %v1045_v0, %v1037_v63 }
 0x1ad   : > { %v1051_v10 = vld [vmem:[%s7407_s1 + $0x1a28] sm:$0xff]  ;;  %v1108_v63 = vld [vmem:[%s7407_s1 + $0x1bf0] sm:$0xff] }
 0x1ae   : > { %3680 = vmatpush1.bf16.msra.mxu0 %v3679_v19  ;;  %v978_v19 = vld [vmem:[%s7407_s1 + $0x17e0] sm:$0xff]  ;;  %v1115_v0 = vld [vmem:[%s7407_s1 + $0x1c28] sm:$0xff] }
 0x1af   : > { %3936 = vmatpush1.bf16.msra.mxu1 %v3935_v20  ;;  %3682 = vmatprep.subr.bf16.mxu0 %v3681_v21  ;;  %v972_v20 = vld [vmem:[%s7407_s1 + $0x17b0] sm:$0xff]  ;;  %v3957_v21 = vpack.c.bf16 %v981_v14, %v973_v13  ;;  %v3703_v27 = vpack.c.bf16 %v978_v19, %v970_v18  ;;  %v1053_v13 = vld [vmem:[%s7407_s1 + $0x1a38] sm:$0xff]  ;;  %v1050_v18 = vld [vmem:[%s7407_s1 + $0x1a20] sm:$0xff] }
 0x1b0   : > { %3938 = vmatprep.subr.bf16.mxu1 %v3937_v25  ;;  %v989_v25 = vld [vmem:[%s7407_s1 + $0x1838] sm:$0xff]  ;;  %v3959_v28 = vpack.c.bf16 %v980_v22, %v972_v20  ;;  %v1058_v19 = vld [vmem:[%s7407_s1 + $0x1a60] sm:$0xff]  ;;  %v1052_v20 = vld [vmem:[%s7407_s1 + $0x1a30] sm:$0xff] }
 0x1b1   : > { %v1061_v14 = vld [vmem:[%s7407_s1 + $0x1a78] sm:$0xff]  ;;  %v1060_v22 = vld [vmem:[%s7407_s1 + $0x1a70] sm:$0xff] }
 0x1b2   : > { %3684 = vmatpush1.bf16.msra.mxu0 %v3683_v31  ;;  %v994_v31 = vld [vmem:[%s7407_s1 + $0x1860] sm:$0xff] }
 0x1b3   : > { %3940 = vmatpush1.bf16.msra.mxu1 %v3939_v32  ;;  %3686 = vmatprep.subr.bf16.mxu0 %v3685_v33  ;;  %v988_v32 = vld [vmem:[%s7407_s1 + $0x1830] sm:$0xff]  ;;  %v3961_v33 = vpack.c.bf16 %v997_v26, %v989_v25  ;;  %v3707_v39 = vpack.c.bf16 %v994_v31, %v986_v30  ;;  %v1069_v25 = vld [vmem:[%s7407_s1 + $0x1ab8] sm:$0xff]  ;;  %v1066_v30 = vld [vmem:[%s7407_s1 + $0x1aa0] sm:$0xff] }
 0x1b4   : > { %3942 = vmatprep.subr.bf16.mxu1 %v3941_v37  ;;  %v1005_v37 = vld [vmem:[%s7407_s1 + $0x18b8] sm:$0xff]  ;;  %v3963_v40 = vpack.c.bf16 %v996_v34, %v988_v32  ;;  %v1074_v31 = vld [vmem:[%s7407_s1 + $0x1ae0] sm:$0xff]  ;;  %v1068_v32 = vld [vmem:[%s7407_s1 + $0x1ab0] sm:$0xff] }
 0x1b5   : > { %v1077_v26 = vld [vmem:[%s7407_s1 + $0x1af8] sm:$0xff]  ;;  %v1076_v34 = vld [vmem:[%s7407_s1 + $0x1af0] sm:$0xff] }
 0x1b6   : > { %3688 = vmatpush1.bf16.msra.mxu0 %v3687_v43  ;;  %v1010_v43 = vld [vmem:[%s7407_s1 + $0x18e0] sm:$0xff] }
 0x1b7   : > { %3944 = vmatpush1.bf16.msra.mxu1 %v3943_v44  ;;  %3690 = vmatprep.subr.bf16.mxu0 %v3689_v45  ;;  %v1004_v44 = vld [vmem:[%s7407_s1 + $0x18b0] sm:$0xff]  ;;  %v3965_v45 = vpack.c.bf16 %v1013_v38, %v1005_v37  ;;  %v3711_v52 = vpack.c.bf16 %v1010_v43, %v1002_v42  ;;  %v1085_v37 = vld [vmem:[%s7407_s1 + $0x1b38] sm:$0xff]  ;;  %v1082_v42 = vld [vmem:[%s7407_s1 + $0x1b20] sm:$0xff] }
 0x1b8   : > { %3946 = vmatprep.subr.bf16.mxu1 %v3945_v49  ;;  %v4107_v49 = vld [vmem:[%s4448_s11 + $0x20] sm:$0xff]  ;;  %v3967_v53 = vpack.c.bf16 %v1012_v46, %v1004_v44  ;;  %v1093_v38 = vld [vmem:[%s7407_s1 + $0x1b78] sm:$0xff]  ;;  %v1084_v44 = vld [vmem:[%s7407_s1 + $0x1b30] sm:$0xff] }
 0x1b9   : > { %v1090_v43 = vld [vmem:[%s7407_s1 + $0x1b60] sm:$0xff]  ;;  %v3985_v46 = vpack.c.bf16 %v1093_v38, %v1085_v37 }
 0x1ba   : > { %3692 = vmatpush1.bf16.msra.mxu0 %v3691_v55  ;;  %v1018_v55 = vld [vmem:[%s7407_s1 + $0x1920] sm:$0xff] }
 0x1bb   : > { %3948 = vmatpush1.bf16.msra.mxu1 %v3947_v56  ;;  %3694 = vmatprep.subr.bf16.mxu0 %v3693_v57  ;;  %v1026_v56 = vld [vmem:[%s7407_s1 + $0x1960] sm:$0xff]  ;;  %v1020_v57 = vld [vmem:[%s7407_s1 + $0x1930] sm:$0xff] }
 0x1bc   : > { %3950 = vmatprep.subr.bf16.mxu1 %v3949_v61  ;;  %v1043_v61 = vld [vmem:[%s7407_s1 + $0x19e8] sm:$0xff]  ;;  %v3715_v2 = vpack.c.bf16 %v1026_v56, %v1018_v55  ;;  %v3731_v55 = vpack.c.bf16 %v1090_v43, %v1082_v42  ;;  %v3987_v56 = vpack.c.bf16 %v1092_v47, %v1084_v44  ;;  %v1146_v38 = vld [vmem:[%s7407_s1 + $0x1d20] sm:$0xff]  ;;  %v1156_v42 = vld [vmem:[%s7407_s1 + $0x1d70] sm:$0xff] }
 0x1bd   : > { %v1163_v43 = vld [vmem:[%s7407_s1 + $0x1da8] sm:$0xff]  ;;  %v1173_v47 = vld [vmem:[%s7407_s1 + $0x1df8] sm:$0xff] }
 0x1be   : > { %3696 = vmatpush1.bf16.msra.mxu0 %v3695_v3  ;;  %v3971_v3 = vpack.c.bf16 %v1028_v59, %v1020_v57  ;;  %v1106_v59 = vld [vmem:[%s7407_s1 + $0x1be0] sm:$0xff]  ;;  %v1171_v44 = vld [vmem:[%s7407_s1 + $0x1de8] sm:$0xff] }
 0x1bf   : > { %3952 = vmatpush1.bf16.msra.mxu1 %v3951_v4  ;;  %3698 = vmatprep.subr.bf16.mxu0 %v3697_v5  ;;  %v3717_v4 = vpack.c.bf16 %v1043_v61, %v1035_v60  ;;  %v1034_v5 = vld [vmem:[%s7407_s1 + $0x19a0] sm:$0xff]  ;;  %v1100_v60 = vld [vmem:[%s7407_s1 + $0x1bb0] sm:$0xff] }
 0x1c0   : > { %3954 = vmatprep.subr.bf16.mxu1 %v3953_v9  ;;  %v1044_v9 = vld [vmem:[%s7407_s1 + $0x19f0] sm:$0xff] }
 0x1c2   : > { %3700 = vmatpush1.bf16.msra.mxu0 %v3699_v15  ;;  %v3719_v15 = vpack.c.bf16 %v1042_v6, %v1034_v5  ;;  %v1117_v5 = vld [vmem:[%s7407_s1 + $0x1c38] sm:$0xff] }
 0x1c3   : > { %3956 = vmatpush1.bf16.msra.mxu1 %v3955_v16  ;;  %3702 = vmatprep.subr.bf16.mxu0 %v3701_v17  ;;  %v3975_v16 = vpack.c.bf16 %v1044_v9, %v1036_v7  ;;  %v3721_v17 = vpack.c.bf16 %v1059_v11, %v1051_v10  ;;  %v1125_v6 = vld [vmem:[%s7407_s1 + $0x1c78] sm:$0xff] }
 0x1c4   : > { %3958 = vmatprep.subr.bf16.mxu1 %v3957_v21  ;;  %v3977_v21 = vpack.c.bf16 %v1061_v14, %v1053_v13  ;;  %v1114_v14 = vld [vmem:[%s7407_s1 + $0x1c20] sm:$0xff] }
 0x1c6   : > { %3704 = vmatpush1.bf16.msra.mxu0 %v3703_v27  ;;  %v3723_v27 = vpack.c.bf16 %v1058_v19, %v1050_v18  ;;  %v1124_v18 = vld [vmem:[%s7407_s1 + $0x1c70] sm:$0xff]  ;;  %v1131_v19 = vld [vmem:[%s7407_s1 + $0x1ca8] sm:$0xff] }
 0x1c7   : > { %3960 = vmatpush1.bf16.msra.mxu1 %v3959_v28  ;;  %3706 = vmatprep.subr.bf16.mxu0 %v3705_v29  ;;  %v3979_v28 = vpack.c.bf16 %v1060_v22, %v1052_v20  ;;  %v3725_v29 = vpack.c.bf16 %v1075_v24, %v1067_v23  ;;  %v1139_v20 = vld [vmem:[%s7407_s1 + $0x1ce8] sm:$0xff]  ;;  %v1141_v22 = vld [vmem:[%s7407_s1 + $0x1cf8] sm:$0xff] }
 0x1c8   : > { %3962 = vmatprep.subr.bf16.mxu1 %v3961_v33  ;;  %v3981_v33 = vpack.c.bf16 %v1077_v26, %v1069_v25  ;;  %v3741_v25 = vpack.c.bf16 %v1139_v20, %v1131_v19  ;;  %v1130_v26 = vld [vmem:[%s7407_s1 + $0x1ca0] sm:$0xff] }
 0x1c9   : > { %2073 = vmatmul.mubr.f32.vlgmr.msra.gmra.mrb[4].mxu0 %v4107_v49 }
 0x1ca   : > { %3708 = vmatpush1.bf16.msra.mxu0 %v3707_v39  ;;  %2381 = vmatmul.mubr.f32.vlgmr.msra.gmra.mrb[4].mxu1 %v4107_v49  ;;  %v3727_v39 = vpack.c.bf16 %v1074_v31, %v1066_v30  ;;  %v1107_v49 = vld [vmem:[%s7407_s1 + $0x1be8] sm:$0xff]  ;;  %v1140_v30 = vld [vmem:[%s7407_s1 + $0x1cf0] sm:$0xff] }
 0x1cb   : > { %3964 = vmatpush1.bf16.msra.mxu1 %v3963_v40  ;;  %3710 = vmatprep.subr.bf16.mxu0 %v3709_v41  ;;  %v3983_v40 = vpack.c.bf16 %v1076_v34, %v1068_v32  ;;  %v3729_v41 = vpack.c.bf16 %v1091_v36, %v1083_v35  ;;  %v3733_v57 = vpack.c.bf16 %v1107_v49, %v1099_v48  ;;  %v1147_v31 = vld [vmem:[%s7407_s1 + $0x1d28] sm:$0xff]  ;;  %v1157_v34 = vld [vmem:[%s7407_s1 + $0x1d78] sm:$0xff] }
 0x1cc   : > { %3966 = vmatprep.subr.bf16.mxu1 %v3965_v45  ;;  %2078 = vmatprep.mubr.f32.mxu0 %v4108_v62  ;;  %v1155_v32 = vld [vmem:[%s7407_s1 + $0x1d68] sm:$0xff] }
 0x1cd   : > { %2386 = vmatprep.mubr.f32.mxu1 %v4108_v62  ;;  %2079 = vmatmul.mubr.f32.gmra.mrb[6].mxu0 %v4109_v1  ;;  %v3745_v37 = vpack.c.bf16 %v1155_v32, %v1147_v31 }
 0x1ce   : > { %3712 = vmatpush1.bf16.msra.mxu0 %v3711_v52  ;;  %2387 = vmatmul.mubr.f32.gmra.mrb[6].mxu1 %v4109_v1  ;;  %v1101_v52 = vld [vmem:[%s7407_s1 + $0x1bb8] sm:$0xff]  ;;  %v1123_v1 = vld [vmem:[%s7407_s1 + $0x1c68] sm:$0xff] }
 0x1cf   : > { %3968 = vmatpush1.bf16.msra.mxu1 %v3967_v53  ;;  %3714 = vmatprep.subr.bf16.mxu0 %v3713_v54  ;;  %v1109_v53 = vld [vmem:[%s7407_s1 + $0x1bf8] sm:$0xff]  ;;  %v3737_v13 = vpack.c.bf16 %v1123_v1, %v1115_v0 }
 0x1d0   : > { %3970 = vmatprep.subr.bf16.mxu1 %v3969_v58  ;;  %2149 = vmatprep.mubr.f32.mxu0 %v4110_v12  ;;  %v1098_v58 = vld [vmem:[%s7407_s1 + $0x1ba0] sm:$0xff]  ;;  %v3989_v62 = vpack.c.bf16 %v1109_v53, %v1101_v52  ;;  %v3749_v52 = vpack.c.bf16 %v1171_v44, %v1163_v43 }
 0x1d1   : > { %2457 = vmatprep.mubr.f32.mxu1 %v4110_v12  ;;  %v3735_v10 = vpack.c.bf16 %v1106_v59, %v1098_v58  ;;  %v3991_v12 = vpack.c.bf16 %v1108_v63, %v1100_v60  ;;  %v1162_v53 = vld [vmem:[%s7407_s1 + $0x1da0] sm:$0xff]  ;;  %v1172_v58 = vld [vmem:[%s7407_s1 + $0x1df0] sm:$0xff]  ;;  %v1179_v59 = vld [vmem:[%s7407_s1 + $0x1e28] sm:$0xff] }
 0x1d2   : > { %3716 = vmatpush1.bf16.msra.mxu0 %v3715_v2  ;;  %v1187_v60 = vld [vmem:[%s7407_s1 + $0x1e68] sm:$0xff]  ;;  %v1189_v63 = vld [vmem:[%s7407_s1 + $0x1e78] sm:$0xff] }
 0x1d3   : > { %3972 = vmatpush1.bf16.msra.mxu1 %v3971_v3  ;;  %3718 = vmatprep.subr.bf16.mxu0 %v3717_v4 }
 0x1d4   : > { %3974 = vmatprep.subr.bf16.mxu1 %v3973_v8 }
 0x1d6   : > { %3720 = vmatpush1.bf16.msra.mxu0 %v3719_v15  ;;  %v1122_v15 = vld [vmem:[%s7407_s1 + $0x1c60] sm:$0xff] }
 0x1d7   : > { %3976 = vmatpush1.bf16.msra.mxu1 %v3975_v16  ;;  %3722 = vmatprep.subr.bf16.mxu0 %v3721_v17  ;;  %v1116_v16 = vld [vmem:[%s7407_s1 + $0x1c30] sm:$0xff]  ;;  %v3993_v17 = vpack.c.bf16 %v1125_v6, %v1117_v5  ;;  %v3739_v23 = vpack.c.bf16 %v1122_v15, %v1114_v14  ;;  %v3753_v5 = vpack.c.bf16 %v1187_v60, %v1179_v59  ;;  %v1178_v6 = vld [vmem:[%s7407_s1 + $0x1e20] sm:$0xff]  ;;  %v1195_v15 = vld [vmem:[%s7407_s1 + $0x1ea8] sm:$0xff] }
 0x1d8   : > { %3978 = vmatprep.subr.bf16.mxu1 %v3977_v21  ;;  %v1133_v21 = vld [vmem:[%s7407_s1 + $0x1cb8] sm:$0xff]  ;;  %v3995_v24 = vpack.c.bf16 %v1124_v18, %v1116_v16  ;;  %v1188_v14 = vld [vmem:[%s7407_s1 + $0x1e70] sm:$0xff]  ;;  %v1203_v16 = vld [vmem:[%s7407_s1 + $0x1ee8] sm:$0xff] }
 0x1d9   : > { %v1205_v18 = vld [vmem:[%s7407_s1 + $0x1ef8] sm:$0xff] }
 0x1da   : > { %3724 = vmatpush1.bf16.msra.mxu0 %v3723_v27  ;;  %v1138_v27 = vld [vmem:[%s7407_s1 + $0x1ce0] sm:$0xff] }
 0x1db   : > { %3980 = vmatpush1.bf16.msra.mxu1 %v3979_v28  ;;  %3726 = vmatprep.subr.bf16.mxu0 %v3725_v29  ;;  %v1132_v28 = vld [vmem:[%s7407_s1 + $0x1cb0] sm:$0xff]  ;;  %v3997_v29 = vpack.c.bf16 %v1141_v22, %v1133_v21  ;;  %v3743_v35 = vpack.c.bf16 %v1138_v27, %v1130_v26  ;;  %v3757_v21 = vpack.c.bf16 %v1203_v16, %v1195_v15  ;;  %v1194_v22 = vld [vmem:[%s7407_s1 + $0x1ea0] sm:$0xff]  ;;  %v1211_v27 = vld [vmem:[%s7407_s1 + $0x1f28] sm:$0xff] }
 0x1dc   : > { %v7056_v45 = vpop.f32.mrb[0].mxu0  ;;  %3982 = vmatprep.subr.bf16.mxu1 %v3981_v33  ;;  %v1149_v33 = vld [vmem:[%s7407_s1 + $0x1d38] sm:$0xff]  ;;  %v3999_v36 = vpack.c.bf16 %v1140_v30, %v1132_v28  ;;  %v1204_v26 = vld [vmem:[%s7407_s1 + $0x1ef0] sm:$0xff]  ;;  %v1219_v28 = vld [vmem:[%s7407_s1 + $0x1f68] sm:$0xff] }
 0x1dd   : > { %v7067_v50 = vpop.f32.mrb[0].mxu1  ;;  %v7069_v51 = vpop.f32.mrb[1].mxu0  ;;  %v1221_v30 = vld [vmem:[%s7407_s1 + $0x1f78] sm:$0xff] }
 0x1de   : > { %v7077_v54 = vpop.f32.mrb[1].mxu1  ;;  %3728 = vmatpush1.bf16.msra.mxu0 %v3727_v39  ;;  %v1154_v39 = vld [vmem:[%s7407_s1 + $0x1d60] sm:$0xff] }
 0x1df   : > { %3984 = vmatpush1.bf16.msra.mxu1 %v3983_v40  ;;  %3730 = vmatprep.subr.bf16.mxu0 %v3729_v41  ;;  %v1148_v40 = vld [vmem:[%s7407_s1 + $0x1d30] sm:$0xff]  ;;  %v4001_v41 = vpack.c.bf16 %v1157_v34, %v1149_v33  ;;  %v3747_v48 = vpack.c.bf16 %v1154_v39, %v1146_v38  ;;  %v3761_v33 = vpack.c.bf16 %v1219_v28, %v1211_v27  ;;  %v1210_v34 = vld [vmem:[%s7407_s1 + $0x1f20] sm:$0xff]  ;;  %v1227_v39 = vld [vmem:[%s7407_s1 + $0x1fa8] sm:$0xff] }
 0x1e0   : > { %v7088_v61 = vpop.f32.mrb[2].mxu0  ;;  %3986 = vmatprep.subr.bf16.mxu1 %v3985_v46  ;;  %v1165_v46 = vld [vmem:[%s7407_s1 + $0x1db8] sm:$0xff]  ;;  %v4003_v49 = vpack.c.bf16 %v1156_v42, %v1148_v40  ;;  %v1220_v38 = vld [vmem:[%s7407_s1 + $0x1f70] sm:$0xff]  ;;  %v1235_v40 = vld [vmem:[%s7407_s1 + $0x1fe8] sm:$0xff] }
 0x1e1   : > { %v4027_v2 = vpack.c.bf16 %v7088_v61, %v7056_v45  ;;  %v7101_v3 = vpop.f32.mrb[2].mxu1  ;;  %v7103_v4 = vpop.f32.mrb[3].mxu0  ;;  %v1237_v42 = vld [vmem:[%s7407_s1 + $0x1ff8] sm:$0xff]  ;;  %v2471_v45 = vld [vmem:[%s7408_s2 + $0x8] sm:$0xff] }
 0x1e2   : > { %v4031_v7 = vpack.c.bf16 %v7101_v3, %v7067_v50  ;;  %v4025_v8 = vpack.c.bf16 %v7103_v4, %v7069_v51  ;;  %v7115_v9 = vpop.f32.mrb[3].mxu1  ;;  %3732 = vmatpush1.bf16.msra.mxu0 %v3731_v55  ;;  %v1170_v55 = vld [vmem:[%s7407_s1 + $0x1de0] sm:$0xff]  ;;  %v4113_v51 = vld [vmem:[%s4448_s11 + $0x70] sm:$0xff]  ;;  %v4122_v4 = vmov 0.0   ;;  %v2473_v61 = vld [vmem:[%s7408_s2 + $0x18] sm:$0xff] }
 0x1e3   : > { %v4029_v11 = vpack.c.bf16 %v7115_v9, %v7077_v54  ;;  %3988 = vmatpush1.bf16.msra.mxu1 %v3987_v56  ;;  %3734 = vmatprep.subr.bf16.mxu0 %v3733_v57  ;;  %v1164_v56 = vld [vmem:[%s7407_s1 + $0x1db0] sm:$0xff]  ;;  %v4005_v57 = vpack.c.bf16 %v1173_v47, %v1165_v46  ;;  %v3751_v0 = vpack.c.bf16 %v1170_v55, %v1162_v53  ;;  %v1226_v47 = vld [vmem:[%s7407_s1 + $0x1fa0] sm:$0xff] }
 0x1e4   : > { %3990 = vmatprep.subr.bf16.mxu1 %v3989_v62  ;;  %v1181_v62 = vld [vmem:[%s7407_s1 + $0x1e38] sm:$0xff]  ;;  %v4007_v1 = vpack.c.bf16 %v1172_v58, %v1164_v56  ;;  %v3765_v46 = vpack.c.bf16 %v1235_v40, %v1227_v39  ;;  %v1236_v53 = vld [vmem:[%s7407_s1 + $0x1ff0] sm:$0xff]  ;;  %v2470_v54 = vld [vmem:[%s7408_s2] sm:$0xff] }
 0x1e5   : > { %v4112_v58 = vld [vmem:[%s4448_s11 + $0x78] sm:$0xff]  ;;  %v2472_v50 = vld [vmem:[%s7408_s2 + $0x10] sm:$0xff] }
 0x1e6   : > { %3736 = vmatpush1.bf16.msra.mxu0 %v3735_v10  ;;  %v1186_v10 = vld [vmem:[%s7407_s1 + $0x1e60] sm:$0xff] }
 0x1e7   : > { %3992 = vmatpush1.bf16.msra.mxu1 %v3991_v12  ;;  %3738 = vmatprep.subr.bf16.mxu0 %v3737_v13  ;;  %v1180_v12 = vld [vmem:[%s7407_s1 + $0x1e30] sm:$0xff]  ;;  %v4009_v13 = vpack.c.bf16 %v1189_v63, %v1181_v62  ;;  %v3755_v19 = vpack.c.bf16 %v1186_v10, %v1178_v6 }
 0x1e8   : > { %3994 = vmatprep.subr.bf16.mxu1 %v3993_v17  ;;  %v1197_v17 = vld [vmem:[%s7407_s1 + $0x1eb8] sm:$0xff]  ;;  %v4011_v20 = vpack.c.bf16 %v1188_v14, %v1180_v12 }
 0x1ea   : > { %3740 = vmatpush1.bf16.msra.mxu0 %v3739_v23  ;;  %v1202_v23 = vld [vmem:[%s7407_s1 + $0x1ee0] sm:$0xff] }
 0x1eb   : > { %3996 = vmatpush1.bf16.msra.mxu1 %v3995_v24  ;;  %3742 = vmatprep.subr.bf16.mxu0 %v3741_v25  ;;  %v1196_v24 = vld [vmem:[%s7407_s1 + $0x1eb0] sm:$0xff]  ;;  %v4013_v25 = vpack.c.bf16 %v1205_v18, %v1197_v17  ;;  %v3759_v31 = vpack.c.bf16 %v1202_v23, %v1194_v22 }
 0x1ec   : > { %3998 = vmatprep.subr.bf16.mxu1 %v3997_v29  ;;  %v1213_v29 = vld [vmem:[%s7407_s1 + $0x1f38] sm:$0xff]  ;;  %v4015_v32 = vpack.c.bf16 %v1204_v26, %v1196_v24 }
 0x1ee   : > { %3744 = vmatpush1.bf16.msra.mxu0 %v3743_v35  ;;  %v1218_v35 = vld [vmem:[%s7407_s1 + $0x1f60] sm:$0xff] }
 0x1ef   : > { %4000 = vmatpush1.bf16.msra.mxu1 %v3999_v36  ;;  %3746 = vmatprep.subr.bf16.mxu0 %v3745_v37  ;;  %v1212_v36 = vld [vmem:[%s7407_s1 + $0x1f30] sm:$0xff]  ;;  %v4017_v37 = vpack.c.bf16 %v1221_v30, %v1213_v29  ;;  %v3763_v43 = vpack.c.bf16 %v1218_v35, %v1210_v34 }
 0x1f0   : > { %4002 = vmatprep.subr.bf16.mxu1 %v4001_v41  ;;  %v1229_v41 = vld [vmem:[%s7407_s1 + $0x1fb8] sm:$0xff]  ;;  %v4019_v44 = vpack.c.bf16 %v1220_v38, %v1212_v36 }
 0x1f2   : > { %3748 = vmatpush1.bf16.msra.mxu0 %v3747_v48  ;;  %v1234_v48 = vld [vmem:[%s7407_s1 + $0x1fe0] sm:$0xff] }
 0x1f3   : > { %4004 = vmatpush1.bf16.msra.mxu1 %v4003_v49  ;;  %3750 = vmatprep.subr.bf16.mxu0 %v3749_v52  ;;  %v4021_v49 = vpack.c.bf16 %v1237_v42, %v1229_v41  ;;  %v1228_v52 = vld [vmem:[%s7407_s1 + $0x1fb0] sm:$0xff]  ;;  %v3767_v55 = vpack.c.bf16 %v1234_v48, %v1226_v47 }
 0x1f4   : > { %4006 = vmatprep.subr.bf16.mxu1 %v4005_v57  ;;  %v4023_v56 = vpack.c.bf16 %v1236_v53, %v1228_v52  ;;  %v4111_v57 = vld [vmem:[%s4448_s11 + $0x30] sm:$0xff] }
 0x1f6   : > { %3752 = vmatpush1.bf16.msra.mxu0 %v3751_v0 }
 0x1f7   : > { %4008 = vmatpush1.bf16.msra.mxu1 %v4007_v1  ;;  %3754 = vmatprep.subr.bf16.mxu0 %v3753_v5  ;;  %v2476_v5 = vlaneseq }
 0x1f8   : > { %4010 = vmatprep.subr.bf16.mxu1 %v4009_v13  ;;  %v7349_v13 = vld [vmem:[%s7409_s3] sm:$0xff] }
 0x1f9   : > { %v7342_v6 = vshrl.u32 %v2476_v5, 7 }
 0x1fa   : > { %3756 = vmatpush1.bf16.msra.mxu0 %v3755_v19 }
 0x1fb   : > { %4012 = vmatpush1.bf16.msra.mxu1 %v4011_v20  ;;  %3758 = vmatprep.subr.bf16.mxu0 %v3757_v21  ;;  %v2478_v10 = vsub.s32 0, %v7342_v6  ;;  %v2486_v12 = vsub.s32 2, %v7342_v6  ;;  %v2482_v14 = vsub.s32 1, %v7342_v6  ;;  %v2490_v15 = vsub.s32 3, %v7342_v6 }
 0x1fc   : > { %4014 = vmatprep.subr.bf16.mxu1 %v4013_v25 }
 0x1fd   : > { %v2479_v16 = vrot.slane %v7349_v13, %v2478_v10  ;;  %v2487_v17 = vrot.slane %v7349_v13, %v2486_v12  ;;  %v2483_v18 = vrot.slane %v7349_v13, %v2482_v14  ;;  %v2491_v19 = vrot.slane %v7349_v13, %v2490_v15 }
 0x1fe   : > { %3760 = vmatpush1.bf16.msra.mxu0 %v3759_v31 }
 0x1ff   : > { %4016 = vmatpush1.bf16.msra.mxu1 %v4015_v32  ;;  %3762 = vmatprep.subr.bf16.mxu0 %v3761_v33 }
 0x200   : > { %4018 = vmatprep.subr.bf16.mxu1 %v4017_v37 }
 0x202   : > { %3764 = vmatpush1.bf16.msra.mxu0 %v3763_v43 }
 0x203   : > { %4020 = vmatpush1.bf16.msra.mxu1 %v4019_v44  ;;  %3766 = vmatprep.subr.bf16.mxu0 %v3765_v46 }
 0x204   : > { %4022 = vmatprep.subr.bf16.mxu1 %v4021_v49 }
 0x206   : > { %3768 = vmatpush1.bf16.msra.mxu0 %v3767_v55 }
 0x207   : > { %4024 = vmatpush1.bf16.msra.mxu1 %v4023_v56  ;;  %4026 = vmatprep.subr.bf16.mxu0 %v4025_v8  ;;  %v2494_v56 = vsub.s32 4, %v7342_v6 }
 0x208   : > { %4030 = vmatprep.subr.bf16.mxu1 %v4029_v11 }
 0x209   : > { %2150 = vmatmul.mubr.f32.vlgmr.msra.gmra.mrb[4].mxu0 %v4111_v57 }
 0x20a   : > { %2458 = vmatmul.mubr.f32.vlgmr.msra.gmra.mrb[4].mxu1 %v4111_v57  ;;  %4028 = vmatpush1.bf16.msra.mxu0 %v4027_v2  ;;  %v2502_v57 = vsub.s32 6, %v7342_v6 }
 0x20b   : > { %4032 = vmatpush1.bf16.msra.mxu1 %v4031_v7  ;;  %2155 = vmatprep.mubr.f32.mxu0 %v4112_v58 }
 0x20c   : > { %2463 = vmatprep.mubr.f32.mxu1 %v4112_v58  ;;  %v2498_v58 = vsub.s32 5, %v7342_v6 }
 0x20d   : > { %2156 = vmatmul.mubr.f32.gmra.mrb[6].mxu0 %v4113_v51 }
 0x20e   : > { %2464 = vmatmul.mubr.f32.gmra.mrb[6].mxu1 %v4113_v51  ;;  %2593 = vmatprep.mubr.f32.mxu0 %v4122_v4  ;;  %v2506_v51 = vsub.s32 7, %v7342_v6 }
 0x20f   : > { %2682 = vmatprep.mubr.f32.mxu1 %v4122_v4 }
 0x211   : > { %2981 = vmatmul.mubr.msk.f32.vlgmr.msra.gmra.mrb[8].mxu0 %vm2516_vm0, %v2470_v54 }
 0x212   : > { %2985 = vmatmul.mubr.msk.f32.vlgmr.msra.gmra.mrb[8].mxu1 %vm2516_vm0, %v2470_v54  ;;  %2599 = vmatprep.mubr.f32.mxu0 %v4122_v4 }
 0x213   : > { %2688 = vmatprep.mubr.f32.mxu1 %v4122_v4 }
 0x215   : > { %2982 = vmatmul.mubr.msk.f32.gmra.mrb[10].mxu0 %vm2516_vm0, %v2471_v45 }
 0x216   : > { %2986 = vmatmul.mubr.msk.f32.gmra.mrb[10].mxu1 %vm2516_vm0, %v2471_v45  ;;  %2605 = vmatprep.mubr.f32.mxu0 %v4122_v4 }
 0x217   : > { %2694 = vmatprep.mubr.f32.mxu1 %v4122_v4 }
 0x219   : > { %2983 = vmatmul.mubr.msk.f32.gmra.mrb[12].mxu0 %vm2516_vm0, %v2472_v50 }
 0x21a   : > { %2987 = vmatmul.mubr.msk.f32.gmra.mrb[12].mxu1 %vm2516_vm0, %v2472_v50  ;;  %2611 = vmatprep.mubr.f32.mxu0 %v4122_v4 }
 0x21b   : > { %2700 = vmatprep.mubr.f32.mxu1 %v4122_v4 }
 0x21d   : > { %2984 = vmatmul.mubr.msk.f32.gmra.mrb[14].mxu0 %vm2516_vm0, %v2473_v61 }
 0x21e   : > { %2988 = vmatmul.mubr.msk.f32.gmra.mrb[14].mxu1 %vm2516_vm0, %v2473_v61  ;;  %2771 = vmatprep.mubr.f32.mxu0 %v4122_v4 }
 0x21f   : > { %2860 = vmatprep.mubr.f32.mxu1 %v4122_v4 }
 0x2dc   : > { %v2151_v2 = vpop.f32.mrb[4].mxu0 }
 0x2dd   : > { %v2459_v3 = vpop.f32.mrb[4].mxu1  ;;  %v2153_v7 = vpop.f32.mrb[5].mxu0 }
 0x2de   : > { %v2461_v8 = vpop.f32.mrb[5].mxu1 }
 0x2e0   : > { %v2157_v9 = vpop.f32.mrb[6].mxu0 }
 0x2e1   : > { %v4035_v11 = vpack.c.bf16 %v2157_v9, %v2151_v2  ;;  %v2465_v59 = vpop.f32.mrb[6].mxu1  ;;  %v2159_v60 = vpop.f32.mrb[7].mxu0 }
 0x2e2   : > { %v4039_v62 = vpack.c.bf16 %v2465_v59, %v2459_v3  ;;  %v4033_v63 = vpack.c.bf16 %v2159_v60, %v2153_v7  ;;  %v2467_v0 = vpop.f32.mrb[7].mxu1 }
 0x2e3   : > { %v4037_v1 = vpack.c.bf16 %v2467_v0, %v2461_v8 }
 0x2e4   : > { %4034 = vmatprep.subr.bf16.mxu0 %v4033_v63  ;;  %v2595_v20 = vpop.f32.mrb[8].mxu0 }
 0x2e5   : > { %4038 = vmatprep.subr.bf16.mxu1 %v4037_v1  ;;  %4036 = vmatpush1.bf16.msra.mxu0 %v4035_v11  ;;  %v2684_v21 = vpop.f32.mrb[8].mxu1  ;;  %v2596_v22 = vadd.f32 %v2595_v20, %v2479_v16  ;;  %v2597_v24 = vpop.f32.mrb[9].mxu0 }
 0x2e6   : > { %4040 = vmatpush1.bf16.msra.mxu1 %v4039_v62  ;;  %v2685_v23 = vadd.f32 %v2684_v21, %v2487_v17  ;;  %v2686_v25 = vpop.f32.mrb[9].mxu1  ;;  %v2598_v26 = vadd.f32 %v2597_v24, %v2483_v18 }
 0x2e7   : > { %v2687_v27 = vadd.f32 %v2686_v25, %v2491_v19  ;;  %2885 = vst [vmem:[%s7361_s27] sm:$0xff] %v2596_v22 }
 0x2e8   : > { %2989 = vmatmul.mubr.msk.f32.vlgmr.msra.gmra.mrb[16].mxu0 %vm2516_vm0, %v2470_v54  ;;  %2887 = vst [vmem:[%s7361_s27 + $0x10] sm:$0xff] %v2685_v23  ;;  %2886 = vst [vmem:[%s7361_s27 + $0x8] sm:$0xff] %v2598_v26  ;;  %v2601_v28 = vpop.f32.mrb[10].mxu0 }
 0x2e9   : > { %2993 = vmatmul.mubr.msk.f32.vlgmr.msra.gmra.mrb[16].mxu1 %vm2516_vm0, %v2470_v54  ;;  %2777 = vmatprep.mubr.f32.mxu0 %v4122_v4  ;;  %2888 = vst [vmem:[%s7361_s27 + $0x18] sm:$0xff] %v2687_v27  ;;  %v2690_v29 = vpop.f32.mrb[10].mxu1  ;;  %v2602_v30 = vadd.f32 %v2601_v28, %v2479_v16  ;;  %v2603_v32 = vpop.f32.mrb[11].mxu0  ;;  %v2503_v54 = vrot.slane %v7349_v13, %v2502_v57 }
 0x2ea   : > { %2866 = vmatprep.mubr.f32.mxu1 %v4122_v4  ;;  %v2691_v31 = vadd.f32 %v2690_v29, %v2487_v17  ;;  %v2692_v33 = vpop.f32.mrb[11].mxu1  ;;  %v2604_v34 = vadd.f32 %v2603_v32, %v2483_v18 }
 0x2eb   : > { %v2693_v35 = vadd.f32 %v2692_v33, %v2491_v19  ;;  %2893 = vst [vmem:[%s7361_s27 + $0x40] sm:$0xff] %v2602_v30 }
 0x2ec   : > { %2990 = vmatmul.mubr.msk.f32.gmra.mrb[18].mxu0 %vm2516_vm0, %v2471_v45  ;;  %2895 = vst [vmem:[%s7361_s27 + $0x50] sm:$0xff] %v2691_v31  ;;  %2894 = vst [vmem:[%s7361_s27 + $0x48] sm:$0xff] %v2604_v34  ;;  %v2607_v36 = vpop.f32.mrb[12].mxu0 }
 0x2ed   : > { %2994 = vmatmul.mubr.msk.f32.gmra.mrb[18].mxu1 %vm2516_vm0, %v2471_v45  ;;  %2783 = vmatprep.mubr.f32.mxu0 %v4122_v4  ;;  %2896 = vst [vmem:[%s7361_s27 + $0x58] sm:$0xff] %v2693_v35  ;;  %v2696_v37 = vpop.f32.mrb[12].mxu1  ;;  %v2608_v38 = vadd.f32 %v2607_v36, %v2479_v16  ;;  %v2609_v40 = vpop.f32.mrb[13].mxu0  ;;  %v2499_v45 = vrot.slane %v7349_v13, %v2498_v58 }
 0x2ee   : > { %2872 = vmatprep.mubr.f32.mxu1 %v4122_v4  ;;  %v2697_v39 = vadd.f32 %v2696_v37, %v2487_v17  ;;  %v2698_v41 = vpop.f32.mrb[13].mxu1  ;;  %v2610_v42 = vadd.f32 %v2609_v40, %v2483_v18 }
 0x2ef   : > { %v2699_v43 = vadd.f32 %v2698_v41, %v2491_v19  ;;  %2901 = vst [vmem:[%s7361_s27 + $0x80] sm:$0xff] %v2608_v38 }
 0x2f0   : > { %2991 = vmatmul.mubr.msk.f32.gmra.mrb[20].mxu0 %vm2516_vm0, %v2472_v50  ;;  %2903 = vst [vmem:[%s7361_s27 + $0x90] sm:$0xff] %v2697_v39  ;;  %2902 = vst [vmem:[%s7361_s27 + $0x88] sm:$0xff] %v2610_v42  ;;  %v2613_v44 = vpop.f32.mrb[14].mxu0 }
 0x2f1   : > { %2995 = vmatmul.mubr.msk.f32.gmra.mrb[20].mxu1 %vm2516_vm0, %v2472_v50  ;;  %2789 = vmatprep.mubr.f32.mxu0 %v4122_v4  ;;  %2904 = vst [vmem:[%s7361_s27 + $0x98] sm:$0xff] %v2699_v43  ;;  %v2702_v46 = vpop.f32.mrb[14].mxu1  ;;  %v2614_v47 = vadd.f32 %v2613_v44, %v2479_v16  ;;  %v2615_v49 = vpop.f32.mrb[15].mxu0  ;;  %v2507_v50 = vrot.slane %v7349_v13, %v2506_v51 }
 0x2f2   : > { %2878 = vmatprep.mubr.f32.mxu1 %v4122_v4  ;;  %v2703_v48 = vadd.f32 %v2702_v46, %v2487_v17  ;;  %v2704_v52 = vpop.f32.mrb[15].mxu1  ;;  %v2616_v53 = vadd.f32 %v2615_v49, %v2483_v18  ;;  %v2495_v4 = vrot.slane %v7349_v13, %v2494_v56 }
 0x2f3   : > { %v2705_v55 = vadd.f32 %v2704_v52, %v2491_v19  ;;  %2909 = vst [vmem:[%s7361_s27 + $0xc0] sm:$0xff] %v2614_v47 }
 0x2f4   : > { %2992 = vmatmul.mubr.msk.f32.gmra.mrb[22].mxu0 %vm2516_vm0, %v2473_v61  ;;  %2911 = vst [vmem:[%s7361_s27 + $0xd0] sm:$0xff] %v2703_v48  ;;  %2910 = vst [vmem:[%s7361_s27 + $0xc8] sm:$0xff] %v2616_v53 }
 0x2f5   : > { %2996 = vmatmul.mubr.msk.f32.gmra.mrb[22].mxu1 %vm2516_vm0, %v2473_v61  ;;  %2912 = vst [vmem:[%s7361_s27 + $0xd8] sm:$0xff] %v2705_v55 }
 0x3bb   : > { %v2773_v61 = vpop.f32.mrb[16].mxu0 }
 0x3bc   : > { %v2774_v2 = vadd.f32 %v2773_v61, %v2495_v4  ;;  %v2862_v3 = vpop.f32.mrb[16].mxu1  ;;  %v2775_v7 = vpop.f32.mrb[17].mxu0 }
 0x3bd   : > { %v2863_v8 = vadd.f32 %v2862_v3, %v2503_v54  ;;  %v2776_v9 = vadd.f32 %v2775_v7, %v2499_v45  ;;  %v2864_v11 = vpop.f32.mrb[17].mxu1 }
 0x3be   : > { %2889 = vst [vmem:[%s7361_s27 + $0x20] sm:$0xff] %v2774_v2  ;;  %v2865_v59 = vadd.f32 %v2864_v11, %v2507_v50 }
 0x3bf   : > { %2891 = vst [vmem:[%s7361_s27 + $0x30] sm:$0xff] %v2863_v8  ;;  %2890 = vst [vmem:[%s7361_s27 + $0x28] sm:$0xff] %v2776_v9  ;;  %v2779_v60 = vpop.f32.mrb[18].mxu0 }
 0x3c0   : > { %2892 = vst [vmem:[%s7361_s27 + $0x38] sm:$0xff] %v2865_v59  ;;  %v2780_v62 = vadd.f32 %v2779_v60, %v2495_v4  ;;  %v2868_v63 = vpop.f32.mrb[18].mxu1  ;;  %v2781_v0 = vpop.f32.mrb[19].mxu0 }
 0x3c1   : > { %v2869_v1 = vadd.f32 %v2868_v63, %v2503_v54  ;;  %v2782_v5 = vadd.f32 %v2781_v0, %v2499_v45  ;;  %v2870_v6 = vpop.f32.mrb[19].mxu1 }
 0x3c2   : > { %2897 = vst [vmem:[%s7361_s27 + $0x60] sm:$0xff] %v2780_v62  ;;  %v2871_v10 = vadd.f32 %v2870_v6, %v2507_v50 }
 0x3c3   : > { %2899 = vst [vmem:[%s7361_s27 + $0x70] sm:$0xff] %v2869_v1  ;;  %2898 = vst [vmem:[%s7361_s27 + $0x68] sm:$0xff] %v2782_v5  ;;  %v2785_v12 = vpop.f32.mrb[20].mxu0 }
 0x3c4   : > { %2900 = vst [vmem:[%s7361_s27 + $0x78] sm:$0xff] %v2871_v10  ;;  %v2786_v13 = vadd.f32 %v2785_v12, %v2495_v4  ;;  %v2874_v14 = vpop.f32.mrb[20].mxu1  ;;  %v2787_v15 = vpop.f32.mrb[21].mxu0 }
 0x3c5   : > { %v2875_v16 = vadd.f32 %v2874_v14, %v2503_v54  ;;  %v2788_v17 = vadd.f32 %v2787_v15, %v2499_v45  ;;  %v2876_v18 = vpop.f32.mrb[21].mxu1 }
 0x3c6   : > { %2905 = vst [vmem:[%s7361_s27 + $0xa0] sm:$0xff] %v2786_v13  ;;  %v2877_v19 = vadd.f32 %v2876_v18, %v2507_v50 }
 0x3c7   : > { %2907 = vst [vmem:[%s7361_s27 + $0xb0] sm:$0xff] %v2875_v16  ;;  %2906 = vst [vmem:[%s7361_s27 + $0xa8] sm:$0xff] %v2788_v17  ;;  %v2791_v20 = vpop.f32.mrb[22].mxu0 }
 0x3c8   : > { %2908 = vst [vmem:[%s7361_s27 + $0xb8] sm:$0xff] %v2877_v19  ;;  %v2792_v21 = vadd.f32 %v2791_v20, %v2495_v4  ;;  %v2880_v22 = vpop.f32.mrb[22].mxu1  ;;  %v2793_v23 = vpop.f32.mrb[23].mxu0 }
 0x3c9   : > { %v2881_v24 = vadd.f32 %v2880_v22, %v2503_v54  ;;  %v2794_v25 = vadd.f32 %v2793_v23, %v2499_v45  ;;  %v2882_v26 = vpop.f32.mrb[23].mxu1 }
 0x3ca   : > { %2913 = vst [vmem:[%s7361_s27 + $0xe0] sm:$0xff] %v2792_v21  ;;  %v2883_v27 = vadd.f32 %v2882_v26, %v2507_v50 }
 0x3cb   : > { %2915 = vst [vmem:[%s7361_s27 + $0xf0] sm:$0xff] %v2881_v24  ;;  %2914 = vst [vmem:[%s7361_s27 + $0xe8] sm:$0xff] %v2794_v25 }
 0x3cc   : > { %2916 = vst [vmem:[%s7361_s27 + $0xf8] sm:$0xff] %v2883_v27 }
 0x3cd PF: > { %s14_s15 = sadd.s32 1, %s4120_s15  }
 0x3ce   : > { %p11_p4 = scmp.ge.s32.totalorder %s14_s15, 4  }
 0x3d0   :  { %13 = sbr.rel (!%p11_p4) target bundleno = 1 (0x1), region = 66 }

</bundles_post_ra>
